<compile_context>
chip_gen: v5e
topology: v5e:2x2
jax: 0.10.0
libtpu: 0.0.40
codegen_flags: <defaults>
</compile_context>

<pallas_src>
import math
from functools import partial

import jax
import jax.numpy as jnp
from jax import lax
from jax.experimental import pallas as pl
from jax.experimental.pallas import tpu as pltpu

INF = 1e10
_VMEM_LIMIT = 32 * 1024 * 1024  # fits v5e/v6e/v7x scoped budgets with headroom


def _cparams(n_axes=1):
    return pltpu.CompilerParams(
        dimension_semantics=("parallel",) * n_axes,
        vmem_limit_bytes=_VMEM_LIMIT)


def _m_tile(M, target=256):
    """Largest row-tile <= target that divides M (multiple of 8 when tiling)."""
    if M <= target:
        return M
    start = target - (target % 8)
    for t in range(start, 7, -8):
        if M % t == 0:
            return t
    return M  # fall back to a single block


# ----------------------------- Pallas kernels ------------------------------

def _fused_proj_kernel(x_ref, w_ref, b_ref, *o_refs):
    # One matmul x @ [W_0 | W_1 | ...] + b, results split to n_out lane-dense outputs.
    o = jnp.dot(x_ref[...].astype(jnp.bfloat16), w_ref[...],
                preferred_element_type=jnp.float32) + b_ref[...]
    D = o_refs[0].shape[-1]
    for j, oref in enumerate(o_refs):
        oref[...] = o[:, j * D:(j + 1) * D]


def _attn_wo_kernel(q_ref, k_ref, v_ref, mask_ref, wo_ref, bo_ref, o_ref,
                    *, n_heads, inv_scale, causal):
    # One batch element, all heads: out = softmax(q k^T / scale + mask) v, then @ Wo + bo.
    Tq = q_ref.shape[1]
    D = q_ref.shape[2]
    Tk = k_ref.shape[1]
    Dh = D // n_heads

    q = q_ref[0]                       # (Tq, D) f32
    k = k_ref[0]                       # (Tk, D) f32
    v = v_ref[0]                       # (Tk, D) f32

    # Additive mask built in-kernel (0 keep, -INF masked).  Note: the reference
    # divides (scores - INF*mask) by scale; here 1/scale is folded into q and the
    # -INF stays unscaled -- softmax output is numerically identical (masked -> 0).
    neg = (mask_ref[0] - 1.0) * INF    # (1, Tk)
    if causal:
        rows = lax.broadcasted_iota(jnp.int32, (Tq, Tk), 0)
        cols = lax.broadcasted_iota(jnp.int32, (Tq, Tk), 1)
        neg = neg - jnp.where(cols > rows, INF, 0.0)

    qs = (q * inv_scale).astype(jnp.bfloat16)
    kb = k.astype(jnp.bfloat16)
    vb = v.astype(jnp.bfloat16)

    heads = []
    for h in range(n_heads):           # static unroll over heads
        sl = slice(h * Dh, (h + 1) * Dh)
        # NT matmul (contract last axes) -> no explicit transpose of K.
        s = lax.dot_general(qs[:, sl], kb[:, sl], (((1,), (1,)), ((), ())),
                            preferred_element_type=jnp.float32)      # (Tq, Tk)
        s = s + neg
        m = jnp.max(s, axis=-1, keepdims=True)
        e = jnp.exp(s - m)
        p = e * pl.reciprocal(jnp.sum(e, axis=-1, keepdims=True), approx=True)
        heads.append(jnp.dot(p.astype(jnp.bfloat16), vb[:, sl],
                             preferred_element_type=jnp.float32))     # (Tq, Dh)

    merged = jnp.concatenate(heads, axis=-1).astype(jnp.bfloat16)     # (Tq, D)
    o_ref[0] = jnp.dot(merged, wo_ref[...],
                       preferred_element_type=jnp.float32) + bo_ref[...]


def _layernorm(h, gamma, beta, eps, d):
    # torch LayerNorm variant: unbiased std, eps added to std.  Single-pass stats in f32.
    s1 = jnp.sum(h, axis=-1, keepdims=True)
    s2 = jnp.sum(h * h, axis=-1, keepdims=True)
    mean = s1 * (1.0 / d)
    var = jnp.maximum((s2 - s1 * mean) * (1.0 / (d - 1)), 0.0)
    std = jnp.sqrt(var)
    return gamma * (h - mean) / (std + eps) + beta


def _sigmoid(x):
    # tanh form: stable everywhere and maps onto the EUP.
    return 0.5 * (jnp.tanh(0.5 * x) + 1.0)


def _gate_highway_ln_kernel(x_ref, y_ref, w1_ref, b1_ref, w2_ref, b2_ref,
                            gamma_ref, beta_ref, o_ref, *, eps, d):
    # g = sigmoid(FFN_gate(x)); out = LayerNorm(x*g + y*(1-g)).  Gate FFN fused in.
    x = x_ref[...]
    y = y_ref[...]
    xb = x.astype(jnp.bfloat16)
    h1 = jnp.dot(xb, w1_ref[...], preferred_element_type=jnp.float32) + b1_ref[...]
    h1 = jnp.maximum(h1, 0.0)
    glog = jnp.dot(h1.astype(jnp.bfloat16), w2_ref[...],
                   preferred_element_type=jnp.float32) + b2_ref[...]
    g = _sigmoid(glog)
    h = x * g + y * (1.0 - g)
    o_ref[...] = _layernorm(h, gamma_ref[...], beta_ref[...], eps, d)


def _ffn_highway_ln_kernel(x_ref, wf1_ref, bf1_ref, wf2_ref, bf2_ref,
                           wg1_ref, bg1_ref, wg2_ref, bg2_ref,
                           gamma_ref, beta_ref, o_ref, *, eps, d):
    # Entire feed-forward sub-layer: y = FFN(x); g = sigmoid(FFN_gate(x));
    # out = LayerNorm(x*g + y*(1-g)).
    x = x_ref[...]
    xb = x.astype(jnp.bfloat16)
    f = jnp.maximum(jnp.dot(xb, wf1_ref[...],
                            preferred_element_type=jnp.float32) + bf1_ref[...], 0.0)
    y = jnp.dot(f.astype(jnp.bfloat16), wf2_ref[...],
                preferred_element_type=jnp.float32) + bf2_ref[...]
    g1 = jnp.maximum(jnp.dot(xb, wg1_ref[...],
                             preferred_element_type=jnp.float32) + bg1_ref[...], 0.0)
    glog = jnp.dot(g1.astype(jnp.bfloat16), wg2_ref[...],
                   preferred_element_type=jnp.float32) + bg2_ref[...]
    g = _sigmoid(glog)
    h = x * g + y * (1.0 - g)
    o_ref[...] = _layernorm(h, gamma_ref[...], beta_ref[...], eps, d)


# ----------------------------- kernel wrappers ------------------------------

def fused_project(x, w, b, n_out):
    """x: (B, T, D) f32, w: (D, n_out*D) bf16, b: (1, n_out*D) f32 -> n_out x (B,T,D)."""
    B, T, D = x.shape
    M = B * T
    TM = _m_tile(M)
    x2 = x.reshape(M, D)
    outs = pl.pallas_call(
        _fused_proj_kernel,
        grid=(M // TM,),
        in_specs=[
            pl.BlockSpec((TM, D), lambda i: (i, 0)),
            pl.BlockSpec((D, n_out * D), lambda i: (0, 0)),
            pl.BlockSpec((1, n_out * D), lambda i: (0, 0)),
        ],
        out_specs=tuple(pl.BlockSpec((TM, D), lambda i: (i, 0)) for _ in range(n_out)),
        out_shape=tuple(jax.ShapeDtypeStruct((M, D), jnp.float32) for _ in range(n_out)),
        compiler_params=_cparams(1),
    )(x2, w, b)
    return tuple(o.reshape(B, T, D) for o in outs)


def attention_wo(q, k, v, key_mask, wo, bo, n_heads, scale, causal):
    """q: (B,Tq,D), k/v: (B,Tk,D), key_mask: (B,Tk) (1 keep / 0 mask)."""
    B, Tq, D = q.shape
    Tk = k.shape[1]
    mask3 = key_mask.astype(jnp.float32).reshape(B, 1, Tk)
    return pl.pallas_call(
        partial(_attn_wo_kernel, n_heads=n_heads, inv_scale=1.0 / scale,
                causal=bool(causal and Tq == Tk)),
        grid=(B,),
        in_specs=[
            pl.BlockSpec((1, Tq, D), lambda b: (b, 0, 0)),
            pl.BlockSpec((1, Tk, D), lambda b: (b, 0, 0)),
            pl.BlockSpec((1, Tk, D), lambda b: (b, 0, 0)),
            pl.BlockSpec((1, 1, Tk), lambda b: (b, 0, 0)),
            pl.BlockSpec((D, D), lambda b: (0, 0)),
            pl.BlockSpec((1, D), lambda b: (0, 0)),
        ],
        out_specs=pl.BlockSpec((1, Tq, D), lambda b: (b, 0, 0)),
        out_shape=jax.ShapeDtypeStruct((B, Tq, D), jnp.float32),
        compiler_params=_cparams(1),
    )(q, k, v, mask3, wo, bo)


def gate_highway_ln(x_pos, layer_out, p):
    """LayerNorm(x_pos * sigmoid(FFN_gate(x_pos)) + layer_out * (1 - gate))."""
    B, T, D = x_pos.shape
    M = B * T
    H = p["gate_w1"].shape[1]
    TM = _m_tile(M)
    out = pl.pallas_call(
        partial(_gate_highway_ln_kernel, eps=1e-6, d=D),
        grid=(M // TM,),
        in_specs=[
            pl.BlockSpec((TM, D), lambda i: (i, 0)),
            pl.BlockSpec((TM, D), lambda i: (i, 0)),
            pl.BlockSpec((D, H), lambda i: (0, 0)),
            pl.BlockSpec((1, H), lambda i: (0, 0)),
            pl.BlockSpec((H, D), lambda i: (0, 0)),
            pl.BlockSpec((1, D), lambda i: (0, 0)),
            pl.BlockSpec((1, D), lambda i: (0, 0)),
            pl.BlockSpec((1, D), lambda i: (0, 0)),
        ],
        out_specs=pl.BlockSpec((TM, D), lambda i: (i, 0)),
        out_shape=jax.ShapeDtypeStruct((M, D), jnp.float32),
        compiler_params=_cparams(1),
    )(x_pos.reshape(M, D), layer_out.reshape(M, D),
      p["gate_w1"], p["gate_b1"], p["gate_w2"], p["gate_b2"],
      p["gamma"], p["beta"])
    return out.reshape(B, T, D)


def ffn_highway_ln(x, p):
    """Whole feed-forward sub-layer in one kernel."""
    B, T, D = x.shape
    M = B * T
    H = p["ffn_w1"].shape[1]
    TM = _m_tile(M)
    out = pl.pallas_call(
        partial(_ffn_highway_ln_kernel, eps=1e-6, d=D),
        grid=(M // TM,),
        in_specs=[
            pl.BlockSpec((TM, D), lambda i: (i, 0)),
            pl.BlockSpec((D, H), lambda i: (0, 0)),
            pl.BlockSpec((1, H), lambda i: (0, 0)),
            pl.BlockSpec((H, D), lambda i: (0, 0)),
            pl.BlockSpec((1, D), lambda i: (0, 0)),
            pl.BlockSpec((D, H), lambda i: (0, 0)),
            pl.BlockSpec((1, H), lambda i: (0, 0)),
            pl.BlockSpec((H, D), lambda i: (0, 0)),
            pl.BlockSpec((1, D), lambda i: (0, 0)),
            pl.BlockSpec((1, D), lambda i: (0, 0)),
            pl.BlockSpec((1, D), lambda i: (0, 0)),
        ],
        out_specs=pl.BlockSpec((TM, D), lambda i: (i, 0)),
        out_shape=jax.ShapeDtypeStruct((M, D), jnp.float32),
        compiler_params=_cparams(1),
    )(x.reshape(M, D),
      p["ffn_w1"], p["ffn_b1"], p["ffn_w2"], p["ffn_b2"],
      p["gate_w1"], p["gate_b1"], p["gate_w2"], p["gate_b2"],
      p["gamma"], p["beta"])
    return out.reshape(B, T, D)


# ------------------------------- decoder glue --------------------------------

def positional_encodings(T, D):
    positions = jnp.arange(T, dtype=jnp.float32)
    channels = jnp.arange(0, D, 2, dtype=jnp.float32) / D
    channels = 1.0 / (10000.0 ** channels)
    enc = positions[:, None] * channels[None, :]               # (T, D//2)
    enc = jnp.stack([jnp.sin(enc), jnp.cos(enc)], axis=-1)     # (T, D//2, 2)
    return enc.reshape(T, D)


def decoder_layer(x, enc, mask_src, mask_trg, p, n_heads, d_model):
    scale = math.sqrt(d_model)  # Attention uses d_key = d_model, not D/heads

    # --- causal self-attention + highway ---
    sp = p["selfattn"]
    q, k, v = fused_project(x, sp["wqkv"], sp["bqkv"], 3)
    sa = attention_wo(q, k, v, mask_trg, sp["wo"], sp["bo"], n_heads, scale, causal=True)
    x = gate_highway_ln(x, sa, sp)

    # --- cross-attention over the (last) encoder state + highway ---
    cp = p["attention"]
    (q,) = fused_project(x, cp["wq"], cp["bq"], 1)
    k, v = fused_project(enc, cp["wkv"], cp["bkv"], 2)
    ca = attention_wo(q, k, v, mask_src, cp["wo"], cp["bo"], n_heads, scale, causal=False)
    x = gate_highway_ln(x, ca, cp)

    # --- feed-forward highway (single fused kernel) ---
    x = ffn_highway_ln(x, p["feedforward"])
    return x


def decoder_forward(tokens, encoding, mask_src, mask_trg, params, d_model, n_heads):
    # token embedding via tied output weights: F.embedding(x, out.weight * sqrt(d_model))
    embed_w = params["out_weight"] * math.sqrt(d_model)        # (vocab, d_model) f32
    x = jnp.take(embed_w, tokens, axis=0)                      # (B, T, D)
    x = x + positional_encodings(x.shape[1], d_model)[None]
    # TODO(synk): nn.Dropout is identity here (eval mode); stochastic dropout not implemented.
    B, Tt, _ = x.shape
    Ts = encoding[-1].shape[1]
    if mask_src is None:
        mask_src = jnp.ones((B, Ts), jnp.float32)
    if mask_trg is None:
        mask_trg = jnp.ones((B, Tt), jnp.float32)
    enc = encoding[-1]                                         # enc_last=True
    for lp in params["layers"]:
        x = decoder_layer(x, enc, mask_src, mask_trg, lp, n_heads, d_model)
    return x


# ------------------------------- param init ---------------------------------
# Mirrors the PyTorch init: Linear weight ~ U(-1/sqrt(d_in), 1/sqrt(d_in)), bias = 0.
# Weights are stored pre-fused and cast to bf16 (MXU operands); biases/LN params in f32.

def _init_w(key, d_in, d_out):
    stdv = 1.0 / math.sqrt(d_in)
    return jax.random.uniform(key, (d_in, d_out), jnp.float32, -stdv, stdv)


def init_gate_ln(key, d_model, d_hidden):
    k1, k2 = jax.random.split(key)
    return {
        "gate_w1": _init_w(k1, d_model, d_hidden).astype(jnp.bfloat16),
        "gate_b1": jnp.zeros((1, d_hidden), jnp.float32),
        "gate_w2": _init_w(k2, d_hidden, d_model).astype(jnp.bfloat16),
        "gate_b2": jnp.zeros((1, d_model), jnp.float32),
        "gamma": jnp.ones((1, d_model), jnp.float32),
        "beta": jnp.zeros((1, d_model), jnp.float32),
    }


def init_mh_self(key, d_model):
    ks = jax.random.split(key, 4)
    wq, wk, wv, wo = (_init_w(k, d_model, d_model) for k in ks)
    return {
        "wqkv": jnp.concatenate([wq, wk, wv], axis=1).astype(jnp.bfloat16),
        "bqkv": jnp.zeros((1, 3 * d_model), jnp.float32),
        "wo": wo.astype(jnp.bfloat16),
        "bo": jnp.zeros((1, d_model), jnp.float32),
    }


def init_mh_cross(key, d_model):
    ks = jax.random.split(key, 4)
    wq, wk, wv, wo = (_init_w(k, d_model, d_model) for k in ks)
    return {
        "wq": wq.astype(jnp.bfloat16),
        "bq": jnp.zeros((1, d_model), jnp.float32),
        "wkv": jnp.concatenate([wk, wv], axis=1).astype(jnp.bfloat16),
        "bkv": jnp.zeros((1, 2 * d_model), jnp.float32),
        "wo": wo.astype(jnp.bfloat16),
        "bo": jnp.zeros((1, d_model), jnp.float32),
    }


def init_ffn_sublayer(key, d_model, d_hidden):
    k1, k2, k3 = jax.random.split(key, 3)
    return {
        "ffn_w1": _init_w(k1, d_model, d_hidden).astype(jnp.bfloat16),
        "ffn_b1": jnp.zeros((1, d_hidden), jnp.float32),
        "ffn_w2": _init_w(k2, d_hidden, d_model).astype(jnp.bfloat16),
        "ffn_b2": jnp.zeros((1, d_model), jnp.float32),
        **init_gate_ln(k3, d_model, d_hidden),
    }


def init_decoder(key, vocab, d_model, d_hidden, n_layers):
    keys = jax.random.split(key, n_layers + 1)
    stdv = 1.0 / math.sqrt(d_model)
    out_weight = jax.random.uniform(keys[0], (vocab, d_model), jnp.float32, -stdv, stdv)
    layers = []
    for l in range(n_layers):
        k1, k2, k3, k4, k5 = jax.random.split(keys[l + 1], 5)
        layers.append({
            "selfattn": {**init_mh_self(k1, d_model), **init_gate_ln(k2, d_model, d_hidden)},
            "attention": {**init_mh_cross(k3, d_model), **init_gate_ln(k4, d_model, d_hidden)},
            "feedforward": init_ffn_sublayer(k5, d_model, d_hidden),
        })
    return {"out_weight": out_weight, "layers": layers}


# ---------------------------------- main -------------------------------------

if __name__ == "__main__":
    B, Tt, Ts = 2, 8, 8
    d_model, d_hidden, n_heads, n_layers, vocab = 32, 64, 4, 2, 50

    key = jax.random.PRNGKey(0)
    k_params, k_tok, k_enc = jax.random.split(key, 3)

    params = init_decoder(k_params, vocab, d_model, d_hidden, n_layers)

    tokens = jax.random.randint(k_tok, (B, Tt), 0, vocab)                 # (B, Tt) int ids
    enc_keys = jax.random.split(k_enc, n_layers + 1)
    encoding = [jax.random.normal(k, (B, Ts, d_model), jnp.float32) for k in enc_keys]

    # 1.0 = keep, 0.0 = masked (same convention as the PyTorch code)
    mask_src = jnp.ones((B, Ts), jnp.float32).at[1, -2:].set(0.0)
    mask_trg = jnp.ones((B, Tt), jnp.float32).at[1, -1:].set(0.0)

    fwd = jax.jit(partial(decoder_forward, d_model=d_model, n_heads=n_heads))
    out = fwd(tokens, encoding, mask_src, mask_trg, params)
    jax.block_until_ready(out)
    assert out.shape == (B, Tt, d_model)
    print("KERNEL_OK")
</pallas_src>

<mosaic_0001>
module attributes {stable_mosaic.version = 11 : i64} {
  func.func @_fused_proj_kernel(%arg0: i32, %arg1: memref<16x32xf32, #tpu.memory_space<vmem>>, %arg2: memref<32x96xbf16, #tpu.memory_space<vmem>>, %arg3: memref<1x96xf32, #tpu.memory_space<vmem>>, %arg4: memref<16x32xf32, #tpu.memory_space<vmem>>, %arg5: memref<16x32xf32, #tpu.memory_space<vmem>>, %arg6: memref<16x32xf32, #tpu.memory_space<vmem>>) attributes {dimension_semantics = [#tpu.dimension_semantics<parallel>], iteration_bounds = array<i64: 1>, scalar_prefetch = 0 : i64, scratch_operands = 0 : i64, tpu.core_type = #tpu.core_type<tc>, window_params = [{transform_indices = @transform_0, window_bounds = array<i64: 16, 32>}, {pipeline_mode = #tpu.pipeline_mode<synchronous>, transform_indices = @transform_1, window_bounds = array<i64: 32, 96>}, {pipeline_mode = #tpu.pipeline_mode<synchronous>, transform_indices = @transform_2, window_bounds = array<i64: 1, 96>}, {transform_indices = @transform_3, window_bounds = array<i64: 16, 32>}, {transform_indices = @transform_4, window_bounds = array<i64: 16, 32>}, {transform_indices = @transform_5, window_bounds = array<i64: 16, 32>}]} {
    %c0 = arith.constant 0 : index
    %c0_0 = arith.constant 0 : index
    %0 = vector.load %arg1[%c0, %c0_0] : memref<16x32xf32, #tpu.memory_space<vmem>>, vector<16x32xf32>
    %1 = arith.truncf %0 : vector<16x32xf32> to vector<16x32xbf16>
    %c0_1 = arith.constant 0 : index
    %c0_2 = arith.constant 0 : index
    %2 = vector.load %arg2[%c0_1, %c0_2] : memref<32x96xbf16, #tpu.memory_space<vmem>>, vector<32x96xbf16>
    %cst = arith.constant dense<0.000000e+00> : vector<16x96xf32>
    %3 = tpu.matmul %1, %2, %cst {dimension_numbers = #tpu.dot_dimension_numbers<[1], [0], [0], [1], [0, 0, 1, 1], [], []>} : vector<16x32xbf16>, vector<32x96xbf16>, vector<16x96xf32> -> vector<16x96xf32>
    %c0_3 = arith.constant 0 : index
    %c0_4 = arith.constant 0 : index
    %4 = vector.load %arg3[%c0_3, %c0_4] : memref<1x96xf32, #tpu.memory_space<vmem>>, vector<1x96xf32>
    %5 = vector.broadcast %4 : vector<1x96xf32> to vector<16x96xf32>
    %6 = arith.addf %3, %5 : vector<16x96xf32>
    %7 = vector.extract_strided_slice %6 {offsets = [0, 0], sizes = [16, 32], strides = [1, 1]} : vector<16x96xf32> to vector<16x32xf32>
    %c0_5 = arith.constant 0 : index
    %c0_6 = arith.constant 0 : index
    %8 = vector.load %arg4[%c0_5, %c0_6] : memref<16x32xf32, #tpu.memory_space<vmem>>, vector<16x32xf32>
    tpu.vector_store %arg4[%c0_5, %c0_6], %7 {strides = array<i32>} : memref<16x32xf32, #tpu.memory_space<vmem>>, vector<16x32xf32>,
    %9 = vector.extract_strided_slice %6 {offsets = [0, 32], sizes = [16, 32], strides = [1, 1]} : vector<16x96xf32> to vector<16x32xf32>
    %c0_7 = arith.constant 0 : index
    %c0_8 = arith.constant 0 : index
    %10 = vector.load %arg5[%c0_7, %c0_8] : memref<16x32xf32, #tpu.memory_space<vmem>>, vector<16x32xf32>
    tpu.vector_store %arg5[%c0_7, %c0_8], %9 {strides = array<i32>} : memref<16x32xf32, #tpu.memory_space<vmem>>, vector<16x32xf32>,
    %11 = vector.extract_strided_slice %6 {offsets = [0, 64], sizes = [16, 32], strides = [1, 1]} : vector<16x96xf32> to vector<16x32xf32>
    %c0_9 = arith.constant 0 : index
    %c0_10 = arith.constant 0 : index
    %12 = vector.load %arg6[%c0_9, %c0_10] : memref<16x32xf32, #tpu.memory_space<vmem>>, vector<16x32xf32>
    tpu.vector_store %arg6[%c0_9, %c0_10], %11 {strides = array<i32>} : memref<16x32xf32, #tpu.memory_space<vmem>>, vector<16x32xf32>,
    return
  }
  func.func @transform_0(%arg0: i32) -> (i32, i32) {
    %c0_i32 = arith.constant 0 : i32
    %c0_i32_0 = arith.constant 0 : i32
    return %arg0, %c0_i32 : i32, i32
  }
  func.func @transform_1(%arg0: i32) -> (i32, i32) {
    %c0_i32 = arith.constant 0 : i32
    %c0_i32_0 = arith.constant 0 : i32
    %c0_i32_1 = arith.constant 0 : i32
    return %c0_i32, %c0_i32_0 : i32, i32
  }
  func.func @transform_2(%arg0: i32) -> (i32, i32) {
    %c0_i32 = arith.constant 0 : i32
    %c0_i32_0 = arith.constant 0 : i32
    %c0_i32_1 = arith.constant 0 : i32
    return %c0_i32, %c0_i32_0 : i32, i32
  }
  func.func @transform_3(%arg0: i32) -> (i32, i32) {
    %c0_i32 = arith.constant 0 : i32
    %c0_i32_0 = arith.constant 0 : i32
    return %arg0, %c0_i32 : i32, i32
  }
  func.func @transform_4(%arg0: i32) -> (i32, i32) {
    %c0_i32 = arith.constant 0 : i32
    %c0_i32_0 = arith.constant 0 : i32
    return %arg0, %c0_i32 : i32, i32
  }
  func.func @transform_5(%arg0: i32) -> (i32, i32) {
    %c0_i32 = arith.constant 0 : i32
    %c0_i32_0 = arith.constant 0 : i32
    return %arg0, %c0_i32 : i32, i32
  }
}

module attributes {stable_mosaic.version = 11 : i64} {
  func.func @_fused_proj_kernel(%arg0: i32, %arg1: memref<16x32xf32, #tpu.memory_space<vmem>>, %arg2: memref<32x32xbf16, #tpu.memory_space<vmem>>, %arg3: memref<1x32xf32, #tpu.memory_space<vmem>>, %arg4: memref<16x32xf32, #tpu.memory_space<vmem>>) attributes {dimension_semantics = [#tpu.dimension_semantics<parallel>], iteration_bounds = array<i64: 1>, scalar_prefetch = 0 : i64, scratch_operands = 0 : i64, tpu.core_type = #tpu.core_type<tc>, window_params = [{transform_indices = @transform_0, window_bounds = array<i64: 16, 32>}, {pipeline_mode = #tpu.pipeline_mode<synchronous>, transform_indices = @transform_1, window_bounds = array<i64: 32, 32>}, {pipeline_mode = #tpu.pipeline_mode<synchronous>, transform_indices = @transform_2, window_bounds = array<i64: 1, 32>}, {transform_indices = @transform_3, window_bounds = array<i64: 16, 32>}]} {
    %c0 = arith.constant 0 : index
    %c0_0 = arith.constant 0 : index
    %0 = vector.load %arg1[%c0, %c0_0] : memref<16x32xf32, #tpu.memory_space<vmem>>, vector<16x32xf32>
    %1 = arith.truncf %0 : vector<16x32xf32> to vector<16x32xbf16>
    %c0_1 = arith.constant 0 : index
    %c0_2 = arith.constant 0 : index
    %2 = vector.load %arg2[%c0_1, %c0_2] : memref<32x32xbf16, #tpu.memory_space<vmem>>, vector<32x32xbf16>
    %cst = arith.constant dense<0.000000e+00> : vector<16x32xf32>
    %3 = tpu.matmul %1, %2, %cst {dimension_numbers = #tpu.dot_dimension_numbers<[1], [0], [0], [1], [0, 0, 1, 1], [], []>} : vector<16x32xbf16>, vector<32x32xbf16>, vector<16x32xf32> -> vector<16x32xf32>
    %c0_3 = arith.constant 0 : index
    %c0_4 = arith.constant 0 : index
    %4 = vector.load %arg3[%c0_3, %c0_4] : memref<1x32xf32, #tpu.memory_space<vmem>>, vector<1x32xf32>
    %5 = vector.broadcast %4 : vector<1x32xf32> to vector<16x32xf32>
    %6 = arith.addf %3, %5 : vector<16x32xf32>
    %c0_5 = arith.constant 0 : index
    %c0_6 = arith.constant 0 : index
    %7 = vector.load %arg4[%c0_5, %c0_6] : memref<16x32xf32, #tpu.memory_space<vmem>>, vector<16x32xf32>
    tpu.vector_store %arg4[%c0_5, %c0_6], %6 {strides = array<i32>} : memref<16x32xf32, #tpu.memory_space<vmem>>, vector<16x32xf32>,
    return
  }
  func.func @transform_0(%arg0: i32) -> (i32, i32) {
    %c0_i32 = arith.constant 0 : i32
    %c0_i32_0 = arith.constant 0 : i32
    return %arg0, %c0_i32 : i32, i32
  }
  func.func @transform_1(%arg0: i32) -> (i32, i32) {
    %c0_i32 = arith.constant 0 : i32
    %c0_i32_0 = arith.constant 0 : i32
    %c0_i32_1 = arith.constant 0 : i32
    return %c0_i32, %c0_i32_0 : i32, i32
  }
  func.func @transform_2(%arg0: i32) -> (i32, i32) {
    %c0_i32 = arith.constant 0 : i32
    %c0_i32_0 = arith.constant 0 : i32
    %c0_i32_1 = arith.constant 0 : i32
    return %c0_i32, %c0_i32_0 : i32, i32
  }
  func.func @transform_3(%arg0: i32) -> (i32, i32) {
    %c0_i32 = arith.constant 0 : i32
    %c0_i32_0 = arith.constant 0 : i32
    return %arg0, %c0_i32 : i32, i32
  }
}

module attributes {stable_mosaic.version = 11 : i64} {
  func.func @_attn_wo_kernel(%arg0: i32, %arg1: memref<1x8x32xf32, #tpu.memory_space<vmem>>, %arg2: memref<1x8x32xf32, #tpu.memory_space<vmem>>, %arg3: memref<1x8x32xf32, #tpu.memory_space<vmem>>, %arg4: memref<1x1x8xf32, #tpu.memory_space<vmem>>, %arg5: memref<32x32xbf16, #tpu.memory_space<vmem>>, %arg6: memref<1x32xf32, #tpu.memory_space<vmem>>, %arg7: memref<1x8x32xf32, #tpu.memory_space<vmem>>) attributes {dimension_semantics = [#tpu.dimension_semantics<parallel>], iteration_bounds = array<i64: 2>, scalar_prefetch = 0 : i64, scratch_operands = 0 : i64, tpu.core_type = #tpu.core_type<tc>, window_params = [{transform_indices = @transform_0, window_bounds = array<i64: 1, 8, 32>}, {transform_indices = @transform_1, window_bounds = array<i64: 1, 8, 32>}, {transform_indices = @transform_2, window_bounds = array<i64: 1, 8, 32>}, {transform_indices = @transform_3, window_bounds = array<i64: 1, 1, 8>}, {pipeline_mode = #tpu.pipeline_mode<synchronous>, transform_indices = @transform_4, window_bounds = array<i64: 32, 32>}, {pipeline_mode = #tpu.pipeline_mode<synchronous>, transform_indices = @transform_5, window_bounds = array<i64: 1, 32>}, {transform_indices = @transform_6, window_bounds = array<i64: 1, 8, 32>}]} {
    %c0 = arith.constant 0 : index
    %c0_0 = arith.constant 0 : index
    %c0_1 = arith.constant 0 : index
    %0 = vector.load %arg1[%c0, %c0_0, %c0_1] : memref<1x8x32xf32, #tpu.memory_space<vmem>>, vector<1x8x32xf32>
    %1 = vector.shape_cast %0 : vector<1x8x32xf32> to vector<8x32xf32>
    %c0_2 = arith.constant 0 : index
    %c0_3 = arith.constant 0 : index
    %c0_4 = arith.constant 0 : index
    %2 = vector.load %arg2[%c0_2, %c0_3, %c0_4] : memref<1x8x32xf32, #tpu.memory_space<vmem>>, vector<1x8x32xf32>
    %3 = vector.shape_cast %2 : vector<1x8x32xf32> to vector<8x32xf32>
    %c0_5 = arith.constant 0 : index
    %c0_6 = arith.constant 0 : index
    %c0_7 = arith.constant 0 : index
    %4 = vector.load %arg3[%c0_5, %c0_6, %c0_7] : memref<1x8x32xf32, #tpu.memory_space<vmem>>, vector<1x8x32xf32>
    %5 = vector.shape_cast %4 : vector<1x8x32xf32> to vector<8x32xf32>
    %c0_8 = arith.constant 0 : index
    %c0_9 = arith.constant 0 : index
    %c0_10 = arith.constant 0 : index
    %6 = vector.load %arg4[%c0_8, %c0_9, %c0_10] : memref<1x1x8xf32, #tpu.memory_space<vmem>>, vector<1x1x8xf32>
    %7 = vector.shape_cast %6 : vector<1x1x8xf32> to vector<1x8xf32>
    %cst = arith.constant 1.000000e+00 : f32
    %8 = vector.broadcast %cst : f32 to vector<1x8xf32>
    %9 = arith.subf %7, %8 : vector<1x8xf32>
    %cst_11 = arith.constant 1.000000e+10 : f32
    %10 = vector.broadcast %cst_11 : f32 to vector<1x8xf32>
    %11 = arith.mulf %9, %10 : vector<1x8xf32>
    %12 = tpu.iota {dimensions = array<i32: 0>} : vector<8x8xi32>
    %13 = tpu.iota {dimensions = array<i32: 1>} : vector<8x8xi32>
    %14 = arith.cmpi sgt, %13, %12 : vector<8x8xi32>
    %cst_12 = arith.constant 1.000000e+10 : f32
    %cst_13 = arith.constant 0.000000e+00 : f32
    %15 = vector.broadcast %cst_12 : f32 to vector<8x8xf32>
    %16 = vector.broadcast %cst_13 : f32 to vector<8x8xf32>
    %17 = arith.select %14, %15, %16 : vector<8x8xi1>, vector<8x8xf32>
    %18 = vector.broadcast %11 : vector<1x8xf32> to vector<8x8xf32>
    %19 = arith.subf %18, %17 : vector<8x8xf32>
    %cst_14 = arith.constant 0.176776692 : f32
    %20 = vector.broadcast %cst_14 : f32 to vector<8x32xf32>
    %21 = arith.mulf %1, %20 : vector<8x32xf32>
    %22 = arith.truncf %21 : vector<8x32xf32> to vector<8x32xbf16>
    %23 = arith.truncf %3 : vector<8x32xf32> to vector<8x32xbf16>
    %24 = arith.truncf %5 : vector<8x32xf32> to vector<8x32xbf16>
    %25 = vector.extract_strided_slice %22 {offsets = [0, 0], sizes = [8, 8], strides = [1, 1]} : vector<8x32xbf16> to vector<8x8xbf16>
    %26 = vector.extract_strided_slice %23 {offsets = [0, 0], sizes = [8, 8], strides = [1, 1]} : vector<8x32xbf16> to vector<8x8xbf16>
    %cst_15 = arith.constant dense<0.000000e+00> : vector<8x8xf32>
    %27 = tpu.matmul %25, %26, %cst_15 {dimension_numbers = #tpu.dot_dimension_numbers<[1], [1], [0], [0], [0, 0, 1, 0], [], []>} : vector<8x8xbf16>, vector<8x8xbf16>, vector<8x8xf32> -> vector<8x8xf32>
    %28 = arith.addf %27, %19 : vector<8x8xf32>
    %cst_16 = arith.constant dense<0xFF800000> : vector<8xf32>
    %29 = vector.multi_reduction <maximumf>, %28, %cst_16 [1] : vector<8x8xf32> to vector<8xf32>
    %30 = vector.shape_cast %29 : vector<8xf32> to vector<8x1xf32>
    %31 = vector.broadcast %30 : vector<8x1xf32> to vector<8x8xf32>
    %32 = arith.subf %28, %31 : vector<8x8xf32>
    %33 = math.exp %32 : vector<8x8xf32>
    %cst_17 = arith.constant dense<0.000000e+00> : vector<8xf32>
    %34 = vector.multi_reduction <add>, %33, %cst_17 [1] : vector<8x8xf32> to vector<8xf32>
    %35 = vector.shape_cast %34 : vector<8xf32> to vector<8x1xf32>
    %36 = tpu.reciprocal %35 {approx = true} : vector<8x1xf32> -> vector<8x1xf32>
    %37 = vector.broadcast %36 : vector<8x1xf32> to vector<8x8xf32>
    %38 = arith.mulf %33, %37 : vector<8x8xf32>
    %39 = arith.truncf %38 : vector<8x8xf32> to vector<8x8xbf16>
    %40 = vector.extract_strided_slice %24 {offsets = [0, 0], sizes = [8, 8], strides = [1, 1]} : vector<8x32xbf16> to vector<8x8xbf16>
    %cst_18 = arith.constant dense<0.000000e+00> : vector<8x8xf32>
    %41 = tpu.matmul %39, %40, %cst_18 {dimension_numbers = #tpu.dot_dimension_numbers<[1], [0], [0], [1], [0, 0, 1, 1], [], []>} : vector<8x8xbf16>, vector<8x8xbf16>, vector<8x8xf32> -> vector<8x8xf32>
    %42 = vector.extract_strided_slice %22 {offsets = [0, 8], sizes = [8, 8], strides = [1, 1]} : vector<8x32xbf16> to vector<8x8xbf16>
    %43 = vector.extract_strided_slice %23 {offsets = [0, 8], sizes = [8, 8], strides = [1, 1]} : vector<8x32xbf16> to vector<8x8xbf16>
    %cst_19 = arith.constant dense<0.000000e+00> : vector<8x8xf32>
    %44 = tpu.matmul %42, %43, %cst_19 {dimension_numbers = #tpu.dot_dimension_numbers<[1], [1], [0], [0], [0, 0, 1, 0], [], []>} : vector<8x8xbf16>, vector<8x8xbf16>, vector<8x8xf32> -> vector<8x8xf32>
    %45 = arith.addf %44, %19 : vector<8x8xf32>
    %cst_20 = arith.constant dense<0xFF800000> : vector<8xf32>
    %46 = vector.multi_reduction <maximumf>, %45, %cst_20 [1] : vector<8x8xf32> to vector<8xf32>
    %47 = vector.shape_cast %46 : vector<8xf32> to vector<8x1xf32>
    %48 = vector.broadcast %47 : vector<8x1xf32> to vector<8x8xf32>
    %49 = arith.subf %45, %48 : vector<8x8xf32>
    %50 = math.exp %49 : vector<8x8xf32>
    %cst_21 = arith.constant dense<0.000000e+00> : vector<8xf32>
    %51 = vector.multi_reduction <add>, %50, %cst_21 [1] : vector<8x8xf32> to vector<8xf32>
    %52 = vector.shape_cast %51 : vector<8xf32> to vector<8x1xf32>
    %53 = tpu.reciprocal %52 {approx = true} : vector<8x1xf32> -> vector<8x1xf32>
    %54 = vector.broadcast %53 : vector<8x1xf32> to vector<8x8xf32>
    %55 = arith.mulf %50, %54 : vector<8x8xf32>
    %56 = arith.truncf %55 : vector<8x8xf32> to vector<8x8xbf16>
    %57 = vector.extract_strided_slice %24 {offsets = [0, 8], sizes = [8, 8], strides = [1, 1]} : vector<8x32xbf16> to vector<8x8xbf16>
    %cst_22 = arith.constant dense<0.000000e+00> : vector<8x8xf32>
    %58 = tpu.matmul %56, %57, %cst_22 {dimension_numbers = #tpu.dot_dimension_numbers<[1], [0], [0], [1], [0, 0, 1, 1], [], []>} : vector<8x8xbf16>, vector<8x8xbf16>, vector<8x8xf32> -> vector<8x8xf32>
    %59 = vector.extract_strided_slice %22 {offsets = [0, 16], sizes = [8, 8], strides = [1, 1]} : vector<8x32xbf16> to vector<8x8xbf16>
    %60 = vector.extract_strided_slice %23 {offsets = [0, 16], sizes = [8, 8], strides = [1, 1]} : vector<8x32xbf16> to vector<8x8xbf16>
    %cst_23 = arith.constant dense<0.000000e+00> : vector<8x8xf32>
    %61 = tpu.matmul %59, %60, %cst_23 {dimension_numbers = #tpu.dot_dimension_numbers<[1], [1], [0], [0], [0, 0, 1, 0], [], []>} : vector<8x8xbf16>, vector<8x8xbf16>, vector<8x8xf32> -> vector<8x8xf32>
    %62 = arith.addf %61, %19 : vector<8x8xf32>
    %cst_24 = arith.constant dense<0xFF800000> : vector<8xf32>
    %63 = vector.multi_reduction <maximumf>, %62, %cst_24 [1] : vector<8x8xf32> to vector<8xf32>
    %64 = vector.shape_cast %63 : vector<8xf32> to vector<8x1xf32>
    %65 = vector.broadcast %64 : vector<8x1xf32> to vector<8x8xf32>
    %66 = arith.subf %62, %65 : vector<8x8xf32>
    %67 = math.exp %66 : vector<8x8xf32>
    %cst_25 = arith.constant dense<0.000000e+00> : vector<8xf32>
    %68 = vector.multi_reduction <add>, %67, %cst_25 [1] : vector<8x8xf32> to vector<8xf32>
    %69 = vector.shape_cast %68 : vector<8xf32> to vector<8x1xf32>
    %70 = tpu.reciprocal %69 {approx = true} : vector<8x1xf32> -> vector<8x1xf32>
    %71 = vector.broadcast %70 : vector<8x1xf32> to vector<8x8xf32>
    %72 = arith.mulf %67, %71 : vector<8x8xf32>
    %73 = arith.truncf %72 : vector<8x8xf32> to vector<8x8xbf16>
    %74 = vector.extract_strided_slice %24 {offsets = [0, 16], sizes = [8, 8], strides = [1, 1]} : vector<8x32xbf16> to vector<8x8xbf16>
    %cst_26 = arith.constant dense<0.000000e+00> : vector<8x8xf32>
    %75 = tpu.matmul %73, %74, %cst_26 {dimension_numbers = #tpu.dot_dimension_numbers<[1], [0], [0], [1], [0, 0, 1, 1], [], []>} : vector<8x8xbf16>, vector<8x8xbf16>, vector<8x8xf32> -> vector<8x8xf32>
    %76 = vector.extract_strided_slice %22 {offsets = [0, 24], sizes = [8, 8], strides = [1, 1]} : vector<8x32xbf16> to vector<8x8xbf16>
    %77 = vector.extract_strided_slice %23 {offsets = [0, 24], sizes = [8, 8], strides = [1, 1]} : vector<8x32xbf16> to vector<8x8xbf16>
    %cst_27 = arith.constant dense<0.000000e+00> : vector<8x8xf32>
    %78 = tpu.matmul %76, %77, %cst_27 {dimension_numbers = #tpu.dot_dimension_numbers<[1], [1], [0], [0], [0, 0, 1, 0], [], []>} : vector<8x8xbf16>, vector<8x8xbf16>, vector<8x8xf32> -> vector<8x8xf32>
    %79 = arith.addf %78, %19 : vector<8x8xf32>
    %cst_28 = arith.constant dense<0xFF800000> : vector<8xf32>
    %80 = vector.multi_reduction <maximumf>, %79, %cst_28 [1] : vector<8x8xf32> to vector<8xf32>
    %81 = vector.shape_cast %80 : vector<8xf32> to vector<8x1xf32>
    %82 = vector.broadcast %81 : vector<8x1xf32> to vector<8x8xf32>
    %83 = arith.subf %79, %82 : vector<8x8xf32>
    %84 = math.exp %83 : vector<8x8xf32>
    %cst_29 = arith.constant dense<0.000000e+00> : vector<8xf32>
    %85 = vector.multi_reduction <add>, %84, %cst_29 [1] : vector<8x8xf32> to vector<8xf32>
    %86 = vector.shape_cast %85 : vector<8xf32> to vector<8x1xf32>
    %87 = tpu.reciprocal %86 {approx = true} : vector<8x1xf32> -> vector<8x1xf32>
    %88 = vector.broadcast %87 : vector<8x1xf32> to vector<8x8xf32>
    %89 = arith.mulf %84, %88 : vector<8x8xf32>
    %90 = arith.truncf %89 : vector<8x8xf32> to vector<8x8xbf16>
    %91 = vector.extract_strided_slice %24 {offsets = [0, 24], sizes = [8, 8], strides = [1, 1]} : vector<8x32xbf16> to vector<8x8xbf16>
    %cst_30 = arith.constant dense<0.000000e+00> : vector<8x8xf32>
    %92 = tpu.matmul %90, %91, %cst_30 {dimension_numbers = #tpu.dot_dimension_numbers<[1], [0], [0], [1], [0, 0, 1, 1], [], []>} : vector<8x8xbf16>, vector<8x8xbf16>, vector<8x8xf32> -> vector<8x8xf32>
    %93 = tpu.concatenate %41, %58, %75, %92 in 1 : vector<8x8xf32>, vector<8x8xf32>, vector<8x8xf32>, vector<8x8xf32> -> vector<8x32xf32>
    %94 = arith.truncf %93 : vector<8x32xf32> to vector<8x32xbf16>
    %c0_31 = arith.constant 0 : index
    %c0_32 = arith.constant 0 : index
    %95 = vector.load %arg5[%c0_31, %c0_32] : memref<32x32xbf16, #tpu.memory_space<vmem>>, vector<32x32xbf16>
    %cst_33 = arith.constant dense<0.000000e+00> : vector<8x32xf32>
    %96 = tpu.matmul %94, %95, %cst_33 {dimension_numbers = #tpu.dot_dimension_numbers<[1], [0], [0], [1], [0, 0, 1, 1], [], []>} : vector<8x32xbf16>, vector<32x32xbf16>, vector<8x32xf32> -> vector<8x32xf32>
    %c0_34 = arith.constant 0 : index
    %c0_35 = arith.constant 0 : index
    %97 = vector.load %arg6[%c0_34, %c0_35] : memref<1x32xf32, #tpu.memory_space<vmem>>, vector<1x32xf32>
    %98 = vector.broadcast %97 : vector<1x32xf32> to vector<8x32xf32>
    %99 = arith.addf %96, %98 : vector<8x32xf32>
    %c0_36 = arith.constant 0 : index
    %c0_37 = arith.constant 0 : index
    %c0_38 = arith.constant 0 : index
    %100 = vector.load %arg7[%c0_36, %c0_37, %c0_38] : memref<1x8x32xf32, #tpu.memory_space<vmem>>, vector<1x8x32xf32>
    %101 = vector.shape_cast %100 : vector<1x8x32xf32> to vector<8x32xf32>
    %102 = vector.shape_cast %99 : vector<8x32xf32> to vector<1x8x32xf32>
    tpu.vector_store %arg7[%c0_36, %c0_37, %c0_38], %102 {strides = array<i32>} : memref<1x8x32xf32, #tpu.memory_space<vmem>>, vector<1x8x32xf32>,
    return
  }
  func.func @transform_0(%arg0: i32) -> (i32, i32, i32) {
    %c0_i32 = arith.constant 0 : i32
    %c0_i32_0 = arith.constant 0 : i32
    %c0_i32_1 = arith.constant 0 : i32
    return %arg0, %c0_i32, %c0_i32_0 : i32, i32, i32
  }
  func.func @transform_1(%arg0: i32) -> (i32, i32, i32) {
    %c0_i32 = arith.constant 0 : i32
    %c0_i32_0 = arith.constant 0 : i32
    %c0_i32_1 = arith.constant 0 : i32
    return %arg0, %c0_i32, %c0_i32_0 : i32, i32, i32
  }
  func.func @transform_2(%arg0: i32) -> (i32, i32, i32) {
    %c0_i32 = arith.constant 0 : i32
    %c0_i32_0 = arith.constant 0 : i32
    %c0_i32_1 = arith.constant 0 : i32
    return %arg0, %c0_i32, %c0_i32_0 : i32, i32, i32
  }
  func.func @transform_3(%arg0: i32) -> (i32, i32, i32) {
    %c0_i32 = arith.constant 0 : i32
    %c0_i32_0 = arith.constant 0 : i32
    %c0_i32_1 = arith.constant 0 : i32
    return %arg0, %c0_i32, %c0_i32_0 : i32, i32, i32
  }
  func.func @transform_4(%arg0: i32) -> (i32, i32) {
    %c0_i32 = arith.constant 0 : i32
    %c0_i32_0 = arith.constant 0 : i32
    %c0_i32_1 = arith.constant 0 : i32
    return %c0_i32, %c0_i32_0 : i32, i32
  }
  func.func @transform_5(%arg0: i32) -> (i32, i32) {
    %c0_i32 = arith.constant 0 : i32
    %c0_i32_0 = arith.constant 0 : i32
    %c0_i32_1 = arith.constant 0 : i32
    return %c0_i32, %c0_i32_0 : i32, i32
  }
  func.func @transform_6(%arg0: i32) -> (i32, i32, i32) {
    %c0_i32 = arith.constant 0 : i32
    %c0_i32_0 = arith.constant 0 : i32
    %c0_i32_1 = arith.constant 0 : i32
    return %arg0, %c0_i32, %c0_i32_0 : i32, i32, i32
  }
}

module attributes {stable_mosaic.version = 11 : i64} {
  func.func @_gate_highway_ln_kernel(%arg0: i32, %arg1: memref<16x32xf32, #tpu.memory_space<vmem>>, %arg2: memref<16x32xf32, #tpu.memory_space<vmem>>, %arg3: memref<32x64xbf16, #tpu.memory_space<vmem>>, %arg4: memref<1x64xf32, #tpu.memory_space<vmem>>, %arg5: memref<64x32xbf16, #tpu.memory_space<vmem>>, %arg6: memref<1x32xf32, #tpu.memory_space<vmem>>, %arg7: memref<1x32xf32, #tpu.memory_space<vmem>>, %arg8: memref<1x32xf32, #tpu.memory_space<vmem>>, %arg9: memref<16x32xf32, #tpu.memory_space<vmem>>) attributes {dimension_semantics = [#tpu.dimension_semantics<parallel>], iteration_bounds = array<i64: 1>, scalar_prefetch = 0 : i64, scratch_operands = 0 : i64, tpu.core_type = #tpu.core_type<tc>, window_params = [{transform_indices = @transform_0, window_bounds = array<i64: 16, 32>}, {transform_indices = @transform_1, window_bounds = array<i64: 16, 32>}, {pipeline_mode = #tpu.pipeline_mode<synchronous>, transform_indices = @transform_2, window_bounds = array<i64: 32, 64>}, {pipeline_mode = #tpu.pipeline_mode<synchronous>, transform_indices = @transform_3, window_bounds = array<i64: 1, 64>}, {pipeline_mode = #tpu.pipeline_mode<synchronous>, transform_indices = @transform_4, window_bounds = array<i64: 64, 32>}, {pipeline_mode = #tpu.pipeline_mode<synchronous>, transform_indices = @transform_5, window_bounds = array<i64: 1, 32>}, {pipeline_mode = #tpu.pipeline_mode<synchronous>, transform_indices = @transform_6, window_bounds = array<i64: 1, 32>}, {pipeline_mode = #tpu.pipeline_mode<synchronous>, transform_indices = @transform_7, window_bounds = array<i64: 1, 32>}, {transform_indices = @transform_8, window_bounds = array<i64: 16, 32>}]} {
    %c0 = arith.constant 0 : index
    %c0_0 = arith.constant 0 : index
    %0 = vector.load %arg1[%c0, %c0_0] : memref<16x32xf32, #tpu.memory_space<vmem>>, vector<16x32xf32>
    %c0_1 = arith.constant 0 : index
    %c0_2 = arith.constant 0 : index
    %1 = vector.load %arg2[%c0_1, %c0_2] : memref<16x32xf32, #tpu.memory_space<vmem>>, vector<16x32xf32>
    %2 = arith.truncf %0 : vector<16x32xf32> to vector<16x32xbf16>
    %c0_3 = arith.constant 0 : index
    %c0_4 = arith.constant 0 : index
    %3 = vector.load %arg3[%c0_3, %c0_4] : memref<32x64xbf16, #tpu.memory_space<vmem>>, vector<32x64xbf16>
    %cst = arith.constant dense<0.000000e+00> : vector<16x64xf32>
    %4 = tpu.matmul %2, %3, %cst {dimension_numbers = #tpu.dot_dimension_numbers<[1], [0], [0], [1], [0, 0, 1, 1], [], []>} : vector<16x32xbf16>, vector<32x64xbf16>, vector<16x64xf32> -> vector<16x64xf32>
    %c0_5 = arith.constant 0 : index
    %c0_6 = arith.constant 0 : index
    %5 = vector.load %arg4[%c0_5, %c0_6] : memref<1x64xf32, #tpu.memory_space<vmem>>, vector<1x64xf32>
    %6 = vector.broadcast %5 : vector<1x64xf32> to vector<16x64xf32>
    %7 = arith.addf %4, %6 : vector<16x64xf32>
    %cst_7 = arith.constant 0.000000e+00 : f32
    %8 = vector.broadcast %cst_7 : f32 to vector<16x64xf32>
    %9 = arith.maximumf %7, %8 : vector<16x64xf32>
    %10 = arith.truncf %9 : vector<16x64xf32> to vector<16x64xbf16>
    %c0_8 = arith.constant 0 : index
    %c0_9 = arith.constant 0 : index
    %11 = vector.load %arg5[%c0_8, %c0_9] : memref<64x32xbf16, #tpu.memory_space<vmem>>, vector<64x32xbf16>
    %cst_10 = arith.constant dense<0.000000e+00> : vector<16x32xf32>
    %12 = tpu.matmul %10, %11, %cst_10 {dimension_numbers = #tpu.dot_dimension_numbers<[1], [0], [0], [1], [0, 0, 1, 1], [], []>} : vector<16x64xbf16>, vector<64x32xbf16>, vector<16x32xf32> -> vector<16x32xf32>
    %c0_11 = arith.constant 0 : index
    %c0_12 = arith.constant 0 : index
    %13 = vector.load %arg6[%c0_11, %c0_12] : memref<1x32xf32, #tpu.memory_space<vmem>>, vector<1x32xf32>
    %14 = vector.broadcast %13 : vector<1x32xf32> to vector<16x32xf32>
    %15 = arith.addf %12, %14 : vector<16x32xf32>
    %cst_13 = arith.constant 5.000000e-01 : f32
    %16 = vector.broadcast %cst_13 : f32 to vector<16x32xf32>
    %17 = arith.mulf %16, %15 : vector<16x32xf32>
    %18 = math.tanh %17 : vector<16x32xf32>
    %cst_14 = arith.constant 1.000000e+00 : f32
    %19 = vector.broadcast %cst_14 : f32 to vector<16x32xf32>
    %20 = arith.addf %18, %19 : vector<16x32xf32>
    %cst_15 = arith.constant 5.000000e-01 : f32
    %21 = vector.broadcast %cst_15 : f32 to vector<16x32xf32>
    %22 = arith.mulf %21, %20 : vector<16x32xf32>
    %23 = arith.mulf %0, %22 : vector<16x32xf32>
    %cst_16 = arith.constant 1.000000e+00 : f32
    %24 = vector.broadcast %cst_16 : f32 to vector<16x32xf32>
    %25 = arith.subf %24, %22 : vector<16x32xf32>
    %26 = arith.mulf %1, %25 : vector<16x32xf32>
    %27 = arith.addf %23, %26 : vector<16x32xf32>
    %c0_17 = arith.constant 0 : index
    %c0_18 = arith.constant 0 : index
    %28 = vector.load %arg7[%c0_17, %c0_18] : memref<1x32xf32, #tpu.memory_space<vmem>>, vector<1x32xf32>
    %c0_19 = arith.constant 0 : index
    %c0_20 = arith.constant 0 : index
    %29 = vector.load %arg8[%c0_19, %c0_20] : memref<1x32xf32, #tpu.memory_space<vmem>>, vector<1x32xf32>
    %cst_21 = arith.constant dense<0.000000e+00> : vector<16xf32>
    %30 = vector.multi_reduction <add>, %27, %cst_21 [1] : vector<16x32xf32> to vector<16xf32>
    %31 = vector.shape_cast %30 : vector<16xf32> to vector<16x1xf32>
    %32 = arith.mulf %27, %27 : vector<16x32xf32>
    %cst_22 = arith.constant dense<0.000000e+00> : vector<16xf32>
    %33 = vector.multi_reduction <add>, %32, %cst_22 [1] : vector<16x32xf32> to vector<16xf32>
    %34 = vector.shape_cast %33 : vector<16xf32> to vector<16x1xf32>
    %cst_23 = arith.constant 3.125000e-02 : f32
    %35 = vector.broadcast %cst_23 : f32 to vector<16x1xf32>
    %36 = arith.mulf %31, %35 : vector<16x1xf32>
    %37 = arith.mulf %31, %36 : vector<16x1xf32>
    %38 = arith.subf %34, %37 : vector<16x1xf32>
    %cst_24 = arith.constant 0.0322580636 : f32
    %39 = vector.broadcast %cst_24 : f32 to vector<16x1xf32>
    %40 = arith.mulf %38, %39 : vector<16x1xf32>
    %cst_25 = arith.constant 0.000000e+00 : f32
    %41 = vector.broadcast %cst_25 : f32 to vector<16x1xf32>
    %42 = arith.maximumf %40, %41 : vector<16x1xf32>
    %43 = math.sqrt %42 : vector<16x1xf32>
    %44 = vector.broadcast %36 : vector<16x1xf32> to vector<16x32xf32>
    %45 = arith.subf %27, %44 : vector<16x32xf32>
    %46 = vector.broadcast %28 : vector<1x32xf32> to vector<16x32xf32>
    %47 = arith.mulf %46, %45 : vector<16x32xf32>
    %cst_26 = arith.constant 9.99999997E-7 : f32
    %48 = vector.broadcast %cst_26 : f32 to vector<16x1xf32>
    %49 = arith.addf %43, %48 : vector<16x1xf32>
    %50 = vector.broadcast %49 : vector<16x1xf32> to vector<16x32xf32>
    %51 = arith.divf %47, %50 : vector<16x32xf32>
    %52 = vector.broadcast %29 : vector<1x32xf32> to vector<16x32xf32>
    %53 = arith.addf %51, %52 : vector<16x32xf32>
    %c0_27 = arith.constant 0 : index
    %c0_28 = arith.constant 0 : index
    %54 = vector.load %arg9[%c0_27, %c0_28] : memref<16x32xf32, #tpu.memory_space<vmem>>, vector<16x32xf32>
    tpu.vector_store %arg9[%c0_27, %c0_28], %53 {strides = array<i32>} : memref<16x32xf32, #tpu.memory_space<vmem>>, vector<16x32xf32>,
    return
  }
  func.func @transform_0(%arg0: i32) -> (i32, i32) {
    %c0_i32 = arith.constant 0 : i32
    %c0_i32_0 = arith.constant 0 : i32
    return %arg0, %c0_i32 : i32, i32
  }
  func.func @transform_1(%arg0: i32) -> (i32, i32) {
    %c0_i32 = arith.constant 0 : i32
    %c0_i32_0 = arith.constant 0 : i32
    return %arg0, %c0_i32 : i32, i32
  }
  func.func @transform_2(%arg0: i32) -> (i32, i32) {
    %c0_i32 = arith.constant 0 : i32
    %c0_i32_0 = arith.constant 0 : i32
    %c0_i32_1 = arith.constant 0 : i32
    return %c0_i32, %c0_i32_0 : i32, i32
  }
  func.func @transform_3(%arg0: i32) -> (i32, i32) {
    %c0_i32 = arith.constant 0 : i32
    %c0_i32_0 = arith.constant 0 : i32
    %c0_i32_1 = arith.constant 0 : i32
    return %c0_i32, %c0_i32_0 : i32, i32
  }
  func.func @transform_4(%arg0: i32) -> (i32, i32) {
    %c0_i32 = arith.constant 0 : i32
    %c0_i32_0 = arith.constant 0 : i32
    %c0_i32_1 = arith.constant 0 : i32
    return %c0_i32, %c0_i32_0 : i32, i32
  }
  func.func @transform_5(%arg0: i32) -> (i32, i32) {
    %c0_i32 = arith.constant 0 : i32
    %c0_i32_0 = arith.constant 0 : i32
    %c0_i32_1 = arith.constant 0 : i32
    return %c0_i32, %c0_i32_0 : i32, i32
  }
  func.func @transform_6(%arg0: i32) -> (i32, i32) {
    %c0_i32 = arith.constant 0 : i32
    %c0_i32_0 = arith.constant 0 : i32
    %c0_i32_1 = arith.constant 0 : i32
    return %c0_i32, %c0_i32_0 : i32, i32
  }
  func.func @transform_7(%arg0: i32) -> (i32, i32) {
    %c0_i32 = arith.constant 0 : i32
    %c0_i32_0 = arith.constant 0 : i32
    %c0_i32_1 = arith.constant 0 : i32
    return %c0_i32, %c0_i32_0 : i32, i32
  }
  func.func @transform_8(%arg0: i32) -> (i32, i32) {
    %c0_i32 = arith.constant 0 : i32
    %c0_i32_0 = arith.constant 0 : i32
    return %arg0, %c0_i32 : i32, i32
  }
}

module attributes {stable_mosaic.version = 11 : i64} {
  func.func @_fused_proj_kernel(%arg0: i32, %arg1: memref<16x32xf32, #tpu.memory_space<vmem>>, %arg2: memref<32x64xbf16, #tpu.memory_space<vmem>>, %arg3: memref<1x64xf32, #tpu.memory_space<vmem>>, %arg4: memref<16x32xf32, #tpu.memory_space<vmem>>, %arg5: memref<16x32xf32, #tpu.memory_space<vmem>>) attributes {dimension_semantics = [#tpu.dimension_semantics<parallel>], iteration_bounds = array<i64: 1>, scalar_prefetch = 0 : i64, scratch_operands = 0 : i64, tpu.core_type = #tpu.core_type<tc>, window_params = [{transform_indices = @transform_0, window_bounds = array<i64: 16, 32>}, {pipeline_mode = #tpu.pipeline_mode<synchronous>, transform_indices = @transform_1, window_bounds = array<i64: 32, 64>}, {pipeline_mode = #tpu.pipeline_mode<synchronous>, transform_indices = @transform_2, window_bounds = array<i64: 1, 64>}, {transform_indices = @transform_3, window_bounds = array<i64: 16, 32>}, {transform_indices = @transform_4, window_bounds = array<i64: 16, 32>}]} {
    %c0 = arith.constant 0 : index
    %c0_0 = arith.constant 0 : index
    %0 = vector.load %arg1[%c0, %c0_0] : memref<16x32xf32, #tpu.memory_space<vmem>>, vector<16x32xf32>
    %1 = arith.truncf %0 : vector<16x32xf32> to vector<16x32xbf16>
    %c0_1 = arith.constant 0 : index
    %c0_2 = arith.constant 0 : index
    %2 = vector.load %arg2[%c0_1, %c0_2] : memref<32x64xbf16, #tpu.memory_space<vmem>>, vector<32x64xbf16>
    %cst = arith.constant dense<0.000000e+00> : vector<16x64xf32>
    %3 = tpu.matmul %1, %2, %cst {dimension_numbers = #tpu.dot_dimension_numbers<[1], [0], [0], [1], [0, 0, 1, 1], [], []>} : vector<16x32xbf16>, vector<32x64xbf16>, vector<16x64xf32> -> vector<16x64xf32>
    %c0_3 = arith.constant 0 : index
    %c0_4 = arith.constant 0 : index
    %4 = vector.load %arg3[%c0_3, %c0_4] : memref<1x64xf32, #tpu.memory_space<vmem>>, vector<1x64xf32>
    %5 = vector.broadcast %4 : vector<1x64xf32> to vector<16x64xf32>
    %6 = arith.addf %3, %5 : vector<16x64xf32>
    %7 = vector.extract_strided_slice %6 {offsets = [0, 0], sizes = [16, 32], strides = [1, 1]} : vector<16x64xf32> to vector<16x32xf32>
    %c0_5 = arith.constant 0 : index
    %c0_6 = arith.constant 0 : index
    %8 = vector.load %arg4[%c0_5, %c0_6] : memref<16x32xf32, #tpu.memory_space<vmem>>, vector<16x32xf32>
    tpu.vector_store %arg4[%c0_5, %c0_6], %7 {strides = array<i32>} : memref<16x32xf32, #tpu.memory_space<vmem>>, vector<16x32xf32>,
    %9 = vector.extract_strided_slice %6 {offsets = [0, 32], sizes = [16, 32], strides = [1, 1]} : vector<16x64xf32> to vector<16x32xf32>
    %c0_7 = arith.constant 0 : index
    %c0_8 = arith.constant 0 : index
    %10 = vector.load %arg5[%c0_7, %c0_8] : memref<16x32xf32, #tpu.memory_space<vmem>>, vector<16x32xf32>
    tpu.vector_store %arg5[%c0_7, %c0_8], %9 {strides = array<i32>} : memref<16x32xf32, #tpu.memory_space<vmem>>, vector<16x32xf32>,
    return
  }
  func.func @transform_0(%arg0: i32) -> (i32, i32) {
    %c0_i32 = arith.constant 0 : i32
    %c0_i32_0 = arith.constant 0 : i32
    return %arg0, %c0_i32 : i32, i32
  }
  func.func @transform_1(%arg0: i32) -> (i32, i32) {
    %c0_i32 = arith.constant 0 : i32
    %c0_i32_0 = arith.constant 0 : i32
    %c0_i32_1 = arith.constant 0 : i32
    return %c0_i32, %c0_i32_0 : i32, i32
  }
  func.func @transform_2(%arg0: i32) -> (i32, i32) {
    %c0_i32 = arith.constant 0 : i32
    %c0_i32_0 = arith.constant 0 : i32
    %c0_i32_1 = arith.constant 0 : i32
    return %c0_i32, %c0_i32_0 : i32, i32
  }
  func.func @transform_3(%arg0: i32) -> (i32, i32) {
    %c0_i32 = arith.constant 0 : i32
    %c0_i32_0 = arith.constant 0 : i32
    return %arg0, %c0_i32 : i32, i32
  }
  func.func @transform_4(%arg0: i32) -> (i32, i32) {
    %c0_i32 = arith.constant 0 : i32
    %c0_i32_0 = arith.constant 0 : i32
    return %arg0, %c0_i32 : i32, i32
  }
}

module attributes {stable_mosaic.version = 11 : i64} {
  func.func @_attn_wo_kernel(%arg0: i32, %arg1: memref<1x8x32xf32, #tpu.memory_space<vmem>>, %arg2: memref<1x8x32xf32, #tpu.memory_space<vmem>>, %arg3: memref<1x8x32xf32, #tpu.memory_space<vmem>>, %arg4: memref<1x1x8xf32, #tpu.memory_space<vmem>>, %arg5: memref<32x32xbf16, #tpu.memory_space<vmem>>, %arg6: memref<1x32xf32, #tpu.memory_space<vmem>>, %arg7: memref<1x8x32xf32, #tpu.memory_space<vmem>>) attributes {dimension_semantics = [#tpu.dimension_semantics<parallel>], iteration_bounds = array<i64: 2>, scalar_prefetch = 0 : i64, scratch_operands = 0 : i64, tpu.core_type = #tpu.core_type<tc>, window_params = [{transform_indices = @transform_0, window_bounds = array<i64: 1, 8, 32>}, {transform_indices = @transform_1, window_bounds = array<i64: 1, 8, 32>}, {transform_indices = @transform_2, window_bounds = array<i64: 1, 8, 32>}, {transform_indices = @transform_3, window_bounds = array<i64: 1, 1, 8>}, {pipeline_mode = #tpu.pipeline_mode<synchronous>, transform_indices = @transform_4, window_bounds = array<i64: 32, 32>}, {pipeline_mode = #tpu.pipeline_mode<synchronous>, transform_indices = @transform_5, window_bounds = array<i64: 1, 32>}, {transform_indices = @transform_6, window_bounds = array<i64: 1, 8, 32>}]} {
    %c0 = arith.constant 0 : index
    %c0_0 = arith.constant 0 : index
    %c0_1 = arith.constant 0 : index
    %0 = vector.load %arg1[%c0, %c0_0, %c0_1] : memref<1x8x32xf32, #tpu.memory_space<vmem>>, vector<1x8x32xf32>
    %1 = vector.shape_cast %0 : vector<1x8x32xf32> to vector<8x32xf32>
    %c0_2 = arith.constant 0 : index
    %c0_3 = arith.constant 0 : index
    %c0_4 = arith.constant 0 : index
    %2 = vector.load %arg2[%c0_2, %c0_3, %c0_4] : memref<1x8x32xf32, #tpu.memory_space<vmem>>, vector<1x8x32xf32>
    %3 = vector.shape_cast %2 : vector<1x8x32xf32> to vector<8x32xf32>
    %c0_5 = arith.constant 0 : index
    %c0_6 = arith.constant 0 : index
    %c0_7 = arith.constant 0 : index
    %4 = vector.load %arg3[%c0_5, %c0_6, %c0_7] : memref<1x8x32xf32, #tpu.memory_space<vmem>>, vector<1x8x32xf32>
    %5 = vector.shape_cast %4 : vector<1x8x32xf32> to vector<8x32xf32>
    %c0_8 = arith.constant 0 : index
    %c0_9 = arith.constant 0 : index
    %c0_10 = arith.constant 0 : index
    %6 = vector.load %arg4[%c0_8, %c0_9, %c0_10] : memref<1x1x8xf32, #tpu.memory_space<vmem>>, vector<1x1x8xf32>
    %7 = vector.shape_cast %6 : vector<1x1x8xf32> to vector<1x8xf32>
    %cst = arith.constant 1.000000e+00 : f32
    %8 = vector.broadcast %cst : f32 to vector<1x8xf32>
    %9 = arith.subf %7, %8 : vector<1x8xf32>
    %cst_11 = arith.constant 1.000000e+10 : f32
    %10 = vector.broadcast %cst_11 : f32 to vector<1x8xf32>
    %11 = arith.mulf %9, %10 : vector<1x8xf32>
    %cst_12 = arith.constant 0.176776692 : f32
    %12 = vector.broadcast %cst_12 : f32 to vector<8x32xf32>
    %13 = arith.mulf %1, %12 : vector<8x32xf32>
    %14 = arith.truncf %13 : vector<8x32xf32> to vector<8x32xbf16>
    %15 = arith.truncf %3 : vector<8x32xf32> to vector<8x32xbf16>
    %16 = arith.truncf %5 : vector<8x32xf32> to vector<8x32xbf16>
    %17 = vector.extract_strided_slice %14 {offsets = [0, 0], sizes = [8, 8], strides = [1, 1]} : vector<8x32xbf16> to vector<8x8xbf16>
    %18 = vector.extract_strided_slice %15 {offsets = [0, 0], sizes = [8, 8], strides = [1, 1]} : vector<8x32xbf16> to vector<8x8xbf16>
    %cst_13 = arith.constant dense<0.000000e+00> : vector<8x8xf32>
    %19 = tpu.matmul %17, %18, %cst_13 {dimension_numbers = #tpu.dot_dimension_numbers<[1], [1], [0], [0], [0, 0, 1, 0], [], []>} : vector<8x8xbf16>, vector<8x8xbf16>, vector<8x8xf32> -> vector<8x8xf32>
    %20 = vector.broadcast %11 : vector<1x8xf32> to vector<8x8xf32>
    %21 = arith.addf %19, %20 : vector<8x8xf32>
    %cst_14 = arith.constant dense<0xFF800000> : vector<8xf32>
    %22 = vector.multi_reduction <maximumf>, %21, %cst_14 [1] : vector<8x8xf32> to vector<8xf32>
    %23 = vector.shape_cast %22 : vector<8xf32> to vector<8x1xf32>
    %24 = vector.broadcast %23 : vector<8x1xf32> to vector<8x8xf32>
    %25 = arith.subf %21, %24 : vector<8x8xf32>
    %26 = math.exp %25 : vector<8x8xf32>
    %cst_15 = arith.constant dense<0.000000e+00> : vector<8xf32>
    %27 = vector.multi_reduction <add>, %26, %cst_15 [1] : vector<8x8xf32> to vector<8xf32>
    %28 = vector.shape_cast %27 : vector<8xf32> to vector<8x1xf32>
    %29 = tpu.reciprocal %28 {approx = true} : vector<8x1xf32> -> vector<8x1xf32>
    %30 = vector.broadcast %29 : vector<8x1xf32> to vector<8x8xf32>
    %31 = arith.mulf %26, %30 : vector<8x8xf32>
    %32 = arith.truncf %31 : vector<8x8xf32> to vector<8x8xbf16>
    %33 = vector.extract_strided_slice %16 {offsets = [0, 0], sizes = [8, 8], strides = [1, 1]} : vector<8x32xbf16> to vector<8x8xbf16>
    %cst_16 = arith.constant dense<0.000000e+00> : vector<8x8xf32>
    %34 = tpu.matmul %32, %33, %cst_16 {dimension_numbers = #tpu.dot_dimension_numbers<[1], [0], [0], [1], [0, 0, 1, 1], [], []>} : vector<8x8xbf16>, vector<8x8xbf16>, vector<8x8xf32> -> vector<8x8xf32>
    %35 = vector.extract_strided_slice %14 {offsets = [0, 8], sizes = [8, 8], strides = [1, 1]} : vector<8x32xbf16> to vector<8x8xbf16>
    %36 = vector.extract_strided_slice %15 {offsets = [0, 8], sizes = [8, 8], strides = [1, 1]} : vector<8x32xbf16> to vector<8x8xbf16>
    %cst_17 = arith.constant dense<0.000000e+00> : vector<8x8xf32>
    %37 = tpu.matmul %35, %36, %cst_17 {dimension_numbers = #tpu.dot_dimension_numbers<[1], [1], [0], [0], [0, 0, 1, 0], [], []>} : vector<8x8xbf16>, vector<8x8xbf16>, vector<8x8xf32> -> vector<8x8xf32>
    %38 = vector.broadcast %11 : vector<1x8xf32> to vector<8x8xf32>
    %39 = arith.addf %37, %38 : vector<8x8xf32>
    %cst_18 = arith.constant dense<0xFF800000> : vector<8xf32>
    %40 = vector.multi_reduction <maximumf>, %39, %cst_18 [1] : vector<8x8xf32> to vector<8xf32>
    %41 = vector.shape_cast %40 : vector<8xf32> to vector<8x1xf32>
    %42 = vector.broadcast %41 : vector<8x1xf32> to vector<8x8xf32>
    %43 = arith.subf %39, %42 : vector<8x8xf32>
    %44 = math.exp %43 : vector<8x8xf32>
    %cst_19 = arith.constant dense<0.000000e+00> : vector<8xf32>
    %45 = vector.multi_reduction <add>, %44, %cst_19 [1] : vector<8x8xf32> to vector<8xf32>
    %46 = vector.shape_cast %45 : vector<8xf32> to vector<8x1xf32>
    %47 = tpu.reciprocal %46 {approx = true} : vector<8x1xf32> -> vector<8x1xf32>
    %48 = vector.broadcast %47 : vector<8x1xf32> to vector<8x8xf32>
    %49 = arith.mulf %44, %48 : vector<8x8xf32>
    %50 = arith.truncf %49 : vector<8x8xf32> to vector<8x8xbf16>
    %51 = vector.extract_strided_slice %16 {offsets = [0, 8], sizes = [8, 8], strides = [1, 1]} : vector<8x32xbf16> to vector<8x8xbf16>
    %cst_20 = arith.constant dense<0.000000e+00> : vector<8x8xf32>
    %52 = tpu.matmul %50, %51, %cst_20 {dimension_numbers = #tpu.dot_dimension_numbers<[1], [0], [0], [1], [0, 0, 1, 1], [], []>} : vector<8x8xbf16>, vector<8x8xbf16>, vector<8x8xf32> -> vector<8x8xf32>
    %53 = vector.extract_strided_slice %14 {offsets = [0, 16], sizes = [8, 8], strides = [1, 1]} : vector<8x32xbf16> to vector<8x8xbf16>
    %54 = vector.extract_strided_slice %15 {offsets = [0, 16], sizes = [8, 8], strides = [1, 1]} : vector<8x32xbf16> to vector<8x8xbf16>
    %cst_21 = arith.constant dense<0.000000e+00> : vector<8x8xf32>
    %55 = tpu.matmul %53, %54, %cst_21 {dimension_numbers = #tpu.dot_dimension_numbers<[1], [1], [0], [0], [0, 0, 1, 0], [], []>} : vector<8x8xbf16>, vector<8x8xbf16>, vector<8x8xf32> -> vector<8x8xf32>
    %56 = vector.broadcast %11 : vector<1x8xf32> to vector<8x8xf32>
    %57 = arith.addf %55, %56 : vector<8x8xf32>
    %cst_22 = arith.constant dense<0xFF800000> : vector<8xf32>
    %58 = vector.multi_reduction <maximumf>, %57, %cst_22 [1] : vector<8x8xf32> to vector<8xf32>
    %59 = vector.shape_cast %58 : vector<8xf32> to vector<8x1xf32>
    %60 = vector.broadcast %59 : vector<8x1xf32> to vector<8x8xf32>
    %61 = arith.subf %57, %60 : vector<8x8xf32>
    %62 = math.exp %61 : vector<8x8xf32>
    %cst_23 = arith.constant dense<0.000000e+00> : vector<8xf32>
    %63 = vector.multi_reduction <add>, %62, %cst_23 [1] : vector<8x8xf32> to vector<8xf32>
    %64 = vector.shape_cast %63 : vector<8xf32> to vector<8x1xf32>
    %65 = tpu.reciprocal %64 {approx = true} : vector<8x1xf32> -> vector<8x1xf32>
    %66 = vector.broadcast %65 : vector<8x1xf32> to vector<8x8xf32>
    %67 = arith.mulf %62, %66 : vector<8x8xf32>
    %68 = arith.truncf %67 : vector<8x8xf32> to vector<8x8xbf16>
    %69 = vector.extract_strided_slice %16 {offsets = [0, 16], sizes = [8, 8], strides = [1, 1]} : vector<8x32xbf16> to vector<8x8xbf16>
    %cst_24 = arith.constant dense<0.000000e+00> : vector<8x8xf32>
    %70 = tpu.matmul %68, %69, %cst_24 {dimension_numbers = #tpu.dot_dimension_numbers<[1], [0], [0], [1], [0, 0, 1, 1], [], []>} : vector<8x8xbf16>, vector<8x8xbf16>, vector<8x8xf32> -> vector<8x8xf32>
    %71 = vector.extract_strided_slice %14 {offsets = [0, 24], sizes = [8, 8], strides = [1, 1]} : vector<8x32xbf16> to vector<8x8xbf16>
    %72 = vector.extract_strided_slice %15 {offsets = [0, 24], sizes = [8, 8], strides = [1, 1]} : vector<8x32xbf16> to vector<8x8xbf16>
    %cst_25 = arith.constant dense<0.000000e+00> : vector<8x8xf32>
    %73 = tpu.matmul %71, %72, %cst_25 {dimension_numbers = #tpu.dot_dimension_numbers<[1], [1], [0], [0], [0, 0, 1, 0], [], []>} : vector<8x8xbf16>, vector<8x8xbf16>, vector<8x8xf32> -> vector<8x8xf32>
    %74 = vector.broadcast %11 : vector<1x8xf32> to vector<8x8xf32>
    %75 = arith.addf %73, %74 : vector<8x8xf32>
    %cst_26 = arith.constant dense<0xFF800000> : vector<8xf32>
    %76 = vector.multi_reduction <maximumf>, %75, %cst_26 [1] : vector<8x8xf32> to vector<8xf32>
    %77 = vector.shape_cast %76 : vector<8xf32> to vector<8x1xf32>
    %78 = vector.broadcast %77 : vector<8x1xf32> to vector<8x8xf32>
    %79 = arith.subf %75, %78 : vector<8x8xf32>
    %80 = math.exp %79 : vector<8x8xf32>
    %cst_27 = arith.constant dense<0.000000e+00> : vector<8xf32>
    %81 = vector.multi_reduction <add>, %80, %cst_27 [1] : vector<8x8xf32> to vector<8xf32>
    %82 = vector.shape_cast %81 : vector<8xf32> to vector<8x1xf32>
    %83 = tpu.reciprocal %82 {approx = true} : vector<8x1xf32> -> vector<8x1xf32>
    %84 = vector.broadcast %83 : vector<8x1xf32> to vector<8x8xf32>
    %85 = arith.mulf %80, %84 : vector<8x8xf32>
    %86 = arith.truncf %85 : vector<8x8xf32> to vector<8x8xbf16>
    %87 = vector.extract_strided_slice %16 {offsets = [0, 24], sizes = [8, 8], strides = [1, 1]} : vector<8x32xbf16> to vector<8x8xbf16>
    %cst_28 = arith.constant dense<0.000000e+00> : vector<8x8xf32>
    %88 = tpu.matmul %86, %87, %cst_28 {dimension_numbers = #tpu.dot_dimension_numbers<[1], [0], [0], [1], [0, 0, 1, 1], [], []>} : vector<8x8xbf16>, vector<8x8xbf16>, vector<8x8xf32> -> vector<8x8xf32>
    %89 = tpu.concatenate %34, %52, %70, %88 in 1 : vector<8x8xf32>, vector<8x8xf32>, vector<8x8xf32>, vector<8x8xf32> -> vector<8x32xf32>
    %90 = arith.truncf %89 : vector<8x32xf32> to vector<8x32xbf16>
    %c0_29 = arith.constant 0 : index
    %c0_30 = arith.constant 0 : index
    %91 = vector.load %arg5[%c0_29, %c0_30] : memref<32x32xbf16, #tpu.memory_space<vmem>>, vector<32x32xbf16>
    %cst_31 = arith.constant dense<0.000000e+00> : vector<8x32xf32>
    %92 = tpu.matmul %90, %91, %cst_31 {dimension_numbers = #tpu.dot_dimension_numbers<[1], [0], [0], [1], [0, 0, 1, 1], [], []>} : vector<8x32xbf16>, vector<32x32xbf16>, vector<8x32xf32> -> vector<8x32xf32>
    %c0_32 = arith.constant 0 : index
    %c0_33 = arith.constant 0 : index
    %93 = vector.load %arg6[%c0_32, %c0_33] : memref<1x32xf32, #tpu.memory_space<vmem>>, vector<1x32xf32>
    %94 = vector.broadcast %93 : vector<1x32xf32> to vector<8x32xf32>
    %95 = arith.addf %92, %94 : vector<8x32xf32>
    %c0_34 = arith.constant 0 : index
    %c0_35 = arith.constant 0 : index
    %c0_36 = arith.constant 0 : index
    %96 = vector.load %arg7[%c0_34, %c0_35, %c0_36] : memref<1x8x32xf32, #tpu.memory_space<vmem>>, vector<1x8x32xf32>
    %97 = vector.shape_cast %96 : vector<1x8x32xf32> to vector<8x32xf32>
    %98 = vector.shape_cast %95 : vector<8x32xf32> to vector<1x8x32xf32>
    tpu.vector_store %arg7[%c0_34, %c0_35, %c0_36], %98 {strides = array<i32>} : memref<1x8x32xf32, #tpu.memory_space<vmem>>, vector<1x8x32xf32>,
    return
  }
  func.func @transform_0(%arg0: i32) -> (i32, i32, i32) {
    %c0_i32 = arith.constant 0 : i32
    %c0_i32_0 = arith.constant 0 : i32
    %c0_i32_1 = arith.constant 0 : i32
    return %arg0, %c0_i32, %c0_i32_0 : i32, i32, i32
  }
  func.func @transform_1(%arg0: i32) -> (i32, i32, i32) {
    %c0_i32 = arith.constant 0 : i32
    %c0_i32_0 = arith.constant 0 : i32
    %c0_i32_1 = arith.constant 0 : i32
    return %arg0, %c0_i32, %c0_i32_0 : i32, i32, i32
  }
  func.func @transform_2(%arg0: i32) -> (i32, i32, i32) {
    %c0_i32 = arith.constant 0 : i32
    %c0_i32_0 = arith.constant 0 : i32
    %c0_i32_1 = arith.constant 0 : i32
    return %arg0, %c0_i32, %c0_i32_0 : i32, i32, i32
  }
  func.func @transform_3(%arg0: i32) -> (i32, i32, i32) {
    %c0_i32 = arith.constant 0 : i32
    %c0_i32_0 = arith.constant 0 : i32
    %c0_i32_1 = arith.constant 0 : i32
    return %arg0, %c0_i32, %c0_i32_0 : i32, i32, i32
  }
  func.func @transform_4(%arg0: i32) -> (i32, i32) {
    %c0_i32 = arith.constant 0 : i32
    %c0_i32_0 = arith.constant 0 : i32
    %c0_i32_1 = arith.constant 0 : i32
    return %c0_i32, %c0_i32_0 : i32, i32
  }
  func.func @transform_5(%arg0: i32) -> (i32, i32) {
    %c0_i32 = arith.constant 0 : i32
    %c0_i32_0 = arith.constant 0 : i32
    %c0_i32_1 = arith.constant 0 : i32
    return %c0_i32, %c0_i32_0 : i32, i32
  }
  func.func @transform_6(%arg0: i32) -> (i32, i32, i32) {
    %c0_i32 = arith.constant 0 : i32
    %c0_i32_0 = arith.constant 0 : i32
    %c0_i32_1 = arith.constant 0 : i32
    return %arg0, %c0_i32, %c0_i32_0 : i32, i32, i32
  }
}

module attributes {stable_mosaic.version = 11 : i64} {
  func.func @_ffn_highway_ln_kernel(%arg0: i32, %arg1: memref<16x32xf32, #tpu.memory_space<vmem>>, %arg2: memref<32x64xbf16, #tpu.memory_space<vmem>>, %arg3: memref<1x64xf32, #tpu.memory_space<vmem>>, %arg4: memref<64x32xbf16, #tpu.memory_space<vmem>>, %arg5: memref<1x32xf32, #tpu.memory_space<vmem>>, %arg6: memref<32x64xbf16, #tpu.memory_space<vmem>>, %arg7: memref<1x64xf32, #tpu.memory_space<vmem>>, %arg8: memref<64x32xbf16, #tpu.memory_space<vmem>>, %arg9: memref<1x32xf32, #tpu.memory_space<vmem>>, %arg10: memref<1x32xf32, #tpu.memory_space<vmem>>, %arg11: memref<1x32xf32, #tpu.memory_space<vmem>>, %arg12: memref<16x32xf32, #tpu.memory_space<vmem>>) attributes {dimension_semantics = [#tpu.dimension_semantics<parallel>], iteration_bounds = array<i64: 1>, scalar_prefetch = 0 : i64, scratch_operands = 0 : i64, tpu.core_type = #tpu.core_type<tc>, window_params = [{transform_indices = @transform_0, window_bounds = array<i64: 16, 32>}, {pipeline_mode = #tpu.pipeline_mode<synchronous>, transform_indices = @transform_1, window_bounds = array<i64: 32, 64>}, {pipeline_mode = #tpu.pipeline_mode<synchronous>, transform_indices = @transform_2, window_bounds = array<i64: 1, 64>}, {pipeline_mode = #tpu.pipeline_mode<synchronous>, transform_indices = @transform_3, window_bounds = array<i64: 64, 32>}, {pipeline_mode = #tpu.pipeline_mode<synchronous>, transform_indices = @transform_4, window_bounds = array<i64: 1, 32>}, {pipeline_mode = #tpu.pipeline_mode<synchronous>, transform_indices = @transform_5, window_bounds = array<i64: 32, 64>}, {pipeline_mode = #tpu.pipeline_mode<synchronous>, transform_indices = @transform_6, window_bounds = array<i64: 1, 64>}, {pipeline_mode = #tpu.pipeline_mode<synchronous>, transform_indices = @transform_7, window_bounds = array<i64: 64, 32>}, {pipeline_mode = #tpu.pipeline_mode<synchronous>, transform_indices = @transform_8, window_bounds = array<i64: 1, 32>}, {pipeline_mode = #tpu.pipeline_mode<synchronous>, transform_indices = @transform_9, window_bounds = array<i64: 1, 32>}, {pipeline_mode = #tpu.pipeline_mode<synchronous>, transform_indices = @transform_10, window_bounds = array<i64: 1, 32>}, {transform_indices = @transform_11, window_bounds = array<i64: 16, 32>}]} {
    %c0 = arith.constant 0 : index
    %c0_0 = arith.constant 0 : index
    %0 = vector.load %arg1[%c0, %c0_0] : memref<16x32xf32, #tpu.memory_space<vmem>>, vector<16x32xf32>
    %1 = arith.truncf %0 : vector<16x32xf32> to vector<16x32xbf16>
    %c0_1 = arith.constant 0 : index
    %c0_2 = arith.constant 0 : index
    %2 = vector.load %arg2[%c0_1, %c0_2] : memref<32x64xbf16, #tpu.memory_space<vmem>>, vector<32x64xbf16>
    %cst = arith.constant dense<0.000000e+00> : vector<16x64xf32>
    %3 = tpu.matmul %1, %2, %cst {dimension_numbers = #tpu.dot_dimension_numbers<[1], [0], [0], [1], [0, 0, 1, 1], [], []>} : vector<16x32xbf16>, vector<32x64xbf16>, vector<16x64xf32> -> vector<16x64xf32>
    %c0_3 = arith.constant 0 : index
    %c0_4 = arith.constant 0 : index
    %4 = vector.load %arg3[%c0_3, %c0_4] : memref<1x64xf32, #tpu.memory_space<vmem>>, vector<1x64xf32>
    %5 = vector.broadcast %4 : vector<1x64xf32> to vector<16x64xf32>
    %6 = arith.addf %3, %5 : vector<16x64xf32>
    %cst_5 = arith.constant 0.000000e+00 : f32
    %7 = vector.broadcast %cst_5 : f32 to vector<16x64xf32>
    %8 = arith.maximumf %6, %7 : vector<16x64xf32>
    %9 = arith.truncf %8 : vector<16x64xf32> to vector<16x64xbf16>
    %c0_6 = arith.constant 0 : index
    %c0_7 = arith.constant 0 : index
    %10 = vector.load %arg4[%c0_6, %c0_7] : memref<64x32xbf16, #tpu.memory_space<vmem>>, vector<64x32xbf16>
    %cst_8 = arith.constant dense<0.000000e+00> : vector<16x32xf32>
    %11 = tpu.matmul %9, %10, %cst_8 {dimension_numbers = #tpu.dot_dimension_numbers<[1], [0], [0], [1], [0, 0, 1, 1], [], []>} : vector<16x64xbf16>, vector<64x32xbf16>, vector<16x32xf32> -> vector<16x32xf32>
    %c0_9 = arith.constant 0 : index
    %c0_10 = arith.constant 0 : index
    %12 = vector.load %arg5[%c0_9, %c0_10] : memref<1x32xf32, #tpu.memory_space<vmem>>, vector<1x32xf32>
    %13 = vector.broadcast %12 : vector<1x32xf32> to vector<16x32xf32>
    %14 = arith.addf %11, %13 : vector<16x32xf32>
    %c0_11 = arith.constant 0 : index
    %c0_12 = arith.constant 0 : index
    %15 = vector.load %arg6[%c0_11, %c0_12] : memref<32x64xbf16, #tpu.memory_space<vmem>>, vector<32x64xbf16>
    %cst_13 = arith.constant dense<0.000000e+00> : vector<16x64xf32>
    %16 = tpu.matmul %1, %15, %cst_13 {dimension_numbers = #tpu.dot_dimension_numbers<[1], [0], [0], [1], [0, 0, 1, 1], [], []>} : vector<16x32xbf16>, vector<32x64xbf16>, vector<16x64xf32> -> vector<16x64xf32>
    %c0_14 = arith.constant 0 : index
    %c0_15 = arith.constant 0 : index
    %17 = vector.load %arg7[%c0_14, %c0_15] : memref<1x64xf32, #tpu.memory_space<vmem>>, vector<1x64xf32>
    %18 = vector.broadcast %17 : vector<1x64xf32> to vector<16x64xf32>
    %19 = arith.addf %16, %18 : vector<16x64xf32>
    %cst_16 = arith.constant 0.000000e+00 : f32
    %20 = vector.broadcast %cst_16 : f32 to vector<16x64xf32>
    %21 = arith.maximumf %19, %20 : vector<16x64xf32>
    %22 = arith.truncf %21 : vector<16x64xf32> to vector<16x64xbf16>
    %c0_17 = arith.constant 0 : index
    %c0_18 = arith.constant 0 : index
    %23 = vector.load %arg8[%c0_17, %c0_18] : memref<64x32xbf16, #tpu.memory_space<vmem>>, vector<64x32xbf16>
    %cst_19 = arith.constant dense<0.000000e+00> : vector<16x32xf32>
    %24 = tpu.matmul %22, %23, %cst_19 {dimension_numbers = #tpu.dot_dimension_numbers<[1], [0], [0], [1], [0, 0, 1, 1], [], []>} : vector<16x64xbf16>, vector<64x32xbf16>, vector<16x32xf32> -> vector<16x32xf32>
    %c0_20 = arith.constant 0 : index
    %c0_21 = arith.constant 0 : index
    %25 = vector.load %arg9[%c0_20, %c0_21] : memref<1x32xf32, #tpu.memory_space<vmem>>, vector<1x32xf32>
    %26 = vector.broadcast %25 : vector<1x32xf32> to vector<16x32xf32>
    %27 = arith.addf %24, %26 : vector<16x32xf32>
    %cst_22 = arith.constant 5.000000e-01 : f32
    %28 = vector.broadcast %cst_22 : f32 to vector<16x32xf32>
    %29 = arith.mulf %28, %27 : vector<16x32xf32>
    %30 = math.tanh %29 : vector<16x32xf32>
    %cst_23 = arith.constant 1.000000e+00 : f32
    %31 = vector.broadcast %cst_23 : f32 to vector<16x32xf32>
    %32 = arith.addf %30, %31 : vector<16x32xf32>
    %cst_24 = arith.constant 5.000000e-01 : f32
    %33 = vector.broadcast %cst_24 : f32 to vector<16x32xf32>
    %34 = arith.mulf %33, %32 : vector<16x32xf32>
    %35 = arith.mulf %0, %34 : vector<16x32xf32>
    %cst_25 = arith.constant 1.000000e+00 : f32
    %36 = vector.broadcast %cst_25 : f32 to vector<16x32xf32>
    %37 = arith.subf %36, %34 : vector<16x32xf32>
    %38 = arith.mulf %14, %37 : vector<16x32xf32>
    %39 = arith.addf %35, %38 : vector<16x32xf32>
    %c0_26 = arith.constant 0 : index
    %c0_27 = arith.constant 0 : index
    %40 = vector.load %arg10[%c0_26, %c0_27] : memref<1x32xf32, #tpu.memory_space<vmem>>, vector<1x32xf32>
    %c0_28 = arith.constant 0 : index
    %c0_29 = arith.constant 0 : index
    %41 = vector.load %arg11[%c0_28, %c0_29] : memref<1x32xf32, #tpu.memory_space<vmem>>, vector<1x32xf32>
    %cst_30 = arith.constant dense<0.000000e+00> : vector<16xf32>
    %42 = vector.multi_reduction <add>, %39, %cst_30 [1] : vector<16x32xf32> to vector<16xf32>
    %43 = vector.shape_cast %42 : vector<16xf32> to vector<16x1xf32>
    %44 = arith.mulf %39, %39 : vector<16x32xf32>
    %cst_31 = arith.constant dense<0.000000e+00> : vector<16xf32>
    %45 = vector.multi_reduction <add>, %44, %cst_31 [1] : vector<16x32xf32> to vector<16xf32>
    %46 = vector.shape_cast %45 : vector<16xf32> to vector<16x1xf32>
    %cst_32 = arith.constant 3.125000e-02 : f32
    %47 = vector.broadcast %cst_32 : f32 to vector<16x1xf32>
    %48 = arith.mulf %43, %47 : vector<16x1xf32>
    %49 = arith.mulf %43, %48 : vector<16x1xf32>
    %50 = arith.subf %46, %49 : vector<16x1xf32>
    %cst_33 = arith.constant 0.0322580636 : f32
    %51 = vector.broadcast %cst_33 : f32 to vector<16x1xf32>
    %52 = arith.mulf %50, %51 : vector<16x1xf32>
    %cst_34 = arith.constant 0.000000e+00 : f32
    %53 = vector.broadcast %cst_34 : f32 to vector<16x1xf32>
    %54 = arith.maximumf %52, %53 : vector<16x1xf32>
    %55 = math.sqrt %54 : vector<16x1xf32>
    %56 = vector.broadcast %48 : vector<16x1xf32> to vector<16x32xf32>
    %57 = arith.subf %39, %56 : vector<16x32xf32>
    %58 = vector.broadcast %40 : vector<1x32xf32> to vector<16x32xf32>
    %59 = arith.mulf %58, %57 : vector<16x32xf32>
    %cst_35 = arith.constant 9.99999997E-7 : f32
    %60 = vector.broadcast %cst_35 : f32 to vector<16x1xf32>
    %61 = arith.addf %55, %60 : vector<16x1xf32>
    %62 = vector.broadcast %61 : vector<16x1xf32> to vector<16x32xf32>
    %63 = arith.divf %59, %62 : vector<16x32xf32>
    %64 = vector.broadcast %41 : vector<1x32xf32> to vector<16x32xf32>
    %65 = arith.addf %63, %64 : vector<16x32xf32>
    %c0_36 = arith.constant 0 : index
    %c0_37 = arith.constant 0 : index
    %66 = vector.load %arg12[%c0_36, %c0_37] : memref<16x32xf32, #tpu.memory_space<vmem>>, vector<16x32xf32>
    tpu.vector_store %arg12[%c0_36, %c0_37], %65 {strides = array<i32>} : memref<16x32xf32, #tpu.memory_space<vmem>>, vector<16x32xf32>,
    return
  }
  func.func @transform_0(%arg0: i32) -> (i32, i32) {
    %c0_i32 = arith.constant 0 : i32
    %c0_i32_0 = arith.constant 0 : i32
    return %arg0, %c0_i32 : i32, i32
  }
  func.func @transform_1(%arg0: i32) -> (i32, i32) {
    %c0_i32 = arith.constant 0 : i32
    %c0_i32_0 = arith.constant 0 : i32
    %c0_i32_1 = arith.constant 0 : i32
    return %c0_i32, %c0_i32_0 : i32, i32
  }
  func.func @transform_2(%arg0: i32) -> (i32, i32) {
    %c0_i32 = arith.constant 0 : i32
    %c0_i32_0 = arith.constant 0 : i32
    %c0_i32_1 = arith.constant 0 : i32
    return %c0_i32, %c0_i32_0 : i32, i32
  }
  func.func @transform_3(%arg0: i32) -> (i32, i32) {
    %c0_i32 = arith.constant 0 : i32
    %c0_i32_0 = arith.constant 0 : i32
    %c0_i32_1 = arith.constant 0 : i32
    return %c0_i32, %c0_i32_0 : i32, i32
  }
  func.func @transform_4(%arg0: i32) -> (i32, i32) {
    %c0_i32 = arith.constant 0 : i32
    %c0_i32_0 = arith.constant 0 : i32
    %c0_i32_1 = arith.constant 0 : i32
    return %c0_i32, %c0_i32_0 : i32, i32
  }
  func.func @transform_5(%arg0: i32) -> (i32, i32) {
    %c0_i32 = arith.constant 0 : i32
    %c0_i32_0 = arith.constant 0 : i32
    %c0_i32_1 = arith.constant 0 : i32
    return %c0_i32, %c0_i32_0 : i32, i32
  }
  func.func @transform_6(%arg0: i32) -> (i32, i32) {
    %c0_i32 = arith.constant 0 : i32
    %c0_i32_0 = arith.constant 0 : i32
    %c0_i32_1 = arith.constant 0 : i32
    return %c0_i32, %c0_i32_0 : i32, i32
  }
  func.func @transform_7(%arg0: i32) -> (i32, i32) {
    %c0_i32 = arith.constant 0 : i32
    %c0_i32_0 = arith.constant 0 : i32
    %c0_i32_1 = arith.constant 0 : i32
    return %c0_i32, %c0_i32_0 : i32, i32
  }
  func.func @transform_8(%arg0: i32) -> (i32, i32) {
    %c0_i32 = arith.constant 0 : i32
    %c0_i32_0 = arith.constant 0 : i32
    %c0_i32_1 = arith.constant 0 : i32
    return %c0_i32, %c0_i32_0 : i32, i32
  }
  func.func @transform_9(%arg0: i32) -> (i32, i32) {
    %c0_i32 = arith.constant 0 : i32
    %c0_i32_0 = arith.constant 0 : i32
    %c0_i32_1 = arith.constant 0 : i32
    return %c0_i32, %c0_i32_0 : i32, i32
  }
  func.func @transform_10(%arg0: i32) -> (i32, i32) {
    %c0_i32 = arith.constant 0 : i32
    %c0_i32_0 = arith.constant 0 : i32
    %c0_i32_1 = arith.constant 0 : i32
    return %c0_i32, %c0_i32_0 : i32, i32
  }
  func.func @transform_11(%arg0: i32) -> (i32, i32) {
    %c0_i32 = arith.constant 0 : i32
    %c0_i32_0 = arith.constant 0 : i32
    return %arg0, %c0_i32 : i32, i32
  }
}

module attributes {stable_mosaic.version = 11 : i64} {
  func.func @_fused_proj_kernel(%arg0: i32, %arg1: memref<16x32xf32, #tpu.memory_space<vmem>>, %arg2: memref<32x96xbf16, #tpu.memory_space<vmem>>, %arg3: memref<1x96xf32, #tpu.memory_space<vmem>>, %arg4: memref<16x32xf32, #tpu.memory_space<vmem>>, %arg5: memref<16x32xf32, #tpu.memory_space<vmem>>, %arg6: memref<16x32xf32, #tpu.memory_space<vmem>>) attributes {dimension_semantics = [#tpu.dimension_semantics<parallel>], iteration_bounds = array<i64: 1>, scalar_prefetch = 0 : i64, scratch_operands = 0 : i64, tpu.core_type = #tpu.core_type<tc>, window_params = [{transform_indices = @transform_0, window_bounds = array<i64: 16, 32>}, {pipeline_mode = #tpu.pipeline_mode<synchronous>, transform_indices = @transform_1, window_bounds = array<i64: 32, 96>}, {pipeline_mode = #tpu.pipeline_mode<synchronous>, transform_indices = @transform_2, window_bounds = array<i64: 1, 96>}, {transform_indices = @transform_3, window_bounds = array<i64: 16, 32>}, {transform_indices = @transform_4, window_bounds = array<i64: 16, 32>}, {transform_indices = @transform_5, window_bounds = array<i64: 16, 32>}]} {
    %c0 = arith.constant 0 : index
    %c0_0 = arith.constant 0 : index
    %0 = vector.load %arg1[%c0, %c0_0] : memref<16x32xf32, #tpu.memory_space<vmem>>, vector<16x32xf32>
    %1 = arith.truncf %0 : vector<16x32xf32> to vector<16x32xbf16>
    %c0_1 = arith.constant 0 : index
    %c0_2 = arith.constant 0 : index
    %2 = vector.load %arg2[%c0_1, %c0_2] : memref<32x96xbf16, #tpu.memory_space<vmem>>, vector<32x96xbf16>
    %cst = arith.constant dense<0.000000e+00> : vector<16x96xf32>
    %3 = tpu.matmul %1, %2, %cst {dimension_numbers = #tpu.dot_dimension_numbers<[1], [0], [0], [1], [0, 0, 1, 1], [], []>} : vector<16x32xbf16>, vector<32x96xbf16>, vector<16x96xf32> -> vector<16x96xf32>
    %c0_3 = arith.constant 0 : index
    %c0_4 = arith.constant 0 : index
    %4 = vector.load %arg3[%c0_3, %c0_4] : memref<1x96xf32, #tpu.memory_space<vmem>>, vector<1x96xf32>
    %5 = vector.broadcast %4 : vector<1x96xf32> to vector<16x96xf32>
    %6 = arith.addf %3, %5 : vector<16x96xf32>
    %7 = vector.extract_strided_slice %6 {offsets = [0, 0], sizes = [16, 32], strides = [1, 1]} : vector<16x96xf32> to vector<16x32xf32>
    %c0_5 = arith.constant 0 : index
    %c0_6 = arith.constant 0 : index
    %8 = vector.load %arg4[%c0_5, %c0_6] : memref<16x32xf32, #tpu.memory_space<vmem>>, vector<16x32xf32>
    tpu.vector_store %arg4[%c0_5, %c0_6], %7 {strides = array<i32>} : memref<16x32xf32, #tpu.memory_space<vmem>>, vector<16x32xf32>,
    %9 = vector.extract_strided_slice %6 {offsets = [0, 32], sizes = [16, 32], strides = [1, 1]} : vector<16x96xf32> to vector<16x32xf32>
    %c0_7 = arith.constant 0 : index
    %c0_8 = arith.constant 0 : index
    %10 = vector.load %arg5[%c0_7, %c0_8] : memref<16x32xf32, #tpu.memory_space<vmem>>, vector<16x32xf32>
    tpu.vector_store %arg5[%c0_7, %c0_8], %9 {strides = array<i32>} : memref<16x32xf32, #tpu.memory_space<vmem>>, vector<16x32xf32>,
    %11 = vector.extract_strided_slice %6 {offsets = [0, 64], sizes = [16, 32], strides = [1, 1]} : vector<16x96xf32> to vector<16x32xf32>
    %c0_9 = arith.constant 0 : index
    %c0_10 = arith.constant 0 : index
    %12 = vector.load %arg6[%c0_9, %c0_10] : memref<16x32xf32, #tpu.memory_space<vmem>>, vector<16x32xf32>
    tpu.vector_store %arg6[%c0_9, %c0_10], %11 {strides = array<i32>} : memref<16x32xf32, #tpu.memory_space<vmem>>, vector<16x32xf32>,
    return
  }
  func.func @transform_0(%arg0: i32) -> (i32, i32) {
    %c0_i32 = arith.constant 0 : i32
    %c0_i32_0 = arith.constant 0 : i32
    return %arg0, %c0_i32 : i32, i32
  }
  func.func @transform_1(%arg0: i32) -> (i32, i32) {
    %c0_i32 = arith.constant 0 : i32
    %c0_i32_0 = arith.constant 0 : i32
    %c0_i32_1 = arith.constant 0 : i32
    return %c0_i32, %c0_i32_0 : i32, i32
  }
  func.func @transform_2(%arg0: i32) -> (i32, i32) {
    %c0_i32 = arith.constant 0 : i32
    %c0_i32_0 = arith.constant 0 : i32
    %c0_i32_1 = arith.constant 0 : i32
    return %c0_i32, %c0_i32_0 : i32, i32
  }
  func.func @transform_3(%arg0: i32) -> (i32, i32) {
    %c0_i32 = arith.constant 0 : i32
    %c0_i32_0 = arith.constant 0 : i32
    return %arg0, %c0_i32 : i32, i32
  }
  func.func @transform_4(%arg0: i32) -> (i32, i32) {
    %c0_i32 = arith.constant 0 : i32
    %c0_i32_0 = arith.constant 0 : i32
    return %arg0, %c0_i32 : i32, i32
  }
  func.func @transform_5(%arg0: i32) -> (i32, i32) {
    %c0_i32 = arith.constant 0 : i32
    %c0_i32_0 = arith.constant 0 : i32
    return %arg0, %c0_i32 : i32, i32
  }
}

module attributes {stable_mosaic.version = 11 : i64} {
  func.func @_ffn_highway_ln_kernel(%arg0: i32, %arg1: memref<16x32xf32, #tpu.memory_space<vmem>>, %arg2: memref<32x64xbf16, #tpu.memory_space<vmem>>, %arg3: memref<1x64xf32, #tpu.memory_space<vmem>>, %arg4: memref<64x32xbf16, #tpu.memory_space<vmem>>, %arg5: memref<1x32xf32, #tpu.memory_space<vmem>>, %arg6: memref<32x64xbf16, #tpu.memory_space<vmem>>, %arg7: memref<1x64xf32, #tpu.memory_space<vmem>>, %arg8: memref<64x32xbf16, #tpu.memory_space<vmem>>, %arg9: memref<1x32xf32, #tpu.memory_space<vmem>>, %arg10: memref<1x32xf32, #tpu.memory_space<vmem>>, %arg11: memref<1x32xf32, #tpu.memory_space<vmem>>, %arg12: memref<16x32xf32, #tpu.memory_space<vmem>>) attributes {dimension_semantics = [#tpu.dimension_semantics<parallel>], iteration_bounds = array<i64: 1>, scalar_prefetch = 0 : i64, scratch_operands = 0 : i64, tpu.core_type = #tpu.core_type<tc>, window_params = [{transform_indices = @transform_0, window_bounds = array<i64: 16, 32>}, {pipeline_mode = #tpu.pipeline_mode<synchronous>, transform_indices = @transform_1, window_bounds = array<i64: 32, 64>}, {pipeline_mode = #tpu.pipeline_mode<synchronous>, transform_indices = @transform_2, window_bounds = array<i64: 1, 64>}, {pipeline_mode = #tpu.pipeline_mode<synchronous>, transform_indices = @transform_3, window_bounds = array<i64: 64, 32>}, {pipeline_mode = #tpu.pipeline_mode<synchronous>, transform_indices = @transform_4, window_bounds = array<i64: 1, 32>}, {pipeline_mode = #tpu.pipeline_mode<synchronous>, transform_indices = @transform_5, window_bounds = array<i64: 32, 64>}, {pipeline_mode = #tpu.pipeline_mode<synchronous>, transform_indices = @transform_6, window_bounds = array<i64: 1, 64>}, {pipeline_mode = #tpu.pipeline_mode<synchronous>, transform_indices = @transform_7, window_bounds = array<i64: 64, 32>}, {pipeline_mode = #tpu.pipeline_mode<synchronous>, transform_indices = @transform_8, window_bounds = array<i64: 1, 32>}, {pipeline_mode = #tpu.pipeline_mode<synchronous>, transform_indices = @transform_9, window_bounds = array<i64: 1, 32>}, {pipeline_mode = #tpu.pipeline_mode<synchronous>, transform_indices = @transform_10, window_bounds = array<i64: 1, 32>}, {transform_indices = @transform_11, window_bounds = array<i64: 16, 32>}]} {
    %c0 = arith.constant 0 : index
    %c0_0 = arith.constant 0 : index
    %0 = vector.load %arg1[%c0, %c0_0] : memref<16x32xf32, #tpu.memory_space<vmem>>, vector<16x32xf32>
    %1 = arith.truncf %0 : vector<16x32xf32> to vector<16x32xbf16>
    %c0_1 = arith.constant 0 : index
    %c0_2 = arith.constant 0 : index
    %2 = vector.load %arg2[%c0_1, %c0_2] : memref<32x64xbf16, #tpu.memory_space<vmem>>, vector<32x64xbf16>
    %cst = arith.constant dense<0.000000e+00> : vector<16x64xf32>
    %3 = tpu.matmul %1, %2, %cst {dimension_numbers = #tpu.dot_dimension_numbers<[1], [0], [0], [1], [0, 0, 1, 1], [], []>} : vector<16x32xbf16>, vector<32x64xbf16>, vector<16x64xf32> -> vector<16x64xf32>
    %c0_3 = arith.constant 0 : index
    %c0_4 = arith.constant 0 : index
    %4 = vector.load %arg3[%c0_3, %c0_4] : memref<1x64xf32, #tpu.memory_space<vmem>>, vector<1x64xf32>
    %5 = vector.broadcast %4 : vector<1x64xf32> to vector<16x64xf32>
    %6 = arith.addf %3, %5 : vector<16x64xf32>
    %cst_5 = arith.constant 0.000000e+00 : f32
    %7 = vector.broadcast %cst_5 : f32 to vector<16x64xf32>
    %8 = arith.maximumf %6, %7 : vector<16x64xf32>
    %9 = arith.truncf %8 : vector<16x64xf32> to vector<16x64xbf16>
    %c0_6 = arith.constant 0 : index
    %c0_7 = arith.constant 0 : index
    %10 = vector.load %arg4[%c0_6, %c0_7] : memref<64x32xbf16, #tpu.memory_space<vmem>>, vector<64x32xbf16>
    %cst_8 = arith.constant dense<0.000000e+00> : vector<16x32xf32>
    %11 = tpu.matmul %9, %10, %cst_8 {dimension_numbers = #tpu.dot_dimension_numbers<[1], [0], [0], [1], [0, 0, 1, 1], [], []>} : vector<16x64xbf16>, vector<64x32xbf16>, vector<16x32xf32> -> vector<16x32xf32>
    %c0_9 = arith.constant 0 : index
    %c0_10 = arith.constant 0 : index
    %12 = vector.load %arg5[%c0_9, %c0_10] : memref<1x32xf32, #tpu.memory_space<vmem>>, vector<1x32xf32>
    %13 = vector.broadcast %12 : vector<1x32xf32> to vector<16x32xf32>
    %14 = arith.addf %11, %13 : vector<16x32xf32>
    %c0_11 = arith.constant 0 : index
    %c0_12 = arith.constant 0 : index
    %15 = vector.load %arg6[%c0_11, %c0_12] : memref<32x64xbf16, #tpu.memory_space<vmem>>, vector<32x64xbf16>
    %cst_13 = arith.constant dense<0.000000e+00> : vector<16x64xf32>
    %16 = tpu.matmul %1, %15, %cst_13 {dimension_numbers = #tpu.dot_dimension_numbers<[1], [0], [0], [1], [0, 0, 1, 1], [], []>} : vector<16x32xbf16>, vector<32x64xbf16>, vector<16x64xf32> -> vector<16x64xf32>
    %c0_14 = arith.constant 0 : index
    %c0_15 = arith.constant 0 : index
    %17 = vector.load %arg7[%c0_14, %c0_15] : memref<1x64xf32, #tpu.memory_space<vmem>>, vector<1x64xf32>
    %18 = vector.broadcast %17 : vector<1x64xf32> to vector<16x64xf32>
    %19 = arith.addf %16, %18 : vector<16x64xf32>
    %cst_16 = arith.constant 0.000000e+00 : f32
    %20 = vector.broadcast %cst_16 : f32 to vector<16x64xf32>
    %21 = arith.maximumf %19, %20 : vector<16x64xf32>
    %22 = arith.truncf %21 : vector<16x64xf32> to vector<16x64xbf16>
    %c0_17 = arith.constant 0 : index
    %c0_18 = arith.constant 0 : index
    %23 = vector.load %arg8[%c0_17, %c0_18] : memref<64x32xbf16, #tpu.memory_space<vmem>>, vector<64x32xbf16>
    %cst_19 = arith.constant dense<0.000000e+00> : vector<16x32xf32>
    %24 = tpu.matmul %22, %23, %cst_19 {dimension_numbers = #tpu.dot_dimension_numbers<[1], [0], [0], [1], [0, 0, 1, 1], [], []>} : vector<16x64xbf16>, vector<64x32xbf16>, vector<16x32xf32> -> vector<16x32xf32>
    %c0_20 = arith.constant 0 : index
    %c0_21 = arith.constant 0 : index
    %25 = vector.load %arg9[%c0_20, %c0_21] : memref<1x32xf32, #tpu.memory_space<vmem>>, vector<1x32xf32>
    %26 = vector.broadcast %25 : vector<1x32xf32> to vector<16x32xf32>
    %27 = arith.addf %24, %26 : vector<16x32xf32>
    %cst_22 = arith.constant 5.000000e-01 : f32
    %28 = vector.broadcast %cst_22 : f32 to vector<16x32xf32>
    %29 = arith.mulf %28, %27 : vector<16x32xf32>
    %30 = math.tanh %29 : vector<16x32xf32>
    %cst_23 = arith.constant 1.000000e+00 : f32
    %31 = vector.broadcast %cst_23 : f32 to vector<16x32xf32>
    %32 = arith.addf %30, %31 : vector<16x32xf32>
    %cst_24 = arith.constant 5.000000e-01 : f32
    %33 = vector.broadcast %cst_24 : f32 to vector<16x32xf32>
    %34 = arith.mulf %33, %32 : vector<16x32xf32>
    %35 = arith.mulf %0, %34 : vector<16x32xf32>
    %cst_25 = arith.constant 1.000000e+00 : f32
    %36 = vector.broadcast %cst_25 : f32 to vector<16x32xf32>
    %37 = arith.subf %36, %34 : vector<16x32xf32>
    %38 = arith.mulf %14, %37 : vector<16x32xf32>
    %39 = arith.addf %35, %38 : vector<16x32xf32>
    %c0_26 = arith.constant 0 : index
    %c0_27 = arith.constant 0 : index
    %40 = vector.load %arg10[%c0_26, %c0_27] : memref<1x32xf32, #tpu.memory_space<vmem>>, vector<1x32xf32>
    %c0_28 = arith.constant 0 : index
    %c0_29 = arith.constant 0 : index
    %41 = vector.load %arg11[%c0_28, %c0_29] : memref<1x32xf32, #tpu.memory_space<vmem>>, vector<1x32xf32>
    %cst_30 = arith.constant dense<0.000000e+00> : vector<16xf32>
    %42 = vector.multi_reduction <add>, %39, %cst_30 [1] : vector<16x32xf32> to vector<16xf32>
    %43 = vector.shape_cast %42 : vector<16xf32> to vector<16x1xf32>
    %44 = arith.mulf %39, %39 : vector<16x32xf32>
    %cst_31 = arith.constant dense<0.000000e+00> : vector<16xf32>
    %45 = vector.multi_reduction <add>, %44, %cst_31 [1] : vector<16x32xf32> to vector<16xf32>
    %46 = vector.shape_cast %45 : vector<16xf32> to vector<16x1xf32>
    %cst_32 = arith.constant 3.125000e-02 : f32
    %47 = vector.broadcast %cst_32 : f32 to vector<16x1xf32>
    %48 = arith.mulf %43, %47 : vector<16x1xf32>
    %49 = arith.mulf %43, %48 : vector<16x1xf32>
    %50 = arith.subf %46, %49 : vector<16x1xf32>
    %cst_33 = arith.constant 0.0322580636 : f32
    %51 = vector.broadcast %cst_33 : f32 to vector<16x1xf32>
    %52 = arith.mulf %50, %51 : vector<16x1xf32>
    %cst_34 = arith.constant 0.000000e+00 : f32
    %53 = vector.broadcast %cst_34 : f32 to vector<16x1xf32>
    %54 = arith.maximumf %52, %53 : vector<16x1xf32>
    %55 = math.sqrt %54 : vector<16x1xf32>
    %56 = vector.broadcast %48 : vector<16x1xf32> to vector<16x32xf32>
    %57 = arith.subf %39, %56 : vector<16x32xf32>
    %58 = vector.broadcast %40 : vector<1x32xf32> to vector<16x32xf32>
    %59 = arith.mulf %58, %57 : vector<16x32xf32>
    %cst_35 = arith.constant 9.99999997E-7 : f32
    %60 = vector.broadcast %cst_35 : f32 to vector<16x1xf32>
    %61 = arith.addf %55, %60 : vector<16x1xf32>
    %62 = vector.broadcast %61 : vector<16x1xf32> to vector<16x32xf32>
    %63 = arith.divf %59, %62 : vector<16x32xf32>
    %64 = vector.broadcast %41 : vector<1x32xf32> to vector<16x32xf32>
    %65 = arith.addf %63, %64 : vector<16x32xf32>
    %c0_36 = arith.constant 0 : index
    %c0_37 = arith.constant 0 : index
    %66 = vector.load %arg12[%c0_36, %c0_37] : memref<16x32xf32, #tpu.memory_space<vmem>>, vector<16x32xf32>
    tpu.vector_store %arg12[%c0_36, %c0_37], %65 {strides = array<i32>} : memref<16x32xf32, #tpu.memory_space<vmem>>, vector<16x32xf32>,
    return
  }
  func.func @transform_0(%arg0: i32) -> (i32, i32) {
    %c0_i32 = arith.constant 0 : i32
    %c0_i32_0 = arith.constant 0 : i32
    return %arg0, %c0_i32 : i32, i32
  }
  func.func @transform_1(%arg0: i32) -> (i32, i32) {
    %c0_i32 = arith.constant 0 : i32
    %c0_i32_0 = arith.constant 0 : i32
    %c0_i32_1 = arith.constant 0 : i32
    return %c0_i32, %c0_i32_0 : i32, i32
  }
  func.func @transform_2(%arg0: i32) -> (i32, i32) {
    %c0_i32 = arith.constant 0 : i32
    %c0_i32_0 = arith.constant 0 : i32
    %c0_i32_1 = arith.constant 0 : i32
    return %c0_i32, %c0_i32_0 : i32, i32
  }
  func.func @transform_3(%arg0: i32) -> (i32, i32) {
    %c0_i32 = arith.constant 0 : i32
    %c0_i32_0 = arith.constant 0 : i32
    %c0_i32_1 = arith.constant 0 : i32
    return %c0_i32, %c0_i32_0 : i32, i32
  }
  func.func @transform_4(%arg0: i32) -> (i32, i32) {
    %c0_i32 = arith.constant 0 : i32
    %c0_i32_0 = arith.constant 0 : i32
    %c0_i32_1 = arith.constant 0 : i32
    return %c0_i32, %c0_i32_0 : i32, i32
  }
  func.func @transform_5(%arg0: i32) -> (i32, i32) {
    %c0_i32 = arith.constant 0 : i32
    %c0_i32_0 = arith.constant 0 : i32
    %c0_i32_1 = arith.constant 0 : i32
    return %c0_i32, %c0_i32_0 : i32, i32
  }
  func.func @transform_6(%arg0: i32) -> (i32, i32) {
    %c0_i32 = arith.constant 0 : i32
    %c0_i32_0 = arith.constant 0 : i32
    %c0_i32_1 = arith.constant 0 : i32
    return %c0_i32, %c0_i32_0 : i32, i32
  }
  func.func @transform_7(%arg0: i32) -> (i32, i32) {
    %c0_i32 = arith.constant 0 : i32
    %c0_i32_0 = arith.constant 0 : i32
    %c0_i32_1 = arith.constant 0 : i32
    return %c0_i32, %c0_i32_0 : i32, i32
  }
  func.func @transform_8(%arg0: i32) -> (i32, i32) {
    %c0_i32 = arith.constant 0 : i32
    %c0_i32_0 = arith.constant 0 : i32
    %c0_i32_1 = arith.constant 0 : i32
    return %c0_i32, %c0_i32_0 : i32, i32
  }
  func.func @transform_9(%arg0: i32) -> (i32, i32) {
    %c0_i32 = arith.constant 0 : i32
    %c0_i32_0 = arith.constant 0 : i32
    %c0_i32_1 = arith.constant 0 : i32
    return %c0_i32, %c0_i32_0 : i32, i32
  }
  func.func @transform_10(%arg0: i32) -> (i32, i32) {
    %c0_i32 = arith.constant 0 : i32
    %c0_i32_0 = arith.constant 0 : i32
    %c0_i32_1 = arith.constant 0 : i32
    return %c0_i32, %c0_i32_0 : i32, i32
  }
  func.func @transform_11(%arg0: i32) -> (i32, i32) {
    %c0_i32 = arith.constant 0 : i32
    %c0_i32_0 = arith.constant 0 : i32
    return %arg0, %c0_i32 : i32, i32
  }
}

</mosaic_0001>

<bundles_post_ra>
// kernel: decoder_forward.19
= control target key start
LH: loop header
LB: loop body
LE: loop exit
PB: predicated region body
PF: predicated region fallthrough
CT: control target
= control target key end

     0   :  { %vm38_vm0 = vcmask 261120   ;;  %s115_s1 = inlined_call_operand.vmem [shape: bf16[32,32], index: 1, kind: input, shape index: {}]   ;;  %s116_s0 = inlined_call_operand.vmem [shape: f32[16,32], index: 0, kind: input, shape index: {}]   ;;  %s117_s2 = inlined_call_operand.vmem [shape: f32[1,32], index: 2, kind: input, shape index: {}]   ;;  %s118_s3 = inlined_call_operand.vmem [shape: f32[16,32], index: 3, kind: output, shape index: {}]  }
   0x1   :  { %v72_v0 = vld [vmem:[%s115_s1 + $0x8] sm:$0xff]  ;;  %v71_v1 = vld [vmem:[%s115_s1] sm:$0xff] }
   0x2   :  { %48 = vmatpush.bf16.msra.mxu0 %v72_v0  ;;  %v15_v2 = vld [vmem:[%s116_s0] sm:$0xff]  ;;  %v16_v3 = vld [vmem:[%s116_s0 + $0x8] sm:$0xff] }
   0x3   :  { %v17_v4 = vpack.c.bf16 %v16_v3, %v15_v2  ;;  %v73_v5 = vld [vmem:[%s117_s2] ss:$0 sm:$0xff] }
   0x6   :  { %49 = vmatpush.bf16.msra.mxu0 %v71_v1 }
   0x9   :  { %70 = vmatmul.msk.bf16.vlgmr.msra.gmra.mxu0 %vm38_vm0, %v17_v4 }
  0x86   :  { %v51_v6 = vpop.f32.mrf.mxu0 }
  0x87   :  { %v52_v7 = vadd.f32 %v73_v5, %v51_v6 }
  0x89   :  { %56 = vst.msk [vmem:[%s118_s3] sm:$0xff] %vm38_vm0, %v52_v7 }
  0x8e   :  { %v53_v8 = vpop.f32.mrf.mxu0 }
  0x8f   :  { %v54_v9 = vadd.f32 %v73_v5, %v53_v8 }
  0x91   :  { %57 = vst.msk [vmem:[%s118_s3 + $0x8] sm:$0xff] %vm38_vm0, %v54_v9 }

// kernel: decoder_forward.16
= control target key start
LH: loop header
LB: loop body
LE: loop exit
PB: predicated region body
PF: predicated region fallthrough
CT: control target
= control target key end

     0   :  { %vm41_vm0 = vcmask 261120   ;;  %s105_s29 = smov 64   ;;  %s106_s30 = smov 96   ;;  %s177_s1 = inlined_call_operand.vmem [shape: bf16[32,96], index: 1, kind: input, shape index: {}]   ;;  %s178_s0 = inlined_call_operand.vmem [shape: f32[16,32], index: 0, kind: input, shape index: {}]   ;;  %s179_s2 = inlined_call_operand.vmem [shape: f32[1,96], index: 2, kind: input, shape index: {}]   ;;  %s180_s3 = inlined_call_operand.vmem [shape: f32[16,32], index: 3, kind: output, shape index: {0}]   ;;  %s181_s5 = inlined_call_operand.vmem [shape: f32[16,32], index: 5, kind: output, shape index: {2}]   ;;  %s182_s4 = inlined_call_operand.vmem [shape: f32[16,32], index: 4, kind: output, shape index: {1}]  }
   0x1   :  { %v101_v0 = vld [vmem:[%s177_s1 + $0x8] sm:$0xff]  ;;  %v100_v1 = vld [vmem:[%s177_s1] sm:$0xff] }
   0x2   :  { %51 = vmatpush.bf16.msra.mxu0 %v101_v0  ;;  %v18_v2 = vld [vmem:[%s178_s0] sm:$0xff]  ;;  %v19_v3 = vld [vmem:[%s178_s0 + $0x8] sm:$0xff] }
   0x3   :  { %v20_v4 = vpack.c.bf16 %v19_v3, %v18_v2  ;;  %v104_v5 = vld [vmem:[%s179_s2] ss:$0 sm:$0xff] }
   0x6   :  { %52 = vmatpush.bf16.msra.mxu0 %v100_v1 }
   0x9   :  { %99 = vmatmul.msk.bf16.vlgmr.msra.gmra.mxu0 %vm41_vm0, %v20_v4 }
  0x86   :  { %v54_v6 = vpop.f32.mrf.mxu0 }
  0x87   :  { %v55_v7 = vadd.f32 %v104_v5, %v54_v6 }
  0x89   :  { %59 = vst.msk [vmem:[%s180_s3] sm:$0xff] %vm41_vm0, %v55_v7  ;;  %71 = vrot.lane.b32.xlu1 %v55_v7, %s105_s29  ;;  %63 = vrot.lane.b32.xlu0 %v55_v7, %s106_s30 }
  0x8e   :  { %v56_v8 = vpop.f32.mrf.mxu0 }
  0x8f   :  { %v57_v9 = vadd.f32 %v104_v5, %v56_v8 }
  0x91   :  { %60 = vst.msk [vmem:[%s180_s3 + $0x8] sm:$0xff] %vm41_vm0, %v57_v9  ;;  %73 = vrot.lane.b32.xlu1 %v57_v9, %s105_s29  ;;  %65 = vrot.lane.b32.xlu0 %v57_v9, %s106_s30 }
  0xfb   :  { %v72_v10 = vpop.permute.xlu1 %71  ;;  %v64_v11 = vpop.permute.xlu0 %63 }
  0xfc   :  { %77 = vst.msk [vmem:[%s181_s5] sm:$0xff] %vm41_vm0, %v72_v10 }
  0xfd   :  { %69 = vst.msk [vmem:[%s182_s4] sm:$0xff] %vm41_vm0, %v64_v11 }
 0x103   :  { %v74_v12 = vpop.permute.xlu1 %73  ;;  %v66_v13 = vpop.permute.xlu0 %65 }
 0x104   :  { %78 = vst.msk [vmem:[%s181_s5 + $0x8] sm:$0xff] %vm41_vm0, %v74_v12 }
 0x105   :  { %70 = vst.msk [vmem:[%s182_s4 + $0x8] sm:$0xff] %vm41_vm0, %v66_v13 }

// kernel: decoder_forward.18
= control target key start
LH: loop header
LB: loop body
LE: loop exit
PB: predicated region body
PF: predicated region fallthrough
CT: control target
= control target key end

     0   :  { %vm55_vm0 = vcmask 261120   ;;  %vm112_vm1 = vcmask 523264   ;;  %s410_s2 = inlined_call_operand.vmem [shape: bf16[32,64], index: 2, kind: input, shape index: {}]   ;;  %s411_s0 = inlined_call_operand.vmem [shape: f32[16,32], index: 0, kind: input, shape index: {}]   ;;  %s412_s3 = inlined_call_operand.vmem [shape: f32[1,64], index: 3, kind: input, shape index: {}]   ;;  %s413_s5 = inlined_call_operand.vmem [shape: f32[1,32], index: 5, kind: input, shape index: {}]   ;;  %s414_s4 = inlined_call_operand.vmem [shape: bf16[64,32], index: 4, kind: input, shape index: {}]   ;;  %s415_s6 = inlined_call_operand.vmem [shape: f32[1,32], index: 6, kind: input, shape index: {}]   ;;  %s416_s1 = inlined_call_operand.vmem [shape: f32[16,32], index: 1, kind: input, shape index: {}]   ;;  %s417_s7 = inlined_call_operand.vmem [shape: f32[1,32], index: 7, kind: input, shape index: {}]   ;;  %s418_s8 = inlined_call_operand.vmem [shape: f32[16,32], index: 8, kind: output, shape index: {}]  }
   0x1   :  { %v273_v0 = vld [vmem:[%s410_s2 + $0x8] sm:$0xff]  ;;  %v272_v1 = vld [vmem:[%s410_s2] sm:$0xff]  ;;  %v277_v5 = vld [vmem:[%s414_s4 + $0x18] sm:$0xff] }
   0x2   :  { %65 = vmatpush.bf16.msra.mxu0 %v273_v0  ;;  %v30_v2 = vld [vmem:[%s411_s0] sm:$0xff]  ;;  %v31_v3 = vld [vmem:[%s411_s0 + $0x8] sm:$0xff]  ;;  %120 = vmatpush.bf16.msra.mxu1 %v277_v5  ;;  %v276_v6 = vld [vmem:[%s414_s4 + $0x10] sm:$0xff] }
   0x3   :  { %v34_v4 = vpack.c.bf16 %v31_v3, %v30_v2  ;;  %v275_v7 = vld [vmem:[%s414_s4 + $0x8] sm:$0xff]  ;;  %v274_v8 = vld [vmem:[%s414_s4] sm:$0xff] }
   0x4   :  { %v278_v10 = vld [vmem:[%s412_s3] ss:$0 sm:$0xff]  ;;  %v33_v37 = vld [vmem:[%s416_s1 + $0x8] sm:$0xff] }
   0x5   :  { %v279_v17 = vld [vmem:[%s413_s5] ss:$0 sm:$0xff] }
   0x6   :  { %66 = vmatpush.bf16.msra.mxu0 %v272_v1  ;;  %121 = vmatpush.bf16.msra.mxu1 %v276_v6  ;;  %v32_v27 = vld [vmem:[%s416_s1] sm:$0xff] }
   0x9   :  { %254 = vmatmul.msk.bf16.vlgmr.msra.gmra.mxu0 %vm55_vm0, %v34_v4 }
   0xa   :  { %122 = vmatpush.bf16.msra.mxu1 %v275_v7 }
   0xe   :  { %123 = vmatpush.bf16.msra.mxu1 %v274_v8 }
  0x86   :  { %v68_v9 = vpop.f32.mrf.mxu0 }
  0x87   :  { %v69_v11 = vadd.f32 %v278_v10, %v68_v9 }
  0x89   :  { %v73_v14 = vmax.f32 %v69_v11, 0.0 }
  0x8e   :  { %v70_v12 = vpop.f32.mrf.mxu0 }
  0x8f   :  { %v71_v13 = vadd.f32 %v278_v10, %v70_v12 }
  0x91   :  { %v74_v15 = vmax.f32 %v71_v13, 0.0 }
  0x93   :  { %v75_v16 = vpack.c.bf16 %v74_v15, %v73_v14 }
  0x95   :  { %271 = vmatmul.msk.bf16.vlgmr.msra.gmra.mxu1 %vm112_vm1, %v75_v16 }
 0x112   :  { %v125_v18 = vpop.f32.mrf.mxu1 }
 0x113   :  { %v126_v19 = vadd.f32 %v279_v17, %v125_v18 }
 0x115   :  { %v130_v20 = vmul.f32 0.5, %v126_v19 }
 0x117   :  { %282 = vtanh.f32 %v130_v20 }
 0x11a   :  { %v127_v21 = vpop.f32.mrf.mxu1 }
 0x11b   :  { %v128_v22 = vadd.f32 %v279_v17, %v127_v21 }
 0x11d   :  { %v283_v23 = vpop.eup %282  ;;  %v131_v24 = vmul.f32 0.5, %v128_v22  ;;  %v280_v22 = vld [vmem:[%s415_s6] ss:$0 sm:$0xff] }
 0x11e   :  { %v134_v25 = vadd.f32 1.0, %v283_v23 }
 0x11f   :  { %284 = vtanh.f32 %v131_v24 }
 0x120   :  { %v136_v26 = vmul.f32 0.5, %v134_v25 }
 0x122   :  { %v140_v28 = vsub.f32 1.0, %v136_v26  ;;  %v138_v29 = vmul.f32 %v136_v26, %v30_v2 }
 0x124   :  { %v142_v30 = vmul.f32 %v140_v28, %v32_v27 }
 0x125   :  { %v285_v31 = vpop.eup %284 }
 0x126   :  { %v135_v32 = vadd.f32 1.0, %v285_v31  ;;  %v373_v33 = vadd.f32 %v142_v30, %v138_v29  ;;  %v281_v30 = vld [vmem:[%s417_s7] ss:$0 sm:$0xff] }
 0x128   :  { %v137_v34 = vmul.f32 0.5, %v135_v32  ;;  %v148_v35 = vsel %vm55_vm0, %v373_v33, 0.0  ;;  %v154_v36 = vmul.f32 %v373_v33, %v373_v33 }
 0x129   :  { %149 = vadd.xlane.f32.xlu0 %v148_v35 }
 0x12a   :  { %v141_v38 = vsub.f32 1.0, %v137_v34  ;;  %v156_v39 = vsel %vm55_vm0, %v154_v36, 0.0  ;;  %v139_v40 = vmul.f32 %v137_v34, %v31_v3 }
 0x12b   :  { %157 = vadd.xlane.f32.xlu1 %v156_v39 }
 0x12c   :  { %v143_v41 = vmul.f32 %v141_v38, %v33_v37 }
 0x12e   :  { %v383_v42 = vadd.f32 %v143_v41, %v139_v40 }
 0x130   :  { %v151_v43 = vsel %vm55_vm0, %v383_v42, 0.0  ;;  %v155_v44 = vmul.f32 %v383_v42, %v383_v42 }
 0x131   :  { %152 = vadd.xlane.f32.xlu0 %v151_v43 }
 0x132   :  { %v159_v45 = vsel %vm55_vm0, %v155_v44, 0.0 }
 0x133   :  { %160 = vadd.xlane.f32.xlu1 %v159_v45 }
 0x19c   :  { %v150_v46 = vpop.xlane.xlu0 %149 }
 0x19d   :  { %v162_v47 = vmul.f32 0.03125, %v150_v46 }
 0x19e   :  { %v158_v49 = vpop.xlane.xlu1 %157 }
 0x19f   :  { %v164_v48 = vmul.f32 %v162_v47, %v150_v46  ;;  %v196_v23 = vsub.f32 %v373_v33, %v162_v47 }
 0x1a1   :  { %v166_v50 = vsub.f32 %v158_v49, %v164_v48  ;;  %v201_v29 = vmul.f32 %v280_v22, %v196_v23 }
 0x1a3   :  { %v168_v51 = vmul.f32 0.032258064, %v166_v50 }
 0x1a4   :  { %v153_v52 = vpop.xlane.xlu0 %152 }
 0x1a5   :  { %v170_v53 = vmax.f32 %v168_v51, 0.0  ;;  %v390_v54 = vmul.f32 0.03125, %v153_v52 }
 0x1a6   :  { %v161_v56 = vpop.xlane.xlu1 %160 }
 0x1a7   :  { %286 = vrsqrt.f32 %v170_v53  ;;  %v165_v55 = vmul.f32 %v390_v54, %v153_v52  ;;  %vm179_vm2 = vcmp.eq.f32.partialorder %v170_v53, inf  ;;  %v182_v5 = vand.u32 2147483648, %v170_v53 }
 0x1a8   :  { %vm181_vm3 = vcmp.eq.f32.partialorder %v170_v53, 0.0  ;;  %v197_v38 = vsub.f32 %v383_v42, %v390_v54 }
 0x1a9   :  { %v167_v57 = vsub.f32 %v161_v56, %v165_v55 }
 0x1aa   :  { %v202_v44 = vmul.f32 %v280_v22, %v197_v38 }
 0x1ab   :  { %v169_v58 = vmul.f32 0.032258064, %v167_v57 }
 0x1ad   :  { %v287_v59 = vpop.eup %286  ;;  %v171_v61 = vmax.f32 %v169_v58, 0.0 }
 0x1ae   :  { %v173_v60 = vmul.f32 %v287_v59, %v170_v53 }
 0x1af   :  { %288 = vrsqrt.f32 %v171_v61  ;;  %vm191_vm4 = vcmp.eq.f32.partialorder %v171_v61, inf  ;;  %v194_v14 = vand.u32 2147483648, %v171_v61  ;;  %vm193_vm5 = vcmp.eq.f32.partialorder %v171_v61, 0.0 }
 0x1b0   :  { %v174_v62 = vmul.f32 %v287_v59, %v173_v60 }
 0x1b2   :  { %v175_v63 = vmul.f32 0.5, %v174_v62 }
 0x1b4   :  { %v176_v0 = vsub.f32 1.5, %v175_v63 }
 0x1b5   :  { %v289_v1 = vpop.eup %288 }
 0x1b6   :  { %v177_v2 = vmul.f32 %v287_v59, %v176_v0  ;;  %v185_v3 = vmul.f32 %v289_v1, %v171_v61 }
 0x1b8   :  { %v178_v4 = vmul.f32 %v177_v2, %v170_v53  ;;  %v186_v6 = vmul.f32 %v289_v1, %v185_v3 }
 0x1ba   :  { %v180_v7 = vsel %vm179_vm2, %v170_v53, %v178_v4  ;;  %v187_v9 = vmul.f32 0.5, %v186_v6 }
 0x1bb   :  { %v183_v8 = vsel %vm181_vm3, %v182_v5, %v180_v7 }
 0x1bc   :  { %v203_v10 = vadd.f32 1e-06, %v183_v8  ;;  %v188_v11 = vsub.f32 1.5, %v187_v9 }
 0x1be   :  { %290 = vrcp.f32 %v203_v10  ;;  %v189_v12 = vmul.f32 %v289_v1, %v188_v11  ;;  %v216_v21 = vand.u32 2147483648, %v203_v10  ;;  %v214_v25 = vand.u32 2147483647, %v203_v10 }
 0x1bf   :  { %vm210_vm7 = vweird.f32 %v203_v10 }
 0x1c0   :  { %v190_v13 = vmul.f32 %v189_v12, %v171_v61  ;;  %v217_v27 = vor.u32 1.1754944e-38, %v216_v21  ;;  %vm215_vm9 = vcmp.eq.f32.partialorder %v214_v25, 8.507059e+37 }
 0x1c2   :  { %v192_v15 = vsel %vm191_vm4, %v171_v61, %v190_v13 }
 0x1c3   :  { %v195_v17 = vsel %vm193_vm5, %v194_v14, %v192_v15 }
 0x1c4   :  { %v291_v16 = vpop.eup %290  ;;  %v204_v19 = vadd.f32 1e-06, %v195_v17 }
 0x1c5   :  { %v206_v18 = vmul.f32 %v291_v16, %v203_v10  ;;  %vm211_vm6 = vweird.f32 %v291_v16 }
 0x1c6   :  { %292 = vrcp.f32 %v204_v19  ;;  %vm212_vm8 = vmor %vm210_vm7, %vm211_vm6  ;;  %v231_v37 = vand.u32 2147483648, %v204_v19  ;;  %v229_v40 = vand.u32 2147483647, %v204_v19  ;;  %vm225_vm11 = vweird.f32 %v204_v19 }
 0x1c7   :  { %v207_v20 = vsub.f32 1.0, %v206_v18 }
 0x1c8   :  { %v232_v43 = vor.u32 1.1754944e-38, %v231_v37  ;;  %vm230_vm13 = vcmp.eq.f32.partialorder %v229_v40, 8.507059e+37 }
 0x1c9   :  { %v208_v24 = vmul.f32 %v291_v16, %v207_v20 }
 0x1cb   :  { %v209_v26 = vadd.f32 %v291_v16, %v208_v24 }
 0x1cc   :  { %v293_v28 = vpop.eup %292 }
 0x1cd   :  { %v213_v31 = vsel %vm212_vm8, %v291_v16, %v209_v26  ;;  %v221_v34 = vmul.f32 %v293_v28, %v204_v19  ;;  %vm226_vm10 = vweird.f32 %v293_v28 }
 0x1ce   :  { %v218_v32 = vsel %vm215_vm9, %v217_v27, %v213_v31  ;;  %vm227_vm12 = vmor %vm225_vm11, %vm226_vm10 }
 0x1cf   :  { %v219_v35 = vmul.f32 %v218_v32, %v201_v29  ;;  %v222_v36 = vsub.f32 1.0, %v221_v34 }
 0x1d1   :  { %v238_v33 = vadd.f32 %v281_v30, %v219_v35  ;;  %v223_v39 = vmul.f32 %v293_v28, %v222_v36 }
 0x1d3   :  { %240 = vst.msk [vmem:[%s418_s8] sm:$0xff] %vm55_vm0, %v238_v33  ;;  %v224_v41 = vadd.f32 %v293_v28, %v223_v39 }
 0x1d5   :  { %v228_v45 = vsel %vm227_vm12, %v293_v28, %v224_v41 }
 0x1d6   :  { %v233_v46 = vsel %vm230_vm13, %v232_v43, %v228_v45 }
 0x1d7   :  { %v234_v47 = vmul.f32 %v233_v46, %v202_v44 }
 0x1d9   :  { %v239_v48 = vadd.f32 %v281_v30, %v234_v47 }
 0x1db   :  { %241 = vst.msk [vmem:[%s418_s8 + $0x8] sm:$0xff] %vm55_vm0, %v239_v48 }

// kernel: decoder_forward.17
= control target key start
LH: loop header
LB: loop body
LE: loop exit
PB: predicated region body
PF: predicated region fallthrough
CT: control target
= control target key end

     0   :  { %s800_s21 = smov 0   ;;  %s878_s0 = inlined_call_operand.vmem [shape: f32[2,8,32], index: 0, kind: input, shape index: {}]   ;;  %s879_s1 = inlined_call_operand.vmem [shape: f32[2,8,32], index: 1, kind: input, shape index: {}]   ;;  %s880_s2 = inlined_call_operand.vmem [shape: f32[2,8,32], index: 2, kind: input, shape index: {}]   ;;  %s881_s3 = inlined_call_operand.vmem [shape: f32[2,1,8], index: 3, kind: input, shape index: {}]   ;;  %s882_s4 = inlined_call_operand.vmem [shape: bf16[32,32], index: 4, kind: input, shape index: {}]   ;;  %s883_s5 = inlined_call_operand.vmem [shape: f32[1,32], index: 5, kind: input, shape index: {}]   ;;  %s884_s6 = inlined_call_operand.vmem [shape: f32[2,8,32], index: 6, kind: output, shape index: {}]  }
   0x1 LB: > { %s687_s22 = sadd.s32 4294967295, %s756_s21   ;;  %p691_p0 = scmp.ge.s32.totalorder %s756_s21, 1  ;;  %s756_s21 = sphi %s800_s21, %s16_s21  }
   0x2   : > { %p237_p1 = scmp.lt.s32.totalorder %s756_s21, 3 }
   0x4   : > { %p238_p2 = pnand %p691_p0, %p237_p1 }
   0x5   : > { %p276_p3 = scmp.lt.s32.totalorder (!%p238_p2), %s687_s22, 1  ;;  %s758_s30 = smov (!%p238_p2), 112  }
   0x6   : > { %241 = sbr.rel (%p238_p2) target bundleno = 1216 (0x4c0), region = 44  ;;  %s759_s10 = smov (!%p238_p2), 104  }
   0x7   : > { %s761_s11 = smov (!%p238_p2), 120   ;;  %s762_s15 = smov (!%p238_p2), 8  }
   0x8   : > { %s763_s16 = smov (!%p238_p2), 16   ;;  %s764_s17 = smov (!%p238_p2), 24  }
   0xb   : > { %s886_s22 = smov (!%p276_p3, %s687_s22), 1  ;;  %vm316_vm0 = vcmask 64512   ;;  %v302_v9 = vlaneseq  ;;  %v760_v17 = vmov 0.0   ;;  %vm351_vm2 = vcmask 1043456  }
   0xc   : > { %s808_s23 = sshll.u32 %s886_s22, 3  ;;  %s290_s9 = scalar_lea.vmem %s881_s3, %s886_s22  ;;  %vm558_vm3 = vcmask 130048   ;;  %vm560_vm4 = vcmask 195584   ;;  %vm583_vm5 = vcmask 261120  }
   0xd   : > { %s283_s26 = scalar_lea.vmem %s879_s1, %s808_s23  ;;  %s279_s29 = scalar_lea.vmem %s878_s0, %s808_s23  ;;  %v299_v8 = vld [vmem:[%s290_s9] sm:$0x1]  ;;  %v303_v12 = vshrl.u32 %v302_v9, 7  ;;  %v305_v13 = vand.u32 127, %v302_v9 }
   0xe   : > { %v297_v0 = vld [vmem:[%s283_s26] sm:$0xff]  ;;  %v696_v10 = vadd.f32 -1.0, %v299_v8  ;;  %s287_s14 = scalar_lea.vmem %s880_s2, %s808_s23  ;;  %s294_s28 = scalar_lea.vmem %s884_s6, %s808_s23 }
   0xf   : > { %v296_v1 = vld [vmem:[%s279_s29] sm:$0xff]  ;;  %v314_v2 = vpack.c.bf16 %v297_v0, %v297_v0  ;;  %vm306_vm1 = vcmp.gt.s32.totalorder %v305_v13, %v303_v12 }
  0x10   : > { %v312_v4 = vmul.f32 0.17677669, %v296_v1  ;;  %v301_v14 = vmul.f32 1e+10, %v696_v10  ;;  %v307_v18 = vsel %vm306_vm1, 1e+10, %v760_v17 }
  0x11   : > { %v321_v3 = vsel %vm316_vm0, %v314_v2, 0  ;;  %v374_v6 = vunpack.c.l.b16 %v314_v2  ;;  %v298_v34 = vld [vmem:[%s287_s14] sm:$0xff] }
  0x12   : > { %330 = vmatpush.bf16.xpose.msra.mxu0 %v321_v3  ;;  %v313_v5 = vpack.c.bf16 %v312_v4, %v312_v4  ;;  %v309_v16 = vperm.slane %v301_v14, 0  ;;  %v315_v35 = vpack.c.bf16 %v298_v34, %v298_v34 }
  0x13   : > { %v375_v7 = vpack.c.b16 %v374_v6, %v374_v6 }
  0x14   : > { %v369_v11 = vunpack.c.l.b16 %v313_v5  ;;  %v311_v19 = vsub.f32 %v309_v16, %v307_v18  ;;  %v353_v36 = vsel %vm351_vm2, %v315_v35, 0  ;;  %v410_v59 = vunpack.c.l.b16 %v315_v35 }
  0x15   : > { %435 = vrot.lane.b32.xlu2 %v375_v7, %s758_s30  ;;  %362 = vmatpush.bf16.msra.mxu1 %v353_v36  ;;  %v717_v36 = vld [vmem:[%s882_s4 + $0x8] sm:$0xff] }
  0x16   : > { %v370_v15 = vpack.c.b16 %v369_v11, %v369_v11  ;;  %v411_v60 = vpack.c.b16 %v410_v59, %v410_v59 }
  0x19   : > { %697 = vmatmul.msk.bf16.vlgmr.msra.gmra.mxu0 %vm316_vm0, %v313_v5 }
  0x1d   : > { %491 = vrot.lane.b32.xlu2 %v375_v7, %s759_s10 }
  0x25   : > { %433 = vrot.lane.b32.xlu2 %v370_v15, %s758_s30 }
  0x2d   : > { %489 = vrot.lane.b32.xlu2 %v370_v15, %s759_s10 }
  0x6f   : > { %v436_v24 = vpop.permute.xlu2 %435 }
  0x70   : > { %v441_v37 = vsel %vm316_vm0, %v436_v24, 0 }
  0x71   : > { %450 = vmatpush.bf16.xpose.msrb.mxu1 %v441_v37  ;;  %v716_v37 = vld [vmem:[%s882_s4] sm:$0xff] }
  0x77   : > { %v492_v25 = vpop.permute.xlu2 %491 }
  0x78   : > { %v497_v30 = vsel %vm316_vm0, %v492_v25, 0 }
  0x79   : > { %506 = vmatpush.bf16.xpose.msrb.mxu0 %v497_v30 }
  0x7f   : > { %v434_v29 = vpop.permute.xlu2 %433 }
  0x87   : > { %v490_v33 = vpop.permute.xlu2 %489 }
  0x88   : > { %703 = vmatmul.msk.bf16.vlgmr.msrb.gmra.mxu0 %vm316_vm0, %v490_v33 }
  0x96   : > { %v332_v20 = vpop.f32.mrf.mxu0 }
  0x97   : > { %v333_v21 = vadd.f32 %v332_v20, %v311_v19 }
  0x99   : > { %v336_v22 = vsel %vm316_vm0, %v333_v21, -inf }
  0x9a   : > { %337 = vmax.xlane.f32.xlu0 %v336_v22 }
  0x9e   : > { %v334_v23 = vpop.f32.mrf.mxu0 }
  0xae   : > { %376 = vrot.lane.b32.xlu0 %v375_v7, %s761_s11 }
 0x105   : > { %v508_v44 = vpop.f32.mrf.mxu0 }
 0x106   : > { %v509_v45 = vadd.f32 %v508_v44, %v311_v19 }
 0x108   : > { %v512_v46 = vsel %vm316_vm0, %v509_v45, -inf }
 0x10d   : > { %v338_v26 = vpop.xlane.xlu0 %337  ;;  %v510_v47 = vpop.f32.mrf.mxu0 }
 0x10e   : > { %v339_v27 = vsub.f32 %v333_v21, %v338_v26 }
 0x110   : > { %v340_v28 = vmul.f32 1.442695, %v339_v27 }
 0x112   : > { %734 = vpow2.f32 %v340_v28 }
 0x118   : > { %v735_v31 = vpop.eup %734 }
 0x119   : > { %v342_v32 = vsel %vm316_vm0, %v735_v31, 0.0 }
 0x11a   : > { %343 = vadd.xlane.f32.xlu1 %v342_v32 }
 0x120   : > { %v377_v38 = vpop.permute.xlu0 %376 }
 0x121   : > { %v382_v39 = vsel %vm316_vm0, %v377_v38, 0 }
 0x122   : > { %391 = vmatpush.bf16.xpose.msra.mxu2 %v382_v39 }
 0x133   : > { %371 = vrot.lane.b32.xlu1 %v370_v15, %s761_s11 }
 0x15d   : > { %513 = vmax.xlane.f32.xlu1 %v512_v46 }
 0x18d   : > { %v344_v40 = vpop.xlane.xlu1 %343 }
 0x18e   : > { %736 = vrcp.f32 %v344_v40 }
 0x194   : > { %v737_v41 = vpop.eup %736 }
 0x195   : > { %v346_v42 = vmul.f32 %v737_v41, %v735_v31 }
 0x197   : > { %v347_v43 = vpack.c.bf16 %v346_v42, %v346_v42 }
 0x199   : > { %698 = vmatmul.msk.bf16.vlgmr.msra.gmra.mxu1 %vm316_vm0, %v347_v43 }
 0x19a   : > { %593 = vmatpush.bf16.msra.mxu1 %v717_v36 }
 0x19e   : > { %594 = vmatpush.bf16.msra.mxu1 %v716_v37 }
 0x1a5   : > { %v372_v48 = vpop.permute.xlu1 %371 }
 0x1a6   : > { %699 = vmatmul.msk.bf16.vlgmr.msra.gmra.mxu2 %vm316_vm0, %v372_v48 }
 0x1a9   : > { %701 = vmatmul.msk.bf16.vlgmr.msrb.gmra.mxu1 %vm316_vm0, %v434_v29 }
 0x1d0   : > { %v514_v63 = vpop.xlane.xlu1 %513 }
 0x1d1   : > { %v515_v3 = vsub.f32 %v509_v45, %v514_v63  ;;  %v733_v45 = vld [vmem:[%s883_s5] ss:$0 sm:$0xff] }
 0x1d3   : > { %v516_v5 = vmul.f32 1.442695, %v515_v3 }
 0x216   : > { %v844_v49 = vpop.f32.mrf.mxu1 }
 0x21e   : > { %v366_v50 = vpop.f32.mrf.mxu1 }
 0x226   : > { %v452_v51 = vpop.f32.mrf.mxu1 }
 0x227   : > { %v453_v52 = vadd.f32 %v452_v51, %v311_v19 }
 0x229   : > { %v393_v53 = vpop.f32.mrf.mxu2  ;;  %v456_v54 = vsel %vm316_vm0, %v453_v52, -inf }
 0x22a   : > { %v394_v55 = vadd.f32 %v393_v53, %v311_v19  ;;  %457 = vmax.xlane.f32.xlu2 %v456_v54 }
 0x22c   : > { %v397_v56 = vsel %vm316_vm0, %v394_v55, -inf }
 0x22d   : > { %398 = vmax.xlane.f32.xlu0 %v397_v56 }
 0x22e   : > { %v454_v57 = vpop.f32.mrf.mxu1 }
 0x231   : > { %v395_v58 = vpop.f32.mrf.mxu2 }
 0x242   : > { %412 = vrot.lane.b32.xlu2 %v411_v60, %s761_s11 }
 0x29d   : > { %v458_v61 = vpop.xlane.xlu2 %457 }
 0x29e   : > { %v459_v62 = vsub.f32 %v453_v52, %v458_v61 }
 0x2a0   : > { %v460_v0 = vmul.f32 1.442695, %v459_v62  ;;  %v399_v1 = vpop.xlane.xlu0 %398 }
 0x2a1   : > { %v400_v2 = vsub.f32 %v394_v55, %v399_v1 }
 0x2a2   : > { %738 = vpow2.f32 %v460_v0 }
 0x2a3   : > { %v401_v4 = vmul.f32 1.442695, %v400_v2 }
 0x2a5   : > { %740 = vpow2.f32 %v401_v4  ;;  %v413_v12 = vpop.permute.xlu2 %412 }
 0x2a6   : > { %742 = vpow2.f32 %v516_v5  ;;  %v418_v13 = vsel %vm351_vm2, %v413_v12, 0 }
 0x2a7   : > { %427 = vmatpush.bf16.msra.mxu3 %v418_v13 }
 0x2a8   : > { %v739_v6 = vpop.eup %738 }
 0x2a9   : > { %v462_v7 = vsel %vm316_vm0, %v739_v6, 0.0 }
 0x2aa   : > { %463 = vadd.xlane.f32.xlu1 %v462_v7 }
 0x2ab   : > { %v741_v8 = vpop.eup %740 }
 0x2ac   : > { %v403_v9 = vsel %vm316_vm0, %v741_v8, 0.0  ;;  %v743_v10 = vpop.eup %742 }
 0x2ad   : > { %404 = vadd.xlane.f32.xlu0 %v403_v9  ;;  %v518_v11 = vsel %vm316_vm0, %v743_v10, 0.0 }
 0x2b5   : > { %519 = vadd.xlane.f32.xlu0 %v518_v11 }
 0x2c3   : > { %468 = vrot.lane.b32.xlu1 %v411_v60, %s758_s30 }
 0x2c9   : > { %524 = vrot.lane.b32.xlu0 %v411_v60, %s759_s10 }
 0x31d   : > { %v464_v17 = vpop.xlane.xlu1 %463 }
 0x320   : > { %v405_v14 = vpop.xlane.xlu0 %404 }
 0x321   : > { %744 = vrcp.f32 %v405_v14 }
 0x322   : > { %746 = vrcp.f32 %v464_v17 }
 0x327   : > { %v745_v15 = vpop.eup %744 }
 0x328   : > { %v407_v16 = vmul.f32 %v745_v15, %v741_v8  ;;  %v520_v19 = vpop.xlane.xlu0 %519  ;;  %v747_v20 = vpop.eup %746 }
 0x329   : > { %748 = vrcp.f32 %v520_v19  ;;  %v466_v22 = vmul.f32 %v747_v20, %v739_v6 }
 0x32a   : > { %v408_v18 = vpack.c.bf16 %v407_v16, %v407_v16 }
 0x32b   : > { %v467_v26 = vpack.c.bf16 %v466_v22, %v466_v22 }
 0x32c   : > { %700 = vmatmul.msk.bf16.vlgmr.msra.gmra.mxu3 %vm316_vm0, %v408_v18 }
 0x32f   : > { %v749_v24 = vpop.eup %748 }
 0x330   : > { %v522_v25 = vmul.f32 %v749_v24, %v743_v10 }
 0x332   : > { %v523_v29 = vpack.c.bf16 %v522_v25, %v522_v25 }
 0x335   : > { %v469_v21 = vpop.permute.xlu1 %468 }
 0x336   : > { %v474_v23 = vsel %vm351_vm2, %v469_v21, 0 }
 0x337   : > { %483 = vmatpush.bf16.msrb.mxu3 %v474_v23 }
 0x33b   : > { %v525_v27 = vpop.permute.xlu0 %524 }
 0x33c   : > { %702 = vmatmul.msk.bf16.vlgmr.msrb.gmra.mxu3 %vm316_vm0, %v467_v26  ;;  %v530_v28 = vsel %vm351_vm2, %v525_v27, 0 }
 0x33d   : > { %539 = vmatpush.bf16.msrb.mxu2 %v530_v28 }
 0x340   : > { %704 = vmatmul.msk.bf16.vlgmr.msrb.gmra.mxu2 %vm316_vm0, %v523_v29 }
 0x3af   : > { %v429_v30 = vpop.f32.mrf.mxu3 }
 0x3b0   : > { %546 = vrot.lane.b32.xlu2 %v429_v30, %s762_s15 }
 0x3b7   : > { %v431_v31 = vpop.f32.mrf.mxu3 }
 0x3bf   : > { %v485_v32 = vpop.f32.mrf.mxu3 }
 0x3c0   : > { %550 = vrot.lane.b32.xlu2 %v485_v32, %s763_s16 }
 0x3c3   : > { %v541_v33 = vpop.f32.mrf.mxu2 }
 0x3c4   : > { %554 = vrot.lane.b32.xlu0 %v541_v33, %s764_s17 }
 0x3c7   : > { %v487_v34 = vpop.f32.mrf.mxu3 }
 0x3cb   : > { %v543_v35 = vpop.f32.mrf.mxu2 }
 0x40a   : > { %v547_v38 = vpop.permute.xlu2 %546 }
 0x40b   : > { %v557_v40 = vsel %vm316_vm0, %v844_v49, %v547_v38 }
 0x41a   : > { %v551_v39 = vpop.permute.xlu2 %550 }
 0x41b   : > { %v559_v41 = vsel %vm558_vm3, %v557_v40, %v551_v39 }
 0x436   : > { %v555_v42 = vpop.permute.xlu0 %554 }
 0x437   : > { %v561_v43 = vsel %vm560_vm4, %v559_v41, %v555_v42 }
 0x438   : > { %v562_v44 = vpack.c.bf16 %v561_v43, %v561_v43 }
 0x43a   : > { %713 = vmatmul.msk.bf16.vlgmr.msra.gmra.mxu1 %vm583_vm5, %v562_v44 }
 0x4b7   : > { %v596_v46 = vpop.f32.mrf.mxu1 }
 0x4b8   : > { %v597_v47 = vadd.f32 %v733_v45, %v596_v46 }
 0x4ba   : > { %600 = vst.msk [vmem:[%s294_s28] sm:$0xff] %vm583_vm5, %v597_v47 }
 0x4bf   : > { %v598_v48 = vpop.f32.mrf.mxu1 }
 0x4c0 PF: > { %s16_s21 = sadd.s32 1, %s756_s21  }
 0x4c1   : > { %p13_p4 = scmp.ge.s32.totalorder %s16_s21, 4  }
 0x4c3   :  { %15 = sbr.rel (!%p13_p4) target bundleno = 1 (0x1), region = 83 }

// kernel: decoder_forward.20
= control target key start
LH: loop header
LB: loop body
LE: loop exit
PB: predicated region body
PF: predicated region fallthrough
CT: control target
= control target key end

     0   :  { %vm40_vm0 = vcmask 261120   ;;  %s91_s26 = smov 96   ;;  %s149_s1 = inlined_call_operand.vmem [shape: bf16[32,64], index: 1, kind: input, shape index: {}]   ;;  %s150_s0 = inlined_call_operand.vmem [shape: f32[16,32], index: 0, kind: input, shape index: {}]   ;;  %s151_s2 = inlined_call_operand.vmem [shape: f32[1,64], index: 2, kind: input, shape index: {}]   ;;  %s152_s3 = inlined_call_operand.vmem [shape: f32[16,32], index: 3, kind: output, shape index: {0}]   ;;  %s153_s4 = inlined_call_operand.vmem [shape: f32[16,32], index: 4, kind: output, shape index: {1}]  }
   0x1   :  { %v88_v0 = vld [vmem:[%s149_s1 + $0x8] sm:$0xff]  ;;  %v87_v1 = vld [vmem:[%s149_s1] sm:$0xff] }
   0x2   :  { %50 = vmatpush.bf16.msra.mxu0 %v88_v0  ;;  %v17_v2 = vld [vmem:[%s150_s0] sm:$0xff]  ;;  %v18_v3 = vld [vmem:[%s150_s0 + $0x8] sm:$0xff] }
   0x3   :  { %v19_v4 = vpack.c.bf16 %v18_v3, %v17_v2  ;;  %v90_v5 = vld [vmem:[%s151_s2] ss:$0 sm:$0xff] }
   0x6   :  { %51 = vmatpush.bf16.msra.mxu0 %v87_v1 }
   0x9   :  { %86 = vmatmul.msk.bf16.vlgmr.msra.gmra.mxu0 %vm40_vm0, %v19_v4 }
  0x86   :  { %v53_v6 = vpop.f32.mrf.mxu0 }
  0x87   :  { %v54_v7 = vadd.f32 %v90_v5, %v53_v6 }
  0x89   :  { %58 = vst.msk [vmem:[%s152_s3] sm:$0xff] %vm40_vm0, %v54_v7  ;;  %62 = vrot.lane.b32.xlu0 %v54_v7, %s91_s26 }
  0x8e   :  { %v55_v8 = vpop.f32.mrf.mxu0 }
  0x8f   :  { %v56_v9 = vadd.f32 %v90_v5, %v55_v8 }
  0x91   :  { %59 = vst.msk [vmem:[%s152_s3 + $0x8] sm:$0xff] %vm40_vm0, %v56_v9  ;;  %64 = vrot.lane.b32.xlu0 %v56_v9, %s91_s26 }
  0xfb   :  { %v63_v10 = vpop.permute.xlu0 %62 }
  0xfc   :  { %68 = vst.msk [vmem:[%s153_s4] sm:$0xff] %vm40_vm0, %v63_v10 }
 0x103   :  { %v65_v11 = vpop.permute.xlu0 %64 }
 0x104   :  { %69 = vst.msk [vmem:[%s153_s4 + $0x8] sm:$0xff] %vm40_vm0, %v65_v11 }

// kernel: decoder_forward.24
= control target key start
LH: loop header
LB: loop body
LE: loop exit
PB: predicated region body
PF: predicated region fallthrough
CT: control target
= control target key end

     0   :  { %11 = vsyncpa [#allocation3], 0  ;;  %s147_s21 = smov [#allocation2]   ;;  %s220_s0 = inlined_call_operand.vmem [shape: f32[16,32], index: 0, kind: input, shape index: {}]   ;;  %s221_s1 = inlined_call_operand.vmem [shape: bf16[32,96], index: 1, kind: input, shape index: {}]   ;;  %s222_s2 = inlined_call_operand.hbm [shape: f32[1,96], index: 2, kind: input, shape index: {}]   ;;  %s223_s3 = inlined_call_operand.vmem [shape: f32[16,32], index: 3, kind: output, shape index: {0}]   ;;  %s224_s4 = inlined_call_operand.vmem [shape: f32[16,32], index: 4, kind: output, shape index: {1}]   ;;  %s225_s5 = inlined_call_operand.vmem [shape: f32[16,32], index: 5, kind: output, shape index: {2}]  }
   0x1   :  { %s21_s20 = sshll.u32 %s222_s2, 4  ;;  %s23_s22 = sshll.u32 %s147_s21, 4  ;;  %s22_s20 = int_to_ptr.hbm [resolvable:$true] %s21_s20  ;;  %s24_s22 = int_to_ptr.vmem [resolvable:$true] %s23_s22 }
   0x2   :  { %26 = dma.hbm_to_vmem [thread:$0]  %s22_s20, 16, %s24_s22, [#allocation3]  }
   0x3   :  { %145 = dma.done.wait [#allocation3], 16  }
   0x4   :  { %146 = vsyncadd [#allocation3], 4294967280  ;;  %v116_v0 = vld [vmem:[%s221_s1 + $0x8] sm:$0xff]  ;;  %v115_v1 = vld [vmem:[%s221_s1] sm:$0xff]  ;;  %vm55_vm0 = vcmask 261120   ;;  %s148_s1 = smov 64  }
   0x5   :  { %65 = vmatpush.bf16.msra.mxu0 %v116_v0  ;;  %v32_v2 = vld [vmem:[%s220_s0] sm:$0xff]  ;;  %v33_v3 = vld [vmem:[%s220_s0 + $0x8] sm:$0xff]  ;;  %s149_s7 = smov 96  }
   0x6   :  { %v34_v4 = vpack.c.bf16 %v33_v3, %v32_v2  ;;  %v120_v5 = vld [vmem:[#allocation2] ss:$0 sm:$0xff] }
   0x9   :  { %66 = vmatpush.bf16.msra.mxu0 %v115_v1 }
   0xc   :  { %114 = vmatmul.msk.bf16.vlgmr.msra.gmra.mxu0 %vm55_vm0, %v34_v4 }
  0x89   :  { %v68_v6 = vpop.f32.mrf.mxu0 }
  0x8a   :  { %v69_v7 = vadd.f32 %v120_v5, %v68_v6 }
  0x8c   :  { %73 = vst.msk [vmem:[%s223_s3] sm:$0xff] %vm55_vm0, %v69_v7  ;;  %85 = vrot.lane.b32.xlu1 %v69_v7, %s148_s1  ;;  %77 = vrot.lane.b32.xlu0 %v69_v7, %s149_s7 }
  0x91   :  { %v70_v8 = vpop.f32.mrf.mxu0 }
  0x92   :  { %v71_v9 = vadd.f32 %v120_v5, %v70_v8 }
  0x94   :  { %74 = vst.msk [vmem:[%s223_s3 + $0x8] sm:$0xff] %vm55_vm0, %v71_v9  ;;  %87 = vrot.lane.b32.xlu1 %v71_v9, %s148_s1  ;;  %79 = vrot.lane.b32.xlu0 %v71_v9, %s149_s7 }
  0xfe   :  { %v86_v10 = vpop.permute.xlu1 %85  ;;  %v78_v11 = vpop.permute.xlu0 %77 }
  0xff   :  { %91 = vst.msk [vmem:[%s225_s5] sm:$0xff] %vm55_vm0, %v86_v10 }
 0x100   :  { %83 = vst.msk [vmem:[%s224_s4] sm:$0xff] %vm55_vm0, %v78_v11 }
 0x106   :  { %v88_v12 = vpop.permute.xlu1 %87  ;;  %v80_v13 = vpop.permute.xlu0 %79 }
 0x107   :  { %92 = vst.msk [vmem:[%s225_s5 + $0x8] sm:$0xff] %vm55_vm0, %v88_v12 }
 0x108   :  { %84 = vst.msk [vmem:[%s224_s4 + $0x8] sm:$0xff] %vm55_vm0, %v80_v13 }
 0x109   :  { %105 = vsyncpa [#allocation3], 1 }

// kernel: decoder_forward.23
= control target key start
LH: loop header
LB: loop body
LE: loop exit
PB: predicated region body
PF: predicated region fallthrough
CT: control target
= control target key end

     0   :  { %vm62_vm0 = vcmask 261120   ;;  %vm119_vm1 = vcmask 523264   ;;  %s583_s5 = inlined_call_operand.vmem [shape: bf16[32,64], index: 5, kind: input, shape index: {}]   ;;  %s584_s0 = inlined_call_operand.vmem [shape: f32[16,32], index: 0, kind: input, shape index: {}]   ;;  %s585_s1 = inlined_call_operand.vmem [shape: bf16[32,64], index: 1, kind: input, shape index: {}]   ;;  %s586_s6 = inlined_call_operand.vmem [shape: f32[1,64], index: 6, kind: input, shape index: {}]   ;;  %s587_s2 = inlined_call_operand.vmem [shape: f32[1,64], index: 2, kind: input, shape index: {}]   ;;  %s588_s4 = inlined_call_operand.vmem [shape: f32[1,32], index: 4, kind: input, shape index: {}]   ;;  %s589_s7 = inlined_call_operand.vmem [shape: bf16[64,32], index: 7, kind: input, shape index: {}]   ;;  %s590_s3 = inlined_call_operand.vmem [shape: bf16[64,32], index: 3, kind: input, shape index: {}]   ;;  %s591_s8 = inlined_call_operand.vmem [shape: f32[1,32], index: 8, kind: input, shape index: {}]   ;;  %s592_s9 = inlined_call_operand.vmem [shape: f32[1,32], index: 9, kind: input, shape index: {}]   ;;  %s593_s10 = inlined_call_operand.vmem [shape: f32[1,32], index: 10, kind: input, shape index: {}]   ;;  %s594_s11 = inlined_call_operand.vmem [shape: f32[16,32], index: 11, kind: output, shape index: {}]  }
   0x1   :  { %v402_v0 = vld [vmem:[%s583_s5 + $0x8] sm:$0xff]  ;;  %v401_v1 = vld [vmem:[%s583_s5] sm:$0xff]  ;;  %v406_v7 = vld [vmem:[%s589_s7 + $0x18] sm:$0xff] }
   0x2   :  { %v396_v2 = vld [vmem:[%s585_s1 + $0x8] sm:$0xff]  ;;  %163 = vmatpush.bf16.msra.mxu2 %v402_v0  ;;  %v497_v3 = vld [vmem:[%s584_s0] sm:$0xff]  ;;  %217 = vmatpush.bf16.msra.mxu3 %v406_v7  ;;  %v405_v8 = vld [vmem:[%s589_s7 + $0x10] sm:$0xff] }
   0x3   :  { %v502_v4 = vld [vmem:[%s584_s0 + $0x8] sm:$0xff]  ;;  %72 = vmatpush.bf16.msra.mxu0 %v396_v2  ;;  %v395_v5 = vld [vmem:[%s585_s1] sm:$0xff]  ;;  %v400_v9 = vld [vmem:[%s590_s3 + $0x18] sm:$0xff] }
   0x4   :  { %v41_v6 = vpack.c.bf16 %v502_v4, %v497_v3  ;;  %127 = vmatpush.bf16.msra.mxu1 %v400_v9  ;;  %v404_v10 = vld [vmem:[%s589_s7 + $0x8] sm:$0xff]  ;;  %v399_v11 = vld [vmem:[%s590_s3 + $0x10] sm:$0xff]  ;;  %v403_v12 = vld [vmem:[%s589_s7] sm:$0xff] }
   0x5   :  { %v398_v13 = vld [vmem:[%s590_s3 + $0x8] sm:$0xff]  ;;  %v397_v14 = vld [vmem:[%s590_s3] sm:$0xff] }
   0x6   :  { %164 = vmatpush.bf16.msra.mxu2 %v401_v1  ;;  %218 = vmatpush.bf16.msra.mxu3 %v405_v8  ;;  %v408_v16 = vld [vmem:[%s587_s2] ss:$0 sm:$0xff] }
   0x7   :  { %73 = vmatpush.bf16.msra.mxu0 %v395_v5  ;;  %v407_v19 = vld [vmem:[%s586_s6] ss:$0 sm:$0xff] }
   0x8   :  { %128 = vmatpush.bf16.msra.mxu1 %v399_v11  ;;  %v410_v31 = vld [vmem:[%s591_s8] ss:$0 sm:$0xff] }
   0x9   :  { %377 = vmatmul.msk.bf16.vlgmr.msra.gmra.mxu2 %vm62_vm0, %v41_v6  ;;  %v409_v40 = vld [vmem:[%s588_s4] ss:$0 sm:$0xff] }
   0xa   :  { %351 = vmatmul.msk.bf16.vlgmr.msra.gmra.mxu0 %vm62_vm0, %v41_v6  ;;  %219 = vmatpush.bf16.msra.mxu3 %v404_v10 }
   0xc   :  { %129 = vmatpush.bf16.msra.mxu1 %v398_v13 }
   0xe   :  { %220 = vmatpush.bf16.msra.mxu3 %v403_v12 }
  0x10   :  { %130 = vmatpush.bf16.msra.mxu1 %v397_v14 }
  0x87   :  { %v75_v15 = vpop.f32.mrf.mxu0 }
  0x88   :  { %v76_v18 = vadd.f32 %v408_v16, %v75_v15 }
  0x8a   :  { %v80_v21 = vmax.f32 %v76_v18, 0.0 }
  0x8c   :  { %v166_v17 = vpop.f32.mrf.mxu2 }
  0x8d   :  { %v167_v24 = vadd.f32 %v407_v19, %v166_v17 }
  0x8f   :  { %v77_v20 = vpop.f32.mrf.mxu0  ;;  %v171_v28 = vmax.f32 %v167_v24, 0.0 }
  0x90   :  { %v78_v22 = vadd.f32 %v408_v16, %v77_v20 }
  0x92   :  { %v81_v23 = vmax.f32 %v78_v22, 0.0 }
  0x94   :  { %v168_v25 = vpop.f32.mrf.mxu2  ;;  %v82_v26 = vpack.c.bf16 %v81_v23, %v80_v21 }
  0x95   :  { %v169_v27 = vadd.f32 %v407_v19, %v168_v25 }
  0x96   :  { %368 = vmatmul.msk.bf16.vlgmr.msra.gmra.mxu1 %vm119_vm1, %v82_v26 }
  0x97   :  { %v172_v29 = vmax.f32 %v169_v27, 0.0 }
  0x99   :  { %v173_v30 = vpack.c.bf16 %v172_v29, %v171_v28 }
  0x9b   :  { %394 = vmatmul.msk.bf16.vlgmr.msra.gmra.mxu3 %vm119_vm1, %v173_v30 }
 0x113   :  { %v132_v38 = vpop.f32.mrf.mxu1 }
 0x114   :  { %v133_v43 = vadd.f32 %v409_v40, %v132_v38 }
 0x11b   :  { %v134_v50 = vpop.f32.mrf.mxu1 }
 0x11c   :  { %v135_v54 = vadd.f32 %v409_v40, %v134_v50 }
 0x11e   :  { %v222_v32 = vpop.f32.mrf.mxu3 }
 0x11f   :  { %v223_v33 = vadd.f32 %v410_v31, %v222_v32 }
 0x121   :  { %v227_v34 = vmul.f32 0.5, %v223_v33 }
 0x123   :  { %413 = vtanh.f32 %v227_v34 }
 0x126   :  { %v224_v35 = vpop.f32.mrf.mxu3 }
 0x127   :  { %v225_v36 = vadd.f32 %v410_v31, %v224_v35 }
 0x129   :  { %v414_v37 = vpop.eup %413  ;;  %v228_v39 = vmul.f32 0.5, %v225_v36 }
 0x12a   :  { %v231_v41 = vadd.f32 1.0, %v414_v37 }
 0x12b   :  { %415 = vtanh.f32 %v228_v39  ;;  %v411_v39 = vld [vmem:[%s592_s9] ss:$0 sm:$0xff] }
 0x12c   :  { %v233_v42 = vmul.f32 0.5, %v231_v41 }
 0x12e   :  { %v237_v44 = vsub.f32 1.0, %v233_v42  ;;  %v235_v45 = vmul.f32 %v233_v42, %v497_v3 }
 0x130   :  { %v239_v46 = vmul.f32 %v237_v44, %v133_v43 }
 0x131   :  { %v416_v47 = vpop.eup %415 }
 0x132   :  { %v232_v48 = vadd.f32 1.0, %v416_v47  ;;  %v548_v49 = vadd.f32 %v239_v46, %v235_v45  ;;  %v412_v47 = vld [vmem:[%s593_s10] ss:$0 sm:$0xff] }
 0x134   :  { %v234_v51 = vmul.f32 0.5, %v232_v48  ;;  %v245_v52 = vsel %vm62_vm0, %v548_v49, 0.0  ;;  %v251_v53 = vmul.f32 %v548_v49, %v548_v49 }
 0x135   :  { %246 = vadd.xlane.f32.xlu0 %v245_v52 }
 0x136   :  { %v238_v55 = vsub.f32 1.0, %v234_v51  ;;  %v253_v56 = vsel %vm62_vm0, %v251_v53, 0.0  ;;  %v236_v57 = vmul.f32 %v234_v51, %v502_v4 }
 0x137   :  { %254 = vadd.xlane.f32.xlu1 %v253_v56 }
 0x138   :  { %v240_v58 = vmul.f32 %v238_v55, %v135_v54 }
 0x13a   :  { %v556_v59 = vadd.f32 %v240_v58, %v236_v57 }
 0x13c   :  { %v248_v60 = vsel %vm62_vm0, %v556_v59, 0.0  ;;  %v252_v61 = vmul.f32 %v556_v59, %v556_v59 }
 0x13d   :  { %249 = vadd.xlane.f32.xlu0 %v248_v60 }
 0x13e   :  { %v256_v62 = vsel %vm62_vm0, %v252_v61, 0.0 }
 0x13f   :  { %257 = vadd.xlane.f32.xlu1 %v256_v62 }
 0x1a8   :  { %v247_v63 = vpop.xlane.xlu0 %246 }
 0x1a9   :  { %v259_v0 = vmul.f32 0.03125, %v247_v63 }
 0x1aa   :  { %v255_v2 = vpop.xlane.xlu1 %254 }
 0x1ab   :  { %v261_v1 = vmul.f32 %v259_v0, %v247_v63  ;;  %v293_v40 = vsub.f32 %v548_v49, %v259_v0 }
 0x1ad   :  { %v263_v3 = vsub.f32 %v255_v2, %v261_v1  ;;  %v298_v46 = vmul.f32 %v411_v39, %v293_v40 }
 0x1af   :  { %v265_v5 = vmul.f32 0.032258064, %v263_v3 }
 0x1b0   :  { %v250_v4 = vpop.xlane.xlu0 %249 }
 0x1b1   :  { %v267_v6 = vmax.f32 %v265_v5, 0.0  ;;  %v563_v7 = vmul.f32 0.03125, %v250_v4 }
 0x1b2   :  { %v258_v9 = vpop.xlane.xlu1 %257 }
 0x1b3   :  { %417 = vrsqrt.f32 %v267_v6  ;;  %v262_v8 = vmul.f32 %v563_v7, %v250_v4  ;;  %vm276_vm2 = vcmp.eq.f32.partialorder %v267_v6, inf  ;;  %v279_v22 = vand.u32 2147483648, %v267_v6 }
 0x1b4   :  { %vm278_vm3 = vcmp.eq.f32.partialorder %v267_v6, 0.0  ;;  %v294_v55 = vsub.f32 %v556_v59, %v563_v7 }
 0x1b5   :  { %v264_v10 = vsub.f32 %v258_v9, %v262_v8 }
 0x1b6   :  { %v299_v61 = vmul.f32 %v411_v39, %v294_v55 }
 0x1b7   :  { %v266_v11 = vmul.f32 0.032258064, %v264_v10 }
 0x1b9   :  { %v418_v12 = vpop.eup %417  ;;  %v268_v14 = vmax.f32 %v266_v11, 0.0 }
 0x1ba   :  { %v270_v13 = vmul.f32 %v418_v12, %v267_v6 }
 0x1bb   :  { %419 = vrsqrt.f32 %v268_v14  ;;  %vm288_vm4 = vcmp.eq.f32.partialorder %v268_v14, inf  ;;  %v291_v31 = vand.u32 2147483648, %v268_v14  ;;  %vm290_vm5 = vcmp.eq.f32.partialorder %v268_v14, 0.0 }
 0x1bc   :  { %v271_v15 = vmul.f32 %v418_v12, %v270_v13 }
 0x1be   :  { %v272_v16 = vmul.f32 0.5, %v271_v15 }
 0x1c0   :  { %v273_v17 = vsub.f32 1.5, %v272_v16 }
 0x1c1   :  { %v420_v18 = vpop.eup %419 }
 0x1c2   :  { %v274_v19 = vmul.f32 %v418_v12, %v273_v17  ;;  %v282_v20 = vmul.f32 %v420_v18, %v268_v14 }
 0x1c4   :  { %v275_v21 = vmul.f32 %v274_v19, %v267_v6  ;;  %v283_v23 = vmul.f32 %v420_v18, %v282_v20 }
 0x1c6   :  { %v277_v24 = vsel %vm276_vm2, %v267_v6, %v275_v21  ;;  %v284_v26 = vmul.f32 0.5, %v283_v23 }
 0x1c7   :  { %v280_v25 = vsel %vm278_vm3, %v279_v22, %v277_v24 }
 0x1c8   :  { %v300_v27 = vadd.f32 1e-06, %v280_v25  ;;  %v285_v28 = vsub.f32 1.5, %v284_v26 }
 0x1ca   :  { %421 = vrcp.f32 %v300_v27  ;;  %v286_v29 = vmul.f32 %v420_v18, %v285_v28  ;;  %v313_v38 = vand.u32 2147483648, %v300_v27  ;;  %v311_v42 = vand.u32 2147483647, %v300_v27 }
 0x1cb   :  { %vm307_vm7 = vweird.f32 %v300_v27 }
 0x1cc   :  { %v287_v30 = vmul.f32 %v286_v29, %v268_v14  ;;  %v314_v44 = vor.u32 1.1754944e-38, %v313_v38  ;;  %vm312_vm9 = vcmp.eq.f32.partialorder %v311_v42, 8.507059e+37 }
 0x1ce   :  { %v289_v32 = vsel %vm288_vm4, %v268_v14, %v287_v30 }
 0x1cf   :  { %v292_v34 = vsel %vm290_vm5, %v291_v31, %v289_v32 }
 0x1d0   :  { %v422_v33 = vpop.eup %421  ;;  %v301_v36 = vadd.f32 1e-06, %v292_v34 }
 0x1d1   :  { %v303_v35 = vmul.f32 %v422_v33, %v300_v27  ;;  %vm308_vm6 = vweird.f32 %v422_v33 }
 0x1d2   :  { %423 = vrcp.f32 %v301_v36  ;;  %vm309_vm8 = vmor %vm307_vm7, %vm308_vm6  ;;  %v328_v54 = vand.u32 2147483648, %v301_v36  ;;  %v326_v57 = vand.u32 2147483647, %v301_v36  ;;  %vm322_vm11 = vweird.f32 %v301_v36 }
 0x1d3   :  { %v304_v37 = vsub.f32 1.0, %v303_v35 }
 0x1d4   :  { %v329_v60 = vor.u32 1.1754944e-38, %v328_v54  ;;  %vm327_vm13 = vcmp.eq.f32.partialorder %v326_v57, 8.507059e+37 }
 0x1d5   :  { %v305_v41 = vmul.f32 %v422_v33, %v304_v37 }
 0x1d7   :  { %v306_v43 = vadd.f32 %v422_v33, %v305_v41 }
 0x1d8   :  { %v424_v45 = vpop.eup %423 }
 0x1d9   :  { %v310_v48 = vsel %vm309_vm8, %v422_v33, %v306_v43  ;;  %v318_v51 = vmul.f32 %v424_v45, %v301_v36  ;;  %vm323_vm10 = vweird.f32 %v424_v45 }
 0x1da   :  { %v315_v50 = vsel %vm312_vm9, %v314_v44, %v310_v48  ;;  %vm324_vm12 = vmor %vm322_vm11, %vm323_vm10 }
 0x1db   :  { %v316_v52 = vmul.f32 %v315_v50, %v298_v46  ;;  %v319_v53 = vsub.f32 1.0, %v318_v51 }
 0x1dd   :  { %v335_v49 = vadd.f32 %v412_v47, %v316_v52  ;;  %v320_v56 = vmul.f32 %v424_v45, %v319_v53 }
 0x1df   :  { %337 = vst.msk [vmem:[%s594_s11] sm:$0xff] %vm62_vm0, %v335_v49  ;;  %v321_v58 = vadd.f32 %v424_v45, %v320_v56 }
 0x1e1   :  { %v325_v62 = vsel %vm324_vm12, %v424_v45, %v321_v58 }
 0x1e2   :  { %v330_v63 = vsel %vm327_vm13, %v329_v60, %v325_v62 }
 0x1e3   :  { %v331_v0 = vmul.f32 %v330_v63, %v299_v61 }
 0x1e5   :  { %v336_v1 = vadd.f32 %v412_v47, %v331_v0 }
 0x1e7   :  { %338 = vst.msk [vmem:[%s594_s11 + $0x8] sm:$0xff] %vm62_vm0, %v336_v1 }

// kernel: decoder_forward.21
= control target key start
LH: loop header
LB: loop body
LE: loop exit
PB: predicated region body
PF: predicated region fallthrough
CT: control target
= control target key end

     0   :  { %s791_s21 = smov 0   ;;  %s869_s0 = inlined_call_operand.vmem [shape: f32[2,8,32], index: 0, kind: input, shape index: {}]   ;;  %s870_s1 = inlined_call_operand.vmem [shape: f32[2,8,32], index: 1, kind: input, shape index: {}]   ;;  %s871_s2 = inlined_call_operand.vmem [shape: f32[2,8,32], index: 2, kind: input, shape index: {}]   ;;  %s872_s3 = inlined_call_operand.vmem [shape: f32[2,1,8], index: 3, kind: input, shape index: {}]   ;;  %s873_s4 = inlined_call_operand.vmem [shape: bf16[32,32], index: 4, kind: input, shape index: {}]   ;;  %s874_s5 = inlined_call_operand.vmem [shape: f32[1,32], index: 5, kind: input, shape index: {}]   ;;  %s875_s6 = inlined_call_operand.vmem [shape: f32[2,8,32], index: 6, kind: output, shape index: {}]  }
   0x1 LB: > { %s680_s22 = sadd.s32 4294967295, %s748_s21   ;;  %p684_p0 = scmp.ge.s32.totalorder %s748_s21, 1  ;;  %s748_s21 = sphi %s791_s21, %s16_s21  }
   0x2   : > { %p237_p1 = scmp.lt.s32.totalorder %s748_s21, 3 }
   0x4   : > { %p238_p2 = pnand %p684_p0, %p237_p1 }
   0x5   : > { %p276_p3 = scmp.lt.s32.totalorder (!%p238_p2), %s680_s22, 1  ;;  %s750_s30 = smov (!%p238_p2), 112  }
   0x6   : > { %241 = sbr.rel (%p238_p2) target bundleno = 1216 (0x4c0), region = 44  ;;  %s751_s10 = smov (!%p238_p2), 104  }
   0x7   : > { %s752_s11 = smov (!%p238_p2), 120   ;;  %s753_s15 = smov (!%p238_p2), 8  }
   0x8   : > { %s754_s16 = smov (!%p238_p2), 16   ;;  %s755_s17 = smov (!%p238_p2), 24  }
   0xb   : > { %s877_s22 = smov (!%p276_p3, %s680_s22), 1  ;;  %vm309_vm0 = vcmask 64512   ;;  %vm344_vm1 = vcmask 1043456   ;;  %vm551_vm2 = vcmask 130048   ;;  %vm553_vm3 = vcmask 195584  }
   0xc   : > { %s799_s23 = sshll.u32 %s877_s22, 3  ;;  %s290_s9 = scalar_lea.vmem %s872_s3, %s877_s22  ;;  %vm576_vm4 = vcmask 261120  }
   0xd   : > { %s283_s26 = scalar_lea.vmem %s870_s1, %s799_s23  ;;  %s279_s29 = scalar_lea.vmem %s869_s0, %s799_s23  ;;  %v299_v8 = vld [vmem:[%s290_s9] sm:$0x1] }
   0xe   : > { %v297_v0 = vld [vmem:[%s283_s26] sm:$0xff]  ;;  %v689_v10 = vadd.f32 -1.0, %v299_v8  ;;  %s287_s14 = scalar_lea.vmem %s871_s2, %s799_s23  ;;  %s294_s28 = scalar_lea.vmem %s875_s6, %s799_s23 }
   0xf   : > { %v296_v1 = vld [vmem:[%s279_s29] sm:$0xff]  ;;  %v304_v2 = vpack.c.bf16 %v297_v0, %v297_v0 }
  0x10   : > { %v302_v4 = vmul.f32 0.17677669, %v296_v1  ;;  %v301_v12 = vmul.f32 1e+10, %v689_v10  ;;  %v298_v28 = vld [vmem:[%s287_s14] sm:$0xff] }
  0x11   : > { %v314_v3 = vsel %vm309_vm0, %v304_v2, 0  ;;  %v367_v6 = vunpack.c.l.b16 %v304_v2  ;;  %v305_v29 = vpack.c.bf16 %v298_v28, %v298_v28 }
  0x12   : > { %323 = vmatpush.bf16.xpose.msra.mxu0 %v314_v3  ;;  %v303_v5 = vpack.c.bf16 %v302_v4, %v302_v4  ;;  %v307_v13 = vperm.slane %v301_v12, 0 }
  0x13   : > { %v368_v7 = vpack.c.b16 %v367_v6, %v367_v6  ;;  %v346_v30 = vsel %vm344_vm1, %v305_v29, 0  ;;  %v403_v53 = vunpack.c.l.b16 %v305_v29 }
  0x14   : > { %v362_v9 = vunpack.c.l.b16 %v303_v5  ;;  %355 = vmatpush.bf16.msra.mxu1 %v346_v30  ;;  %v710_v30 = vld [vmem:[%s873_s4 + $0x8] sm:$0xff] }
  0x15   : > { %428 = vrot.lane.b32.xlu2 %v368_v7, %s750_s30  ;;  %v404_v54 = vpack.c.b16 %v403_v53, %v403_v53 }
  0x16   : > { %v363_v11 = vpack.c.b16 %v362_v9, %v362_v9 }
  0x19   : > { %690 = vmatmul.msk.bf16.vlgmr.msra.gmra.mxu0 %vm309_vm0, %v303_v5 }
  0x1d   : > { %484 = vrot.lane.b32.xlu2 %v368_v7, %s751_s10 }
  0x25   : > { %426 = vrot.lane.b32.xlu2 %v363_v11, %s750_s30 }
  0x2d   : > { %482 = vrot.lane.b32.xlu2 %v363_v11, %s751_s10 }
  0x6f   : > { %v429_v18 = vpop.permute.xlu2 %428 }
  0x70   : > { %v434_v31 = vsel %vm309_vm0, %v429_v18, 0 }
  0x71   : > { %443 = vmatpush.bf16.xpose.msrb.mxu1 %v434_v31  ;;  %v709_v31 = vld [vmem:[%s873_s4] sm:$0xff] }
  0x77   : > { %v485_v19 = vpop.permute.xlu2 %484 }
  0x78   : > { %v490_v24 = vsel %vm309_vm0, %v485_v19, 0 }
  0x79   : > { %499 = vmatpush.bf16.xpose.msrb.mxu0 %v490_v24 }
  0x7f   : > { %v427_v23 = vpop.permute.xlu2 %426 }
  0x87   : > { %v483_v27 = vpop.permute.xlu2 %482 }
  0x88   : > { %696 = vmatmul.msk.bf16.vlgmr.msrb.gmra.mxu0 %vm309_vm0, %v483_v27 }
  0x96   : > { %v325_v14 = vpop.f32.mrf.mxu0 }
  0x97   : > { %v326_v15 = vadd.f32 %v325_v14, %v307_v13 }
  0x99   : > { %v329_v16 = vsel %vm309_vm0, %v326_v15, -inf }
  0x9a   : > { %330 = vmax.xlane.f32.xlu0 %v329_v16 }
  0x9e   : > { %v327_v17 = vpop.f32.mrf.mxu0 }
  0xae   : > { %369 = vrot.lane.b32.xlu0 %v368_v7, %s752_s11 }
 0x105   : > { %v501_v38 = vpop.f32.mrf.mxu0 }
 0x106   : > { %v502_v39 = vadd.f32 %v501_v38, %v307_v13 }
 0x108   : > { %v505_v40 = vsel %vm309_vm0, %v502_v39, -inf }
 0x10d   : > { %v331_v20 = vpop.xlane.xlu0 %330  ;;  %v503_v41 = vpop.f32.mrf.mxu0 }
 0x10e   : > { %v332_v21 = vsub.f32 %v326_v15, %v331_v20 }
 0x110   : > { %v333_v22 = vmul.f32 1.442695, %v332_v21 }
 0x112   : > { %726 = vpow2.f32 %v333_v22 }
 0x118   : > { %v727_v25 = vpop.eup %726 }
 0x119   : > { %v335_v26 = vsel %vm309_vm0, %v727_v25, 0.0 }
 0x11a   : > { %336 = vadd.xlane.f32.xlu1 %v335_v26 }
 0x120   : > { %v370_v32 = vpop.permute.xlu0 %369 }
 0x121   : > { %v375_v33 = vsel %vm309_vm0, %v370_v32, 0 }
 0x122   : > { %384 = vmatpush.bf16.xpose.msra.mxu2 %v375_v33 }
 0x133   : > { %364 = vrot.lane.b32.xlu1 %v363_v11, %s752_s11 }
 0x15d   : > { %506 = vmax.xlane.f32.xlu1 %v505_v40 }
 0x18d   : > { %v337_v34 = vpop.xlane.xlu1 %336 }
 0x18e   : > { %728 = vrcp.f32 %v337_v34 }
 0x194   : > { %v729_v35 = vpop.eup %728 }
 0x195   : > { %v339_v36 = vmul.f32 %v729_v35, %v727_v25 }
 0x197   : > { %v340_v37 = vpack.c.bf16 %v339_v36, %v339_v36 }
 0x199   : > { %691 = vmatmul.msk.bf16.vlgmr.msra.gmra.mxu1 %vm309_vm0, %v340_v37 }
 0x19a   : > { %586 = vmatpush.bf16.msra.mxu1 %v710_v30 }
 0x19e   : > { %587 = vmatpush.bf16.msra.mxu1 %v709_v31 }
 0x1a5   : > { %v365_v42 = vpop.permute.xlu1 %364 }
 0x1a6   : > { %692 = vmatmul.msk.bf16.vlgmr.msra.gmra.mxu2 %vm309_vm0, %v365_v42 }
 0x1a9   : > { %694 = vmatmul.msk.bf16.vlgmr.msrb.gmra.mxu1 %vm309_vm0, %v427_v23 }
 0x1d0   : > { %v507_v57 = vpop.xlane.xlu1 %506 }
 0x1d1   : > { %v508_v61 = vsub.f32 %v502_v39, %v507_v57  ;;  %v725_v39 = vld [vmem:[%s874_s5] ss:$0 sm:$0xff] }
 0x1d3   : > { %v509_v63 = vmul.f32 1.442695, %v508_v61 }
 0x216   : > { %v835_v43 = vpop.f32.mrf.mxu1 }
 0x21e   : > { %v359_v44 = vpop.f32.mrf.mxu1 }
 0x226   : > { %v445_v45 = vpop.f32.mrf.mxu1 }
 0x227   : > { %v446_v46 = vadd.f32 %v445_v45, %v307_v13 }
 0x229   : > { %v386_v47 = vpop.f32.mrf.mxu2  ;;  %v449_v48 = vsel %vm309_vm0, %v446_v46, -inf }
 0x22a   : > { %v387_v49 = vadd.f32 %v386_v47, %v307_v13  ;;  %450 = vmax.xlane.f32.xlu2 %v449_v48 }
 0x22c   : > { %v390_v50 = vsel %vm309_vm0, %v387_v49, -inf }
 0x22d   : > { %391 = vmax.xlane.f32.xlu0 %v390_v50 }
 0x22e   : > { %v447_v51 = vpop.f32.mrf.mxu1 }
 0x231   : > { %v388_v52 = vpop.f32.mrf.mxu2 }
 0x242   : > { %405 = vrot.lane.b32.xlu2 %v404_v54, %s752_s11 }
 0x29d   : > { %v451_v55 = vpop.xlane.xlu2 %450 }
 0x29e   : > { %v452_v56 = vsub.f32 %v446_v46, %v451_v55 }
 0x2a0   : > { %v453_v58 = vmul.f32 1.442695, %v452_v56  ;;  %v392_v59 = vpop.xlane.xlu0 %391 }
 0x2a1   : > { %v393_v60 = vsub.f32 %v387_v49, %v392_v59 }
 0x2a2   : > { %730 = vpow2.f32 %v453_v58 }
 0x2a3   : > { %v394_v62 = vmul.f32 1.442695, %v393_v60 }
 0x2a5   : > { %732 = vpow2.f32 %v394_v62  ;;  %v406_v6 = vpop.permute.xlu2 %405 }
 0x2a6   : > { %734 = vpow2.f32 %v509_v63  ;;  %v411_v7 = vsel %vm344_vm1, %v406_v6, 0 }
 0x2a7   : > { %420 = vmatpush.bf16.msra.mxu3 %v411_v7 }
 0x2a8   : > { %v731_v0 = vpop.eup %730 }
 0x2a9   : > { %v455_v1 = vsel %vm309_vm0, %v731_v0, 0.0 }
 0x2aa   : > { %456 = vadd.xlane.f32.xlu1 %v455_v1 }
 0x2ab   : > { %v733_v2 = vpop.eup %732 }
 0x2ac   : > { %v396_v3 = vsel %vm309_vm0, %v733_v2, 0.0  ;;  %v735_v4 = vpop.eup %734 }
 0x2ad   : > { %397 = vadd.xlane.f32.xlu0 %v396_v3  ;;  %v511_v5 = vsel %vm309_vm0, %v735_v4, 0.0 }
 0x2b5   : > { %512 = vadd.xlane.f32.xlu0 %v511_v5 }
 0x2c3   : > { %461 = vrot.lane.b32.xlu1 %v404_v54, %s750_s30 }
 0x2c9   : > { %517 = vrot.lane.b32.xlu0 %v404_v54, %s751_s10 }
 0x31d   : > { %v457_v11 = vpop.xlane.xlu1 %456 }
 0x320   : > { %v398_v8 = vpop.xlane.xlu0 %397 }
 0x321   : > { %736 = vrcp.f32 %v398_v8 }
 0x322   : > { %738 = vrcp.f32 %v457_v11 }
 0x327   : > { %v737_v9 = vpop.eup %736 }
 0x328   : > { %v400_v10 = vmul.f32 %v737_v9, %v733_v2  ;;  %v513_v13 = vpop.xlane.xlu0 %512  ;;  %v739_v14 = vpop.eup %738 }
 0x329   : > { %740 = vrcp.f32 %v513_v13  ;;  %v459_v16 = vmul.f32 %v739_v14, %v731_v0 }
 0x32a   : > { %v401_v12 = vpack.c.bf16 %v400_v10, %v400_v10 }
 0x32b   : > { %v460_v20 = vpack.c.bf16 %v459_v16, %v459_v16 }
 0x32c   : > { %693 = vmatmul.msk.bf16.vlgmr.msra.gmra.mxu3 %vm309_vm0, %v401_v12 }
 0x32f   : > { %v741_v18 = vpop.eup %740 }
 0x330   : > { %v515_v19 = vmul.f32 %v741_v18, %v735_v4 }
 0x332   : > { %v516_v23 = vpack.c.bf16 %v515_v19, %v515_v19 }
 0x335   : > { %v462_v15 = vpop.permute.xlu1 %461 }
 0x336   : > { %v467_v17 = vsel %vm344_vm1, %v462_v15, 0 }
 0x337   : > { %476 = vmatpush.bf16.msrb.mxu3 %v467_v17 }
 0x33b   : > { %v518_v21 = vpop.permute.xlu0 %517 }
 0x33c   : > { %695 = vmatmul.msk.bf16.vlgmr.msrb.gmra.mxu3 %vm309_vm0, %v460_v20  ;;  %v523_v22 = vsel %vm344_vm1, %v518_v21, 0 }
 0x33d   : > { %532 = vmatpush.bf16.msrb.mxu2 %v523_v22 }
 0x340   : > { %697 = vmatmul.msk.bf16.vlgmr.msrb.gmra.mxu2 %vm309_vm0, %v516_v23 }
 0x3af   : > { %v422_v24 = vpop.f32.mrf.mxu3 }
 0x3b0   : > { %539 = vrot.lane.b32.xlu2 %v422_v24, %s753_s15 }
 0x3b7   : > { %v424_v25 = vpop.f32.mrf.mxu3 }
 0x3bf   : > { %v478_v26 = vpop.f32.mrf.mxu3 }
 0x3c0   : > { %543 = vrot.lane.b32.xlu2 %v478_v26, %s754_s16 }
 0x3c3   : > { %v534_v27 = vpop.f32.mrf.mxu2 }
 0x3c4   : > { %547 = vrot.lane.b32.xlu0 %v534_v27, %s755_s17 }
 0x3c7   : > { %v480_v28 = vpop.f32.mrf.mxu3 }
 0x3cb   : > { %v536_v29 = vpop.f32.mrf.mxu2 }
 0x40a   : > { %v540_v32 = vpop.permute.xlu2 %539 }
 0x40b   : > { %v550_v34 = vsel %vm309_vm0, %v835_v43, %v540_v32 }
 0x41a   : > { %v544_v33 = vpop.permute.xlu2 %543 }
 0x41b   : > { %v552_v35 = vsel %vm551_vm2, %v550_v34, %v544_v33 }
 0x436   : > { %v548_v36 = vpop.permute.xlu0 %547 }
 0x437   : > { %v554_v37 = vsel %vm553_vm3, %v552_v35, %v548_v36 }
 0x438   : > { %v555_v38 = vpack.c.bf16 %v554_v37, %v554_v37 }
 0x43a   : > { %706 = vmatmul.msk.bf16.vlgmr.msra.gmra.mxu1 %vm576_vm4, %v555_v38 }
 0x4b7   : > { %v589_v40 = vpop.f32.mrf.mxu1 }
 0x4b8   : > { %v590_v41 = vadd.f32 %v725_v39, %v589_v40 }
 0x4ba   : > { %593 = vst.msk [vmem:[%s294_s28] sm:$0xff] %vm576_vm4, %v590_v41 }
 0x4bf   : > { %v591_v42 = vpop.f32.mrf.mxu1 }
 0x4c0 PF: > { %s16_s21 = sadd.s32 1, %s748_s21  }
 0x4c1   : > { %p13_p4 = scmp.ge.s32.totalorder %s16_s21, 4  }
 0x4c3   :  { %15 = sbr.rel (!%p13_p4) target bundleno = 1 (0x1), region = 83 }

// kernel: decoder_forward.31
= control target key start
LH: loop header
LB: loop body
LE: loop exit
PB: predicated region body
PF: predicated region fallthrough
CT: control target
= control target key end

     0   :  { %s627_s0 = inlined_call_operand.vmem [shape: f32[16,32], index: 0, kind: input, shape index: {}]   ;;  %s628_s1 = inlined_call_operand.vmem [shape: bf16[32,64], index: 1, kind: input, shape index: {}]   ;;  %s629_s2 = inlined_call_operand.vmem [shape: f32[1,64], index: 2, kind: input, shape index: {}]   ;;  %s630_s3 = inlined_call_operand.vmem [shape: bf16[64,32], index: 3, kind: input, shape index: {}]   ;;  %s631_s4 = inlined_call_operand.vmem [shape: f32[1,32], index: 4, kind: input, shape index: {}]   ;;  %s632_s5 = inlined_call_operand.vmem [shape: bf16[32,64], index: 5, kind: input, shape index: {}]   ;;  %s633_s6 = inlined_call_operand.vmem [shape: f32[1,64], index: 6, kind: input, shape index: {}]   ;;  %s634_s7 = inlined_call_operand.vmem [shape: bf16[64,32], index: 7, kind: input, shape index: {}]   ;;  %s635_s8 = inlined_call_operand.vmem [shape: f32[1,32], index: 8, kind: input, shape index: {}]   ;;  %s636_s9 = inlined_call_operand.vmem [shape: f32[1,32], index: 9, kind: input, shape index: {}]   ;;  %s637_s10 = inlined_call_operand.vmem [shape: f32[1,32], index: 10, kind: input, shape index: {}]   ;;  %s638_s11 = inlined_call_operand.hbm [shape: f32[16,32], index: 11, kind: output, shape index: {}]  }
   0x1   :  { %v417_v0 = vld [vmem:[%s632_s5 + $0x8] sm:$0xff]  ;;  %v416_v1 = vld [vmem:[%s632_s5] sm:$0xff] }
   0x2   :  { %v541_v2 = vld [vmem:[%s627_s0] sm:$0xff]  ;;  %v546_v3 = vld [vmem:[%s627_s0 + $0x8] sm:$0xff]  ;;  %164 = vmatpush.bf16.msra.mxu2 %v417_v0 }
   0x3   :  { %v411_v4 = vld [vmem:[%s628_s1 + $0x8] sm:$0xff]  ;;  %v410_v5 = vld [vmem:[%s628_s1] sm:$0xff] }
   0x4   :  { %73 = vmatpush.bf16.msra.mxu0 %v411_v4 }
   0x5   :  { %16 = vsyncpa [#allocation3], 0  ;;  %v42_v6 = vpack.c.bf16 %v546_v3, %v541_v2  ;;  %vm63_vm0 = vcmask 261120   ;;  %v421_v7 = vld [vmem:[%s634_s7 + $0x18] sm:$0xff]  ;;  %v420_v8 = vld [vmem:[%s634_s7 + $0x10] sm:$0xff]  ;;  %vm120_vm1 = vcmask 523264  }
   0x6   :  { %165 = vmatpush.bf16.msra.mxu2 %v416_v1  ;;  %218 = vmatpush.bf16.msra.mxu3 %v421_v7  ;;  %v415_v9 = vld [vmem:[%s630_s3 + $0x18] sm:$0xff]  ;;  %v419_v10 = vld [vmem:[%s634_s7 + $0x8] sm:$0xff]  ;;  %v414_v11 = vld [vmem:[%s630_s3 + $0x10] sm:$0xff]  ;;  %s346_s29 = sshll.u32 %s638_s11, 4  ;;  %s470_s30 = smov 128   ;;  %s347_s29 = int_to_ptr.hbm [resolvable:$true] %s346_s29 }
   0x7   :  { %128 = vmatpush.bf16.msra.mxu1 %v415_v9  ;;  %v418_v12 = vld [vmem:[%s634_s7] sm:$0xff]  ;;  %v413_v13 = vld [vmem:[%s630_s3 + $0x8] sm:$0xff]  ;;  %s471_s1 = smov 8  }
   0x8   :  { %74 = vmatpush.bf16.msra.mxu0 %v410_v5  ;;  %v412_v14 = vld [vmem:[%s630_s3] sm:$0xff] }
   0x9   :  { %392 = vmatmul.msk.bf16.vlgmr.msra.gmra.mxu2 %vm63_vm0, %v42_v6  ;;  %v426_v16 = vld [vmem:[%s629_s2] ss:$0 sm:$0xff] }
   0xa   :  { %219 = vmatpush.bf16.msra.mxu3 %v420_v8  ;;  %v425_v19 = vld [vmem:[%s633_s6] ss:$0 sm:$0xff] }
   0xb   :  { %366 = vmatmul.msk.bf16.vlgmr.msra.gmra.mxu0 %vm63_vm0, %v42_v6  ;;  %129 = vmatpush.bf16.msra.mxu1 %v414_v11  ;;  %v428_v31 = vld [vmem:[%s635_s8] ss:$0 sm:$0xff] }
   0xc   :  { %v427_v40 = vld [vmem:[%s631_s4] ss:$0 sm:$0xff] }
   0xe   :  { %220 = vmatpush.bf16.msra.mxu3 %v419_v10 }
   0xf   :  { %130 = vmatpush.bf16.msra.mxu1 %v413_v13 }
  0x12   :  { %221 = vmatpush.bf16.msra.mxu3 %v418_v12 }
  0x13   :  { %131 = vmatpush.bf16.msra.mxu1 %v412_v14 }
  0x88   :  { %v76_v15 = vpop.f32.mrf.mxu0 }
  0x89   :  { %v77_v18 = vadd.f32 %v426_v16, %v76_v15 }
  0x8b   :  { %v81_v21 = vmax.f32 %v77_v18, 0.0 }
  0x8c   :  { %v167_v17 = vpop.f32.mrf.mxu2 }
  0x8d   :  { %v168_v24 = vadd.f32 %v425_v19, %v167_v17 }
  0x8f   :  { %v172_v28 = vmax.f32 %v168_v24, 0.0 }
  0x90   :  { %v78_v20 = vpop.f32.mrf.mxu0 }
  0x91   :  { %v79_v22 = vadd.f32 %v426_v16, %v78_v20 }
  0x93   :  { %v82_v23 = vmax.f32 %v79_v22, 0.0 }
  0x94   :  { %v169_v25 = vpop.f32.mrf.mxu2 }
  0x95   :  { %v83_v26 = vpack.c.bf16 %v82_v23, %v81_v21  ;;  %v170_v27 = vadd.f32 %v425_v19, %v169_v25 }
  0x97   :  { %383 = vmatmul.msk.bf16.vlgmr.msra.gmra.mxu1 %vm120_vm1, %v83_v26  ;;  %v173_v29 = vmax.f32 %v170_v27, 0.0 }
  0x99   :  { %v174_v30 = vpack.c.bf16 %v173_v29, %v172_v28 }
  0x9b   :  { %409 = vmatmul.msk.bf16.vlgmr.msra.gmra.mxu3 %vm120_vm1, %v174_v30 }
 0x114   :  { %v133_v38 = vpop.f32.mrf.mxu1 }
 0x115   :  { %v134_v43 = vadd.f32 %v427_v40, %v133_v38 }
 0x11c   :  { %v135_v50 = vpop.f32.mrf.mxu1 }
 0x11d   :  { %v136_v54 = vadd.f32 %v427_v40, %v135_v50 }
 0x11e   :  { %v223_v32 = vpop.f32.mrf.mxu3 }
 0x11f   :  { %v224_v33 = vadd.f32 %v428_v31, %v223_v32 }
 0x121   :  { %v228_v34 = vmul.f32 0.5, %v224_v33 }
 0x123   :  { %431 = vtanh.f32 %v228_v34 }
 0x126   :  { %v225_v35 = vpop.f32.mrf.mxu3 }
 0x127   :  { %v226_v36 = vadd.f32 %v428_v31, %v225_v35 }
 0x129   :  { %v432_v37 = vpop.eup %431  ;;  %v229_v39 = vmul.f32 0.5, %v226_v36 }
 0x12a   :  { %v232_v41 = vadd.f32 1.0, %v432_v37 }
 0x12b   :  { %433 = vtanh.f32 %v229_v39  ;;  %v429_v39 = vld [vmem:[%s636_s9] ss:$0 sm:$0xff]  ;;  %s469_s9 = smov [#allocation2]  }
 0x12c   :  { %v234_v42 = vmul.f32 0.5, %v232_v41 }
 0x12e   :  { %v238_v44 = vsub.f32 1.0, %v234_v42  ;;  %v236_v45 = vmul.f32 %v234_v42, %v541_v2 }
 0x130   :  { %v240_v46 = vmul.f32 %v238_v44, %v134_v43 }
 0x131   :  { %v434_v47 = vpop.eup %433 }
 0x132   :  { %v233_v48 = vadd.f32 1.0, %v434_v47  ;;  %v595_v49 = vadd.f32 %v240_v46, %v236_v45 }
 0x134   :  { %v235_v51 = vmul.f32 0.5, %v233_v48  ;;  %v246_v52 = vsel %vm63_vm0, %v595_v49, 0.0  ;;  %v252_v53 = vmul.f32 %v595_v49, %v595_v49  ;;  %v430_v48 = vld [vmem:[%s637_s10] ss:$0 sm:$0xff]  ;;  %s344_s10 = sshll.u32 %s469_s9, 4  ;;  %s345_s10 = int_to_ptr.vmem [resolvable:$true] %s344_s10 }
 0x135   :  { %247 = vadd.xlane.f32.xlu0 %v246_v52 }
 0x136   :  { %v239_v55 = vsub.f32 1.0, %v235_v51  ;;  %v254_v56 = vsel %vm63_vm0, %v252_v53, 0.0  ;;  %v237_v57 = vmul.f32 %v235_v51, %v546_v3 }
 0x137   :  { %255 = vadd.xlane.f32.xlu1 %v254_v56 }
 0x138   :  { %v241_v58 = vmul.f32 %v239_v55, %v136_v54 }
 0x13a   :  { %v603_v59 = vadd.f32 %v241_v58, %v237_v57 }
 0x13c   :  { %v249_v60 = vsel %vm63_vm0, %v603_v59, 0.0  ;;  %v253_v61 = vmul.f32 %v603_v59, %v603_v59 }
 0x13d   :  { %250 = vadd.xlane.f32.xlu0 %v249_v60 }
 0x13e   :  { %v257_v62 = vsel %vm63_vm0, %v253_v61, 0.0 }
 0x13f   :  { %258 = vadd.xlane.f32.xlu1 %v257_v62 }
 0x1a8   :  { %v248_v63 = vpop.xlane.xlu0 %247 }
 0x1a9   :  { %v260_v0 = vmul.f32 0.03125, %v248_v63 }
 0x1aa   :  { %v256_v2 = vpop.xlane.xlu1 %255 }
 0x1ab   :  { %v262_v1 = vmul.f32 %v260_v0, %v248_v63  ;;  %v294_v40 = vsub.f32 %v595_v49, %v260_v0 }
 0x1ad   :  { %v264_v4 = vsub.f32 %v256_v2, %v262_v1  ;;  %v299_v46 = vmul.f32 %v429_v39, %v294_v40 }
 0x1af   :  { %v266_v5 = vmul.f32 0.032258064, %v264_v4 }
 0x1b0   :  { %v251_v3 = vpop.xlane.xlu0 %250 }
 0x1b1   :  { %v268_v6 = vmax.f32 %v266_v5, 0.0  ;;  %v610_v7 = vmul.f32 0.03125, %v251_v3 }
 0x1b2   :  { %v259_v9 = vpop.xlane.xlu1 %258 }
 0x1b3   :  { %435 = vrsqrt.f32 %v268_v6  ;;  %v263_v8 = vmul.f32 %v610_v7, %v251_v3  ;;  %vm277_vm2 = vcmp.eq.f32.partialorder %v268_v6, inf  ;;  %v280_v22 = vand.u32 2147483648, %v268_v6 }
 0x1b4   :  { %vm279_vm3 = vcmp.eq.f32.partialorder %v268_v6, 0.0  ;;  %v295_v55 = vsub.f32 %v603_v59, %v610_v7 }
 0x1b5   :  { %v265_v10 = vsub.f32 %v259_v9, %v263_v8 }
 0x1b6   :  { %v300_v61 = vmul.f32 %v429_v39, %v295_v55 }
 0x1b7   :  { %v267_v11 = vmul.f32 0.032258064, %v265_v10 }
 0x1b9   :  { %v436_v12 = vpop.eup %435  ;;  %v269_v14 = vmax.f32 %v267_v11, 0.0 }
 0x1ba   :  { %v271_v13 = vmul.f32 %v436_v12, %v268_v6 }
 0x1bb   :  { %437 = vrsqrt.f32 %v269_v14  ;;  %vm289_vm4 = vcmp.eq.f32.partialorder %v269_v14, inf  ;;  %v292_v31 = vand.u32 2147483648, %v269_v14  ;;  %vm291_vm5 = vcmp.eq.f32.partialorder %v269_v14, 0.0 }
 0x1bc   :  { %v272_v15 = vmul.f32 %v436_v12, %v271_v13 }
 0x1be   :  { %v273_v16 = vmul.f32 0.5, %v272_v15 }
 0x1c0   :  { %v274_v17 = vsub.f32 1.5, %v273_v16 }
 0x1c1   :  { %v438_v18 = vpop.eup %437 }
 0x1c2   :  { %v275_v19 = vmul.f32 %v436_v12, %v274_v17  ;;  %v283_v20 = vmul.f32 %v438_v18, %v269_v14 }
 0x1c4   :  { %v276_v21 = vmul.f32 %v275_v19, %v268_v6  ;;  %v284_v23 = vmul.f32 %v438_v18, %v283_v20 }
 0x1c6   :  { %v278_v24 = vsel %vm277_vm2, %v268_v6, %v276_v21  ;;  %v285_v26 = vmul.f32 0.5, %v284_v23 }
 0x1c7   :  { %v281_v25 = vsel %vm279_vm3, %v280_v22, %v278_v24 }
 0x1c8   :  { %v301_v27 = vadd.f32 1e-06, %v281_v25  ;;  %v286_v28 = vsub.f32 1.5, %v285_v26 }
 0x1ca   :  { %439 = vrcp.f32 %v301_v27  ;;  %v287_v29 = vmul.f32 %v438_v18, %v286_v28  ;;  %v314_v38 = vand.u32 2147483648, %v301_v27  ;;  %v312_v42 = vand.u32 2147483647, %v301_v27 }
 0x1cb   :  { %vm308_vm7 = vweird.f32 %v301_v27 }
 0x1cc   :  { %v288_v30 = vmul.f32 %v287_v29, %v269_v14  ;;  %v315_v44 = vor.u32 1.1754944e-38, %v314_v38  ;;  %vm313_vm9 = vcmp.eq.f32.partialorder %v312_v42, 8.507059e+37 }
 0x1ce   :  { %v290_v32 = vsel %vm289_vm4, %v269_v14, %v288_v30 }
 0x1cf   :  { %v293_v34 = vsel %vm291_vm5, %v292_v31, %v290_v32 }
 0x1d0   :  { %v440_v33 = vpop.eup %439  ;;  %v302_v35 = vadd.f32 1e-06, %v293_v34 }
 0x1d1   :  { %v304_v36 = vmul.f32 %v440_v33, %v301_v27  ;;  %vm309_vm6 = vweird.f32 %v440_v33 }
 0x1d2   :  { %441 = vrcp.f32 %v302_v35  ;;  %vm310_vm8 = vmor %vm308_vm7, %vm309_vm6  ;;  %v329_v49 = vand.u32 2147483648, %v302_v35  ;;  %v327_v57 = vand.u32 2147483647, %v302_v35  ;;  %vm323_vm11 = vweird.f32 %v302_v35 }
 0x1d3   :  { %v305_v37 = vsub.f32 1.0, %v304_v36 }
 0x1d4   :  { %v330_v60 = vor.u32 1.1754944e-38, %v329_v49  ;;  %vm328_vm13 = vcmp.eq.f32.partialorder %v327_v57, 8.507059e+37 }
 0x1d5   :  { %v306_v41 = vmul.f32 %v440_v33, %v305_v37 }
 0x1d7   :  { %v307_v43 = vadd.f32 %v440_v33, %v306_v41 }
 0x1d8   :  { %v442_v45 = vpop.eup %441 }
 0x1d9   :  { %v311_v47 = vsel %vm310_vm8, %v440_v33, %v307_v43  ;;  %v319_v51 = vmul.f32 %v442_v45, %v302_v35  ;;  %vm324_vm10 = vweird.f32 %v442_v45 }
 0x1da   :  { %v316_v50 = vsel %vm313_vm9, %v315_v44, %v311_v47  ;;  %vm325_vm12 = vmor %vm323_vm11, %vm324_vm10 }
 0x1db   :  { %v317_v52 = vmul.f32 %v316_v50, %v299_v46  ;;  %v320_v53 = vsub.f32 1.0, %v319_v51 }
 0x1dd   :  { %v336_v54 = vadd.f32 %v430_v48, %v317_v52  ;;  %v321_v56 = vmul.f32 %v442_v45, %v320_v53 }
 0x1df   :  { %338 = vst.msk [vmem:[#allocation2] sm:$0xff] %vm63_vm0, %v336_v54  ;;  %v322_v58 = vadd.f32 %v442_v45, %v321_v56 }
 0x1e1   :  { %v326_v62 = vsel %vm325_vm12, %v442_v45, %v322_v58 }
 0x1e2   :  { %v331_v63 = vsel %vm328_vm13, %v330_v60, %v326_v62 }
 0x1e3   :  { %v332_v59 = vmul.f32 %v331_v63, %v300_v61 }
 0x1e5   :  { %v337_v0 = vadd.f32 %v430_v48, %v332_v59 }
 0x1e7   :  { %339 = vst.msk [vmem:[#allocation2 + $0x8] sm:$0xff] %vm63_vm0, %v337_v0 }
 0x1e8   :  { %352 = dma.vmem_to_hbm [thread:$0]  %s345_s10, 256, %s347_s29, [#allocation3], %s470_s30, %s470_s30, %s471_s1  }
 0x1e9   :  { %467 = dma.done.wait [#allocation3], 256  }
 0x1ea   :  { %468 = vsyncadd [#allocation3], 4294967040 }
 0x1eb   :  { %357 = vsyncpa [#allocation3], 1 }

</bundles_post_ra>
